<compile_context>
chip_gen: v7x
topology: tpu7x:2x2x1
jax: 0.10.0
libtpu: 0.0.40
codegen_flags: <defaults>
</compile_context>

<pallas_src>
import functools

import jax
import jax.numpy as jnp
from jax.experimental import pallas as pl
from jax.experimental.pallas import tpu as pltpu


def _upsample_onestep_kernel(x_ref, w_ref, b_ref, o_ref, *, H, W, C_out, scale):
    # x_ref: [1, H+2, W+2, C_in]      zero-padded NHWC input, one batch image
    # w_ref: [9*C_in, C_conv]         im2col weight, C_conv = scale^2 * C_out
    # b_ref: [1, C_conv]
    # o_ref: [1, C_out, H, r, W, r]   pixel-shuffled output (wrapper merges dims)
    r = scale
    C_conv = r * r * C_out

    # im2col in VMEM: 9 shifted views, concatenated along the channel (lane) axis.
    patches = []
    for ky in range(3):
        for kx in range(3):
            patches.append(x_ref[0, ky:ky + H, kx:kx + W, :])
    patches = jnp.concatenate(patches, axis=-1)            # [H, W, 9*C_in]
    patches = patches.reshape(H * W, patches.shape[-1])    # [H*W, 9*C_in]

    acc = jnp.dot(patches, w_ref[...], preferred_element_type=jnp.float32)
    acc = acc + b_ref[...].astype(jnp.float32)             # [H*W, C_conv]
    acc = acc.reshape(H, W, C_conv).astype(o_ref.dtype)    # [H, W, C_conv]

    # Fused PixelShuffle: out[b, c, h*r+i, w*r+j] = conv[b, c*r^2 + i*r + j, h, w]
    # conv channels for a fixed (c, i) are contiguous (j fastest), and the
    # output ref's two minor dims are (W, r), so the store needs no relayout.
    for c in range(C_out):
        for i in range(r):
            base = (c * r + i) * r
            o_ref[0, c, :, i, :, :] = acc[:, :, base:base + r]   # [H, W, r]


def upsample_one_step(x, weight, bias, *, scale):
    """UpsampleOneStep forward.

    x:      [B, C_in, H, W]                (torch NCHW layout)
    weight: [scale^2*C_out, C_in, 3, 3]    (torch Conv2d OIHW layout)
    bias:   [scale^2*C_out]
    returns [B, C_out, H*scale, W*scale]
    """
    B, C_in, H, W = x.shape
    C_conv = weight.shape[0]
    r = scale
    C_out = C_conv // (r * r)

    # NCHW -> NHWC + spatial zero pad of 1 (conv padding=1). Single fused XLA op.
    x_nhwc = jnp.transpose(x, (0, 2, 3, 1))
    x_pad = jnp.pad(x_nhwc, ((0, 0), (1, 1), (1, 1), (0, 0)))

    # im2col weight: W_k[(ky*3+kx)*C_in + cin, k] = weight[k, cin, ky, kx]
    w_k = jnp.transpose(weight, (2, 3, 1, 0)).reshape(3 * 3 * C_in, C_conv)
    b2d = bias.reshape(1, C_conv)

    kernel = functools.partial(
        _upsample_onestep_kernel, H=H, W=W, C_out=C_out, scale=r)

    itemsize = jnp.dtype(x.dtype).itemsize
    flops = 2 * B * H * W * 9 * C_in * C_conv
    bytes_accessed = (x_pad.size + w_k.size + b2d.size
                      + B * C_out * H * r * W * r) * itemsize

    # TODO(synk): for very large feature maps, tile H with a 1-row halo
    # (manual DMA) instead of keeping the whole padded image resident in VMEM.
    out6 = pl.pallas_call(
        kernel,
        out_shape=jax.ShapeDtypeStruct((B, C_out, H, r, W, r), x.dtype),
        grid_spec=pltpu.PrefetchScalarGridSpec(
            num_scalar_prefetch=0,
            grid=(B,),
            in_specs=[
                pl.BlockSpec((1, H + 2, W + 2, C_in), lambda b: (b, 0, 0, 0)),
                pl.BlockSpec((3 * 3 * C_in, C_conv), lambda b: (0, 0)),
                pl.BlockSpec((1, C_conv), lambda b: (0, 0)),
            ],
            out_specs=pl.BlockSpec((1, C_out, H, r, W, r),
                                   lambda b: (b, 0, 0, 0, 0, 0)),
        ),
        compiler_params=pltpu.CompilerParams(
            dimension_semantics=("parallel",),
        ),
        cost_estimate=pl.CostEstimate(
            flops=flops, transcendentals=0, bytes_accessed=bytes_accessed),
    )(x_pad, w_k, b2d)

    # Merging adjacent contiguous dims (H,r)->H*r and (W,r)->W*r: metadata-only.
    return out6.reshape(B, C_out, H * r, W * r)


if __name__ == "__main__":
    # Small shapes consistent with the module: lightweight-SR style head.
    B, C_in, C_out, scale = 2, 32, 3, 2
    H = W = 16
    C_conv = scale * scale * C_out

    key = jax.random.PRNGKey(0)
    k_x, k_w, k_b = jax.random.split(key, 3)
    x = jax.random.normal(k_x, (B, C_in, H, W), dtype=jnp.float32)
    weight = jax.random.normal(k_w, (C_conv, C_in, 3, 3), dtype=jnp.float32) * 0.05
    bias = jax.random.normal(k_b, (C_conv,), dtype=jnp.float32) * 0.05

    out = upsample_one_step(x, weight, bias, scale=scale)
    out = jax.block_until_ready(out)

    # Pure-JAX reference: conv2d(3x3, pad=1) + PixelShuffle(scale).
    ref_conv = jax.lax.conv_general_dilated(
        x, weight, window_strides=(1, 1), padding=((1, 1), (1, 1)),
        dimension_numbers=("NCHW", "OIHW", "NCHW"),
        precision=jax.lax.Precision.HIGHEST)
    ref_conv = ref_conv + bias.reshape(1, C_conv, 1, 1)
    ref = ref_conv.reshape(B, C_out, scale, scale, H, W)
    ref = jnp.transpose(ref, (0, 1, 4, 2, 5, 3)).reshape(
        B, C_out, H * scale, W * scale)

    assert out.shape == (B, C_out, H * scale, W * scale)
    max_err = float(jnp.max(jnp.abs(out - ref)))
    assert jnp.allclose(out, ref, atol=1e-4, rtol=1e-4), max_err

    print("KERNEL_OK")
</pallas_src>

<mosaic_0001>
module attributes {stable_mosaic.version = 11 : i64} {
  func.func @_upsample_onestep_kernel(%arg0: i32, %arg1: memref<1x18x18x32xf32, #tpu.memory_space<vmem>>, %arg2: memref<288x12xf32, #tpu.memory_space<vmem>>, %arg3: memref<1x12xf32, #tpu.memory_space<vmem>>, %arg4: memref<1x3x16x2x16x2xf32, #tpu.memory_space<vmem>>) attributes {dimension_semantics = [#tpu.dimension_semantics<parallel>], iteration_bounds = array<i64: 2>, scalar_prefetch = 0 : i64, scratch_operands = 0 : i64, tpu.core_type = #tpu.core_type<tc>, window_params = [{transform_indices = @transform_0, window_bounds = array<i64: 1, 18, 18, 32>}, {pipeline_mode = #tpu.pipeline_mode<synchronous>, transform_indices = @transform_1, window_bounds = array<i64: 288, 12>}, {pipeline_mode = #tpu.pipeline_mode<synchronous>, transform_indices = @transform_2, window_bounds = array<i64: 1, 12>}, {transform_indices = @transform_3, window_bounds = array<i64: 1, 3, 16, 2, 16, 2>}]} {
    %c0 = arith.constant 0 : index
    %c0_0 = arith.constant 0 : index
    %c0_1 = arith.constant 0 : index
    %c0_2 = arith.constant 0 : index
    %0 = vector.load %arg1[%c0, %c0_0, %c0_1, %c0_2] : memref<1x18x18x32xf32, #tpu.memory_space<vmem>>, vector<1x16x16x32xf32>
    %1 = vector.shape_cast %0 : vector<1x16x16x32xf32> to vector<16x16x32xf32>
    %c0_3 = arith.constant 0 : index
    %c0_4 = arith.constant 0 : index
    %c1 = arith.constant 1 : index
    %c0_5 = arith.constant 0 : index
    %2 = vector.load %arg1[%c0_3, %c0_4, %c1, %c0_5] : memref<1x18x18x32xf32, #tpu.memory_space<vmem>>, vector<1x16x16x32xf32>
    %3 = vector.shape_cast %2 : vector<1x16x16x32xf32> to vector<16x16x32xf32>
    %c0_6 = arith.constant 0 : index
    %c0_7 = arith.constant 0 : index
    %c2 = arith.constant 2 : index
    %c0_8 = arith.constant 0 : index
    %4 = vector.load %arg1[%c0_6, %c0_7, %c2, %c0_8] : memref<1x18x18x32xf32, #tpu.memory_space<vmem>>, vector<1x16x16x32xf32>
    %5 = vector.shape_cast %4 : vector<1x16x16x32xf32> to vector<16x16x32xf32>
    %c0_9 = arith.constant 0 : index
    %c1_10 = arith.constant 1 : index
    %c0_11 = arith.constant 0 : index
    %c0_12 = arith.constant 0 : index
    %6 = vector.load %arg1[%c0_9, %c1_10, %c0_11, %c0_12] : memref<1x18x18x32xf32, #tpu.memory_space<vmem>>, vector<1x16x16x32xf32>
    %7 = vector.shape_cast %6 : vector<1x16x16x32xf32> to vector<16x16x32xf32>
    %c0_13 = arith.constant 0 : index
    %c1_14 = arith.constant 1 : index
    %c1_15 = arith.constant 1 : index
    %c0_16 = arith.constant 0 : index
    %8 = vector.load %arg1[%c0_13, %c1_14, %c1_15, %c0_16] : memref<1x18x18x32xf32, #tpu.memory_space<vmem>>, vector<1x16x16x32xf32>
    %9 = vector.shape_cast %8 : vector<1x16x16x32xf32> to vector<16x16x32xf32>
    %c0_17 = arith.constant 0 : index
    %c1_18 = arith.constant 1 : index
    %c2_19 = arith.constant 2 : index
    %c0_20 = arith.constant 0 : index
    %10 = vector.load %arg1[%c0_17, %c1_18, %c2_19, %c0_20] : memref<1x18x18x32xf32, #tpu.memory_space<vmem>>, vector<1x16x16x32xf32>
    %11 = vector.shape_cast %10 : vector<1x16x16x32xf32> to vector<16x16x32xf32>
    %c0_21 = arith.constant 0 : index
    %c2_22 = arith.constant 2 : index
    %c0_23 = arith.constant 0 : index
    %c0_24 = arith.constant 0 : index
    %12 = vector.load %arg1[%c0_21, %c2_22, %c0_23, %c0_24] : memref<1x18x18x32xf32, #tpu.memory_space<vmem>>, vector<1x16x16x32xf32>
    %13 = vector.shape_cast %12 : vector<1x16x16x32xf32> to vector<16x16x32xf32>
    %c0_25 = arith.constant 0 : index
    %c2_26 = arith.constant 2 : index
    %c1_27 = arith.constant 1 : index
    %c0_28 = arith.constant 0 : index
    %14 = vector.load %arg1[%c0_25, %c2_26, %c1_27, %c0_28] : memref<1x18x18x32xf32, #tpu.memory_space<vmem>>, vector<1x16x16x32xf32>
    %15 = vector.shape_cast %14 : vector<1x16x16x32xf32> to vector<16x16x32xf32>
    %c0_29 = arith.constant 0 : index
    %c2_30 = arith.constant 2 : index
    %c2_31 = arith.constant 2 : index
    %c0_32 = arith.constant 0 : index
    %16 = vector.load %arg1[%c0_29, %c2_30, %c2_31, %c0_32] : memref<1x18x18x32xf32, #tpu.memory_space<vmem>>, vector<1x16x16x32xf32>
    %17 = vector.shape_cast %16 : vector<1x16x16x32xf32> to vector<16x16x32xf32>
    %18 = tpu.concatenate %1, %3, %5, %7, %9, %11, %13, %15, %17 in 2 : vector<16x16x32xf32>, vector<16x16x32xf32>, vector<16x16x32xf32>, vector<16x16x32xf32>, vector<16x16x32xf32>, vector<16x16x32xf32>, vector<16x16x32xf32>, vector<16x16x32xf32>, vector<16x16x32xf32> -> vector<16x16x288xf32>
    %19 = vector.shape_cast %18 : vector<16x16x288xf32> to vector<256x288xf32>
    %c0_33 = arith.constant 0 : index
    %c0_34 = arith.constant 0 : index
    %20 = vector.load %arg2[%c0_33, %c0_34] : memref<288x12xf32, #tpu.memory_space<vmem>>, vector<288x12xf32>
    %cst = arith.constant dense<0.000000e+00> : vector<256x12xf32>
    %21 = tpu.matmul %19, %20, %cst {dimension_numbers = #tpu.dot_dimension_numbers<[1], [0], [0], [1], [0, 0, 1, 1], [], []>} : vector<256x288xf32>, vector<288x12xf32>, vector<256x12xf32> -> vector<256x12xf32>
    %c0_35 = arith.constant 0 : index
    %c0_36 = arith.constant 0 : index
    %22 = vector.load %arg3[%c0_35, %c0_36] : memref<1x12xf32, #tpu.memory_space<vmem>>, vector<1x12xf32>
    %23 = vector.broadcast %22 : vector<1x12xf32> to vector<256x12xf32>
    %24 = arith.addf %21, %23 : vector<256x12xf32>
    %25 = vector.shape_cast %24 : vector<256x12xf32> to vector<16x16x12xf32>
    %26 = vector.extract_strided_slice %25 {offsets = [0, 0, 0], sizes = [16, 16, 2], strides = [1, 1, 1]} : vector<16x16x12xf32> to vector<16x16x2xf32>
    %c0_37 = arith.constant 0 : index
    %c0_38 = arith.constant 0 : index
    %c0_39 = arith.constant 0 : index
    %c0_40 = arith.constant 0 : index
    %c0_41 = arith.constant 0 : index
    %c0_42 = arith.constant 0 : index
    %27 = vector.load %arg4[%c0_37, %c0_38, %c0_39, %c0_40, %c0_41, %c0_42] : memref<1x3x16x2x16x2xf32, #tpu.memory_space<vmem>>, vector<1x1x16x1x16x2xf32>
    %28 = vector.shape_cast %27 : vector<1x1x16x1x16x2xf32> to vector<16x16x2xf32>
    %29 = vector.shape_cast %26 : vector<16x16x2xf32> to vector<1x1x16x1x16x2xf32>
    tpu.vector_store %arg4[%c0_37, %c0_38, %c0_39, %c0_40, %c0_41, %c0_42], %29 {strides = array<i32>} : memref<1x3x16x2x16x2xf32, #tpu.memory_space<vmem>>, vector<1x1x16x1x16x2xf32>,
    %30 = vector.extract_strided_slice %25 {offsets = [0, 0, 2], sizes = [16, 16, 2], strides = [1, 1, 1]} : vector<16x16x12xf32> to vector<16x16x2xf32>
    %c0_43 = arith.constant 0 : index
    %c0_44 = arith.constant 0 : index
    %c0_45 = arith.constant 0 : index
    %c1_46 = arith.constant 1 : index
    %c0_47 = arith.constant 0 : index
    %c0_48 = arith.constant 0 : index
    %31 = vector.load %arg4[%c0_43, %c0_44, %c0_45, %c1_46, %c0_47, %c0_48] : memref<1x3x16x2x16x2xf32, #tpu.memory_space<vmem>>, vector<1x1x16x1x16x2xf32>
    %32 = vector.shape_cast %31 : vector<1x1x16x1x16x2xf32> to vector<16x16x2xf32>
    %33 = vector.shape_cast %30 : vector<16x16x2xf32> to vector<1x1x16x1x16x2xf32>
    tpu.vector_store %arg4[%c0_43, %c0_44, %c0_45, %c1_46, %c0_47, %c0_48], %33 {strides = array<i32>} : memref<1x3x16x2x16x2xf32, #tpu.memory_space<vmem>>, vector<1x1x16x1x16x2xf32>,
    %34 = vector.extract_strided_slice %25 {offsets = [0, 0, 4], sizes = [16, 16, 2], strides = [1, 1, 1]} : vector<16x16x12xf32> to vector<16x16x2xf32>
    %c0_49 = arith.constant 0 : index
    %c1_50 = arith.constant 1 : index
    %c0_51 = arith.constant 0 : index
    %c0_52 = arith.constant 0 : index
    %c0_53 = arith.constant 0 : index
    %c0_54 = arith.constant 0 : index
    %35 = vector.load %arg4[%c0_49, %c1_50, %c0_51, %c0_52, %c0_53, %c0_54] : memref<1x3x16x2x16x2xf32, #tpu.memory_space<vmem>>, vector<1x1x16x1x16x2xf32>
    %36 = vector.shape_cast %35 : vector<1x1x16x1x16x2xf32> to vector<16x16x2xf32>
    %37 = vector.shape_cast %34 : vector<16x16x2xf32> to vector<1x1x16x1x16x2xf32>
    tpu.vector_store %arg4[%c0_49, %c1_50, %c0_51, %c0_52, %c0_53, %c0_54], %37 {strides = array<i32>} : memref<1x3x16x2x16x2xf32, #tpu.memory_space<vmem>>, vector<1x1x16x1x16x2xf32>,
    %38 = vector.extract_strided_slice %25 {offsets = [0, 0, 6], sizes = [16, 16, 2], strides = [1, 1, 1]} : vector<16x16x12xf32> to vector<16x16x2xf32>
    %c0_55 = arith.constant 0 : index
    %c1_56 = arith.constant 1 : index
    %c0_57 = arith.constant 0 : index
    %c1_58 = arith.constant 1 : index
    %c0_59 = arith.constant 0 : index
    %c0_60 = arith.constant 0 : index
    %39 = vector.load %arg4[%c0_55, %c1_56, %c0_57, %c1_58, %c0_59, %c0_60] : memref<1x3x16x2x16x2xf32, #tpu.memory_space<vmem>>, vector<1x1x16x1x16x2xf32>
    %40 = vector.shape_cast %39 : vector<1x1x16x1x16x2xf32> to vector<16x16x2xf32>
    %41 = vector.shape_cast %38 : vector<16x16x2xf32> to vector<1x1x16x1x16x2xf32>
    tpu.vector_store %arg4[%c0_55, %c1_56, %c0_57, %c1_58, %c0_59, %c0_60], %41 {strides = array<i32>} : memref<1x3x16x2x16x2xf32, #tpu.memory_space<vmem>>, vector<1x1x16x1x16x2xf32>,
    %42 = vector.extract_strided_slice %25 {offsets = [0, 0, 8], sizes = [16, 16, 2], strides = [1, 1, 1]} : vector<16x16x12xf32> to vector<16x16x2xf32>
    %c0_61 = arith.constant 0 : index
    %c2_62 = arith.constant 2 : index
    %c0_63 = arith.constant 0 : index
    %c0_64 = arith.constant 0 : index
    %c0_65 = arith.constant 0 : index
    %c0_66 = arith.constant 0 : index
    %43 = vector.load %arg4[%c0_61, %c2_62, %c0_63, %c0_64, %c0_65, %c0_66] : memref<1x3x16x2x16x2xf32, #tpu.memory_space<vmem>>, vector<1x1x16x1x16x2xf32>
    %44 = vector.shape_cast %43 : vector<1x1x16x1x16x2xf32> to vector<16x16x2xf32>
    %45 = vector.shape_cast %42 : vector<16x16x2xf32> to vector<1x1x16x1x16x2xf32>
    tpu.vector_store %arg4[%c0_61, %c2_62, %c0_63, %c0_64, %c0_65, %c0_66], %45 {strides = array<i32>} : memref<1x3x16x2x16x2xf32, #tpu.memory_space<vmem>>, vector<1x1x16x1x16x2xf32>,
    %46 = vector.extract_strided_slice %25 {offsets = [0, 0, 10], sizes = [16, 16, 2], strides = [1, 1, 1]} : vector<16x16x12xf32> to vector<16x16x2xf32>
    %c0_67 = arith.constant 0 : index
    %c2_68 = arith.constant 2 : index
    %c0_69 = arith.constant 0 : index
    %c1_70 = arith.constant 1 : index
    %c0_71 = arith.constant 0 : index
    %c0_72 = arith.constant 0 : index
    %47 = vector.load %arg4[%c0_67, %c2_68, %c0_69, %c1_70, %c0_71, %c0_72] : memref<1x3x16x2x16x2xf32, #tpu.memory_space<vmem>>, vector<1x1x16x1x16x2xf32>
    %48 = vector.shape_cast %47 : vector<1x1x16x1x16x2xf32> to vector<16x16x2xf32>
    %49 = vector.shape_cast %46 : vector<16x16x2xf32> to vector<1x1x16x1x16x2xf32>
    tpu.vector_store %arg4[%c0_67, %c2_68, %c0_69, %c1_70, %c0_71, %c0_72], %49 {strides = array<i32>} : memref<1x3x16x2x16x2xf32, #tpu.memory_space<vmem>>, vector<1x1x16x1x16x2xf32>,
    return
  }
  func.func @transform_0(%arg0: i32) -> (i32, i32, i32, i32) {
    %c0_i32 = arith.constant 0 : i32
    %c0_i32_0 = arith.constant 0 : i32
    %c0_i32_1 = arith.constant 0 : i32
    %c0_i32_2 = arith.constant 0 : i32
    return %arg0, %c0_i32, %c0_i32_0, %c0_i32_1 : i32, i32, i32, i32
  }
  func.func @transform_1(%arg0: i32) -> (i32, i32) {
    %c0_i32 = arith.constant 0 : i32
    %c0_i32_0 = arith.constant 0 : i32
    %c0_i32_1 = arith.constant 0 : i32
    return %c0_i32, %c0_i32_0 : i32, i32
  }
  func.func @transform_2(%arg0: i32) -> (i32, i32) {
    %c0_i32 = arith.constant 0 : i32
    %c0_i32_0 = arith.constant 0 : i32
    %c0_i32_1 = arith.constant 0 : i32
    return %c0_i32, %c0_i32_0 : i32, i32
  }
  func.func @transform_3(%arg0: i32) -> (i32, i32, i32, i32, i32, i32) {
    %c0_i32 = arith.constant 0 : i32
    %c0_i32_0 = arith.constant 0 : i32
    %c0_i32_1 = arith.constant 0 : i32
    %c0_i32_2 = arith.constant 0 : i32
    %c0_i32_3 = arith.constant 0 : i32
    %c0_i32_4 = arith.constant 0 : i32
    return %arg0, %c0_i32, %c0_i32_0, %c0_i32_1, %c0_i32_2, %c0_i32_3 : i32, i32, i32, i32, i32, i32
  }
}

</mosaic_0001>

<bundles_post_ra>
// kernel: tpu_custom_call.1
= control target key start
LH: loop header
LB: loop body
LE: loop exit
PB: predicated region body
PF: predicated region fallthrough
CT: control target
= control target key end

     0   :  { %8 = vsyncpa [#allocation3], 0  ;;  %s3959_s12 = smov 0   ;;  %s6142_s0 = inlined_call_operand.vmem [shape: f32[2,18,18,32], index: 0, kind: input, shape index: {}]   ;;  %s6143_s1 = inlined_call_operand.vmem [shape: f32[288,12], index: 1, kind: input, shape index: {}]   ;;  %s6144_s2 = inlined_call_operand.hbm [shape: f32[1,12], index: 2, kind: input, shape index: {}]   ;;  %s6145_s3 = inlined_call_operand.vmem [shape: f32[2,3,16,2,16,2], index: 3, kind: output, shape index: {}]  }
   0x1 LB: > { %s3965_s13 = sadd.s32 4294967295, %s3927_s12   ;;  %p2805_p0 = scmp.ge.s32.totalorder %s3927_s12, 1  ;;  %s3927_s12 = sphi %s3959_s12, %s14_s12  }
   0x2   : > { %p113_p1 = scmp.lt.s32.totalorder %s3927_s12, 3  ;;  %p6146_p3 = scmp.eq.s32.totalorder %s3965_s13, 0 }
   0x3   : > { %s3929_s15 = smov [#allocation2]   ;;  %s3889_s20 = scalar_lea.hbm %s6144_s2, 16 }
   0x4   : > { %p3969_p2 = pnand %p2805_p0, %p113_p1  ;;  %s129_s16 = sshll.u32 %s3929_s15, 4  ;;  %s130_s16 = int_to_ptr.vmem [resolvable:$true] %s129_s16 }
   0x5   : > { %p3890_p6 = scmp.ne.s32.totalorder %s6144_s2, %s3889_s20  ;;  %p3896_p10 = scmp.lt.u32.totalorder %s3889_s20, %s6144_s2 }
   0x6   : > { %s6180_s14 = scalar_select %p3969_p2, 1, 0 }
   0x7   : > { %p3385_p4 = pneg %p3969_p2 }
   0x9   : > { %p3978_p5 = pnand %p6146_p3, %p3385_p4 }
   0xb   : > { %p3891_p7 = pneg %p3978_p5 }
   0xd   : > { %p3892_p8 = pnand %p3891_p7, %p3890_p6 }
   0xf   : > { %p3893_p9 = pneg %p3892_p8 }
  0x11   : > { %p3898_p11 = pnand %p3896_p10, %p3893_p9 }
  0x13   : > { %3901 = shalt.err (!%p3898_p11)
}
  0x14   : > { %s3902_s25 = scalar_lea.vmem %s130_s16, 16  ;;  %s3909_s26 = scalar_lea.vmem %s130_s16, 32 }
  0x15   : > { %p3903_p12 = scmp.ne.s32.totalorder %s130_s16, %s3902_s25  ;;  %p3910_p1 = scmp.lt.s32.totalorder %s130_s16, %s130_s16 }
  0x16   : > { %p3911_p4 = scmp.lt.s32.totalorder %s3909_s26, %s3902_s25 }
  0x17   : > { %p3905_p13 = pnand %p3903_p12, %p3891_p7 }
  0x18   : > { %p3912_p3 = por %p3911_p4, %p3910_p1 }
  0x19   : > { %p3906_p0 = pneg %p3905_p13 }
  0x1b   : > { %p3913_p2 = pnand %p3912_p3, %p3906_p0 }
  0x1d   : > { %3916 = shalt.err (!%p3913_p2)
}
  0x1e   : > { %3388 = dma.hbm_to_vmem [thread:$0]  (!%p3978_p5), %s6144_s2, 16, %s130_s16, [#allocation3]  }
  0x1f   : > { %p6182_p6 = scmp.ne.s32.totalorder %s6180_s14, 0 }
  0x21   : > { %150 = sbr.rel (%p6182_p6) target bundleno = 993 (0x3e1), region = 32 }
  0x28   : > { %p6183_p8 = scmp.eq.s32.totalorder %s3965_s13, 0 }
  0x2a   : > { %3922 = dma.done.wait (%p6183_p8), [#allocation3], 16   ;;  %p6184_p7 = pmov %p6183_p8 }
  0x2b   : > { %p174_p9 = scmp.lt.s32.totalorder %s3965_s13, 1  ;;  %s3930_s6 = smov 32   ;;  %v1449_v39 = vld [vmem:[%s6143_s1 + $0x60] sm:$0xff]  ;;  %vm1242_vm0 = vcmask 261120   ;;  %vm1275_vm1 = vcmask 523264   ;;  %vm1308_vm2 = vcmask 785408  }
  0x2c   : > { %3924 = vsyncadd (%p6184_p7), [#allocation3], 4294967280  ;;  %s3931_s7 = smov 64   ;;  %s3932_s8 = smov 96   ;;  %vm2026_vm3 = vcmask 15360  }
  0x2d   : > { %s6261_s13 = smov (!%p174_p9, %s3965_s13), 1  ;;  %s3935_s20 = smov 124  }
  0x2e   : > { %s3379_s29 = smul.u32 432, %s6261_s13  ;;  %s3936_s21 = smov 122  }
  0x2f   : > { %s3937_s22 = smov 120   ;;  %s3938_s23 = smov 118  }
  0x30   : > { %s4012_s5 = scalar_lea.vmem %s6142_s0, %s3379_s29 }
  0x31   : > { %v4015_v0 = vld [vmem:[%s4012_s5 + $0x31] sm:$0xff]  ;;  %v4018_v1 = vld [vmem:[%s4012_s5 + $0x39] sm:$0xff]  ;;  %v216_v2 = vld [vmem:[%s4012_s5 + $0x1] sm:$0xff] }
  0x32   : > { %v3419_v3 = vpack.i.bf16 %v4018_v1, %v4015_v0  ;;  %v217_v4 = vld [vmem:[%s4012_s5 + $0x9] sm:$0xff]  ;;  %v4028_v6 = vld [vmem:[%s4012_s5 + $0x51] sm:$0xff]  ;;  %v218_v8 = vld [vmem:[%s4012_s5 + $0x19] sm:$0xff] }
  0x33   : > { %v4025_v5 = vld [vmem:[%s4012_s5 + $0x49] sm:$0xff]  ;;  %v3409_v7 = vpack.i.bf16 %v217_v4, %v216_v2  ;;  %v219_v9 = vld [vmem:[%s4012_s5 + $0x21] sm:$0xff]  ;;  %v4037_v12 = vld [vmem:[%s4012_s5 + $0x79] sm:$0xff] }
  0x34   : > { %3420 = vrot.lane.b32.xlu1 %v3419_v3, %s3930_s6  ;;  %v3424_v10 = vpack.i.bf16 %v4028_v6, %v4025_v5  ;;  %v3414_v11 = vpack.i.bf16 %v219_v9, %v218_v8  ;;  %v4040_v13 = vld [vmem:[%s4012_s5 + $0x81] sm:$0xff]  ;;  %v4046_v15 = vld [vmem:[%s4012_s5 + $0x69] sm:$0xff]  ;;  %v231_v19 = vld [vmem:[%s4012_s5 + $0xb1] sm:$0xff] }
  0x35   : > { %3410 = vrot.lane.b32.xlu0 %v3409_v7, %s3930_s6  ;;  %v4043_v14 = vld [vmem:[%s4012_s5 + $0x61] sm:$0xff]  ;;  %v3434_v16 = vpack.i.bf16 %v4040_v13, %v4037_v12  ;;  %v230_v18 = vld [vmem:[%s4012_s5 + $0xa9] sm:$0xff]  ;;  %v228_v20 = vld [vmem:[%s4012_s5 + $0x91] sm:$0xff] }
  0x36   : > { %v3429_v17 = vpack.i.bf16 %v4046_v15, %v4043_v14  ;;  %v229_v21 = vld [vmem:[%s4012_s5 + $0x99] sm:$0xff]  ;;  %v4059_v22 = vpack.i.bf16 %v231_v19, %v230_v18  ;;  %v235_v25 = vld [vmem:[%s4012_s5 + $0xe1] sm:$0xff]  ;;  %v233_v27 = vld [vmem:[%s4012_s5 + $0xc9] sm:$0xff] }
  0x37   : > { %v4062_v23 = vpack.i.bf16 %v229_v21, %v228_v20  ;;  %v234_v24 = vld [vmem:[%s4012_s5 + $0xd9] sm:$0xff]  ;;  %v232_v26 = vld [vmem:[%s4012_s5 + $0xc1] sm:$0xff]  ;;  %v4069_v28 = vld [vmem:[%s4012_s5 + $0x151] sm:$0xff] }
  0x38   : > { %3425 = vrot.lane.b32.xlu1 %v3424_v10, %s3930_s6  ;;  %v3759_v29 = vpack.i.bf16 %v4069_v28, %v4015_v0  ;;  %v4075_v30 = vpack.i.bf16 %v235_v25, %v234_v24  ;;  %v4079_v31 = vpack.i.bf16 %v233_v27, %v232_v26  ;;  %v238_v32 = vld [vmem:[%s4012_s5 + $0x109] sm:$0xff]  ;;  %v239_v33 = vld [vmem:[%s4012_s5 + $0x111] sm:$0xff]  ;;  %v237_v35 = vld [vmem:[%s4012_s5 + $0xf9] sm:$0xff] }
  0x39   : > { %3415 = vrot.lane.b32.xlu0 %v3414_v11, %s3930_s6  ;;  %v236_v34 = vld [vmem:[%s4012_s5 + $0xf1] sm:$0xff]  ;;  %v4086_v36 = vld [vmem:[%s4012_s5 + $0x169] sm:$0xff]  ;;  %v4089_v37 = vld [vmem:[%s4012_s5 + $0x159] sm:$0xff]  ;;  %v4097_v40 = vpack.i.bf16 %v239_v33, %v238_v32 }
  0x3a   : > { %v4101_v41 = vpack.i.bf16 %v237_v35, %v236_v34  ;;  %v242_v42 = vld [vmem:[%s4012_s5 + $0x139] sm:$0xff]  ;;  %v243_v43 = vld [vmem:[%s4012_s5 + $0x141] sm:$0xff]  ;;  %v241_v45 = vld [vmem:[%s4012_s5 + $0x129] sm:$0xff]  ;;  %v3479_v51 = vpack.i.bf16 %v4089_v37, %v4069_v28 }
  0x3b   : > { %v240_v44 = vld [vmem:[%s4012_s5 + $0x121] sm:$0xff]  ;;  %v4108_v46 = vld [vmem:[%s4012_s5 + $0x171] sm:$0xff]  ;;  %v4114_v48 = vpack.i.bf16 %v243_v43, %v242_v42 }
  0x3c   : > { %3435 = vrot.lane.b32.xlu1 %v3434_v16, %s3930_s6  ;;  %v4118_v49 = vpack.i.bf16 %v241_v45, %v240_v44  ;;  %v3484_v50 = vpack.i.bf16 %v4108_v46, %v4086_v36  ;;  %v250_v52 = vld [vmem:[%s4012_s5 + $0x1a] sm:$0xff]  ;;  %v251_v53 = vld [vmem:[%s4012_s5 + $0x22] sm:$0xff]  ;;  %v249_v55 = vld [vmem:[%s4012_s5 + $0xa] sm:$0xff] }
  0x3d   : > { %3430 = vrot.lane.b32.xlu0 %v3429_v17, %s3930_s6  ;;  %v248_v54 = vld [vmem:[%s4012_s5 + $0x2] sm:$0xff]  ;;  %v4133_v56 = vpack.i.bf16 %v251_v53, %v250_v52  ;;  %v254_v58 = vld [vmem:[%s4012_s5 + $0x4a] sm:$0xff]  ;;  %v255_v59 = vld [vmem:[%s4012_s5 + $0x52] sm:$0xff] }
  0x3e   : > { %v3489_v57 = vpack.i.bf16 %v249_v55, %v248_v54  ;;  %v252_v60 = vld [vmem:[%s4012_s5 + $0x32] sm:$0xff]  ;;  %v253_v61 = vld [vmem:[%s4012_s5 + $0x3a] sm:$0xff]  ;;  %v4142_v62 = vpack.i.bf16 %v255_v59, %v254_v58  ;;  %v259_v3 = vld [vmem:[%s4012_s5 + $0x82] sm:$0xff] }
  0x3f   : > { %v4145_v63 = vpack.i.bf16 %v253_v61, %v252_v60  ;;  %v258_v2 = vld [vmem:[%s4012_s5 + $0x7a] sm:$0xff]  ;;  %v256_v4 = vld [vmem:[%s4012_s5 + $0x62] sm:$0xff]  ;;  %v257_v7 = vld [vmem:[%s4012_s5 + $0x6a] sm:$0xff] }
  0x40   : > { %3445 = vrot.lane.b32.xlu1 %v4059_v22, %s3930_s6  ;;  %v4153_v8 = vpack.i.bf16 %v259_v3, %v258_v2  ;;  %v4157_v9 = vpack.i.bf16 %v257_v7, %v256_v4  ;;  %v262_v10 = vld [vmem:[%s4012_s5 + $0xaa] sm:$0xff]  ;;  %v263_v11 = vld [vmem:[%s4012_s5 + $0xb2] sm:$0xff]  ;;  %v261_v17 = vld [vmem:[%s4012_s5 + $0x9a] sm:$0xff] }
  0x41   : > { %3440 = vrot.lane.b32.xlu0 %v4062_v23, %s3930_s6  ;;  %v260_v16 = vld [vmem:[%s4012_s5 + $0x92] sm:$0xff]  ;;  %v4165_v18 = vpack.i.bf16 %v263_v11, %v262_v10  ;;  %v266_v20 = vld [vmem:[%s4012_s5 + $0xda] sm:$0xff]  ;;  %v267_v21 = vld [vmem:[%s4012_s5 + $0xe2] sm:$0xff] }
  0x42   : > { %v4169_v19 = vpack.i.bf16 %v261_v17, %v260_v16  ;;  %v264_v24 = vld [vmem:[%s4012_s5 + $0xc2] sm:$0xff]  ;;  %v265_v25 = vld [vmem:[%s4012_s5 + $0xca] sm:$0xff]  ;;  %v4177_v26 = vpack.i.bf16 %v267_v21, %v266_v20  ;;  %v271_v33 = vld [vmem:[%s4012_s5 + $0x112] sm:$0xff] }
  0x43   : > { %v4181_v27 = vpack.i.bf16 %v265_v25, %v264_v24  ;;  %v270_v32 = vld [vmem:[%s4012_s5 + $0x10a] sm:$0xff]  ;;  %v268_v34 = vld [vmem:[%s4012_s5 + $0xf2] sm:$0xff]  ;;  %v269_v35 = vld [vmem:[%s4012_s5 + $0xfa] sm:$0xff] }
  0x44   : > { %3455 = vrot.lane.b32.xlu1 %v4075_v30, %s3930_s6  ;;  %v4189_v42 = vpack.i.bf16 %v271_v33, %v270_v32  ;;  %v4193_v43 = vpack.i.bf16 %v269_v35, %v268_v34  ;;  %v274_v44 = vld [vmem:[%s4012_s5 + $0x13a] sm:$0xff]  ;;  %v275_v45 = vld [vmem:[%s4012_s5 + $0x142] sm:$0xff]  ;;  %v278_v54 = vld [vmem:[%s4012_s5 + $0x16a] sm:$0xff]  ;;  %v3933_v34 = vmov 0.0|0.0  }
  0x45   : > { %3450 = vrot.lane.b32.xlu0 %v4079_v31, %s3930_s6  ;;  %v4201_v52 = vpack.i.bf16 %v275_v45, %v274_v44  ;;  %v279_v55 = vld [vmem:[%s4012_s5 + $0x172] sm:$0xff]  ;;  %v277_v58 = vld [vmem:[%s4012_s5 + $0x15a] sm:$0xff]  ;;  %v2819_v16 = vld [vmem:[%s4012_s5 + $0x68] sm:$0xff]  ;;  %3347 = vmatprep.subr.bf16.mxu1 %v3933_v34 }
  0x46   : > { %v4213_v59 = vpack.i.bf16 %v279_v55, %v278_v54  ;;  %v2814_v61 = vld [vmem:[%s4012_s5 + $0x30] sm:$0xff]  ;;  %v2815_v2 = vld [vmem:[%s4012_s5 + $0x38] sm:$0xff]  ;;  %v2813_v4 = vld [vmem:[%s4012_s5 + $0x20] sm:$0xff]  ;;  %3291 = vmatprep.subr.bf16.mxu0 %v3933_v34 }
  0x47   : > { %v2812_v3 = vld [vmem:[%s4012_s5 + $0x18] sm:$0xff]  ;;  %v4225_v7 = vpack.i.bf16 %v2815_v2, %v2814_v61  ;;  %v2818_v11 = vld [vmem:[%s4012_s5 + $0x60] sm:$0xff]  ;;  %v2816_v17 = vld [vmem:[%s4012_s5 + $0x48] sm:$0xff] }
  0x48   : > { %3465 = vrot.lane.b32.xlu1 %v4097_v40, %s3930_s6  ;;  %v3569_v10 = vpack.i.bf16 %v2813_v4, %v2812_v3  ;;  %v2817_v20 = vld [vmem:[%s4012_s5 + $0x50] sm:$0xff]  ;;  %v4235_v21 = vpack.i.bf16 %v2819_v16, %v2818_v11  ;;  %v2823_v32 = vld [vmem:[%s4012_s5 + $0x98] sm:$0xff]  ;;  %v2821_v35 = vld [vmem:[%s4012_s5 + $0x80] sm:$0xff] }
  0x49   : > { %3460 = vrot.lane.b32.xlu0 %v4101_v41, %s3930_s6  ;;  %v4238_v24 = vpack.i.bf16 %v2817_v20, %v2816_v17  ;;  %v2822_v25 = vld [vmem:[%s4012_s5 + $0x90] sm:$0xff]  ;;  %v2820_v33 = vld [vmem:[%s4012_s5 + $0x78] sm:$0xff]  ;;  %v1437_v44 = vld [vmem:[%s6143_s1] sm:$0xff] }
  0x4a   : > { %v1438_v45 = vld [vmem:[%s6143_s1 + $0x8] sm:$0xff]  ;;  %v4258_v54 = vpack.i.bf16 %v2821_v35, %v2820_v33  ;;  %v2826_v55 = vld [vmem:[%s4012_s5 + $0xc0] sm:$0xff]  ;;  %v4266_v61 = vld [vmem:[%s4012_s5 + $0xb0] sm:$0xff] }
  0x4b   : > { %v1439_v2 = vld [vmem:[%s6143_s1 + $0x10] sm:$0xff]  ;;  %v1440_v3 = vld [vmem:[%s6143_s1 + $0x18] sm:$0xff]  ;;  %v1442_v33 = vld [vmem:[%s6143_s1 + $0x28] sm:$0xff] }
  0x4c   : > { %3475 = vrot.lane.b32.xlu1 %v4114_v48, %s3930_s6  ;;  %v3295_v4 = vpack.c.bf16 %v1440_v3, %v1439_v2  ;;  %v2830_v16 = vld [vmem:[%s4012_s5 + $0xf0] sm:$0xff]  ;;  %v2831_v17 = vld [vmem:[%s4012_s5 + $0xf8] sm:$0xff] }
  0x4d   : > { %3470 = vrot.lane.b32.xlu0 %v4118_v49, %s3930_s6  ;;  %v2828_v20 = vld [vmem:[%s4012_s5 + $0xd8] sm:$0xff]  ;;  %v2833_v2 = vld [vmem:[%s4012_s5 + $0x110] sm:$0xff] }
  0x4e   : > { %v1443_v3 = vld [vmem:[%s6143_s1 + $0x30] sm:$0xff]  ;;  %v2938_v0 = vld [vmem:[%s4012_s5 + $0x198] sm:$0xff] }
  0x4f   : > { %v4357_v47 = vld [vmem:[%s4012_s5 + $0x170] sm:$0xff] }
  0x50   : > { %3485 = vrot.lane.b32.xlu1 %v3484_v50, %s3930_s6  ;;  %v272_v50 = vld [vmem:[%s4012_s5 + $0x122] sm:$0xff] }
  0x51   : > { %3480 = vrot.lane.b32.xlu0 %v3479_v51, %s3930_s6  ;;  %v273_v51 = vld [vmem:[%s4012_s5 + $0x12a] sm:$0xff] }
  0x52   : > { %v4205_v53 = vpack.i.bf16 %v273_v51, %v272_v50  ;;  %v3292_v50 = vpack.c.bf16 %v1438_v45, %v1437_v44  ;;  %v4254_v51 = vpack.i.bf16 %v2823_v32, %v2822_v25  ;;  %v2829_v25 = vld [vmem:[%s4012_s5 + $0xe0] sm:$0xff]  ;;  %v4298_v44 = vpack.i.bf16 %v2831_v17, %v2830_v16 }
  0x53   : > { %v1441_v32 = vld [vmem:[%s6143_s1 + $0x20] sm:$0xff]  ;;  %v4301_v45 = vpack.i.bf16 %v2829_v25, %v2828_v20  ;;  %v4324_v20 = vld [vmem:[%s4012_s5 + $0x150] sm:$0xff]  ;;  %v4327_v25 = vld [vmem:[%s4012_s5 + $0x158] sm:$0xff] }
  0x54   : > { %3495 = vrot.lane.b32.xlu1 %v4133_v56, %s3931_s7  ;;  %3363 = vmatpush1.bf16.msra.mxu1 %v3292_v50  ;;  %v3298_v35 = vpack.c.bf16 %v1442_v33, %v1441_v32  ;;  %v2836_v32 = vld [vmem:[%s4012_s5 + $0x138] sm:$0xff]  ;;  %v2837_v33 = vld [vmem:[%s4012_s5 + $0x140] sm:$0xff] }
  0x55   : > { %3490 = vrot.lane.b32.xlu0 %v3489_v57, %s3931_s7  ;;  %v276_v57 = vld [vmem:[%s4012_s5 + $0x152] sm:$0xff]  ;;  %3293 = vmatpush1.bf16.msra.mxu0 %v3292_v50  ;;  %v2834_v50 = vld [vmem:[%s4012_s5 + $0x120] sm:$0xff] }
  0x56   : > { %v4217_v60 = vpack.i.bf16 %v277_v58, %v276_v57  ;;  %v2827_v57 = vld [vmem:[%s4012_s5 + $0xc8] sm:$0xff]  ;;  %3348 = vmatprep.subr.bf16.mxu1 %v3933_v34  ;;  %3294 = vmatprep.subr.bf16.mxu0 %v3933_v34 }
  0x57   : > { %v4263_v58 = vld [vmem:[%s4012_s5 + $0xa8] sm:$0xff] }
  0x58   : > { %3505 = vrot.lane.b32.xlu1 %v4142_v62, %s3931_s7  ;;  %v3599_v11 = vpack.i.bf16 %v4266_v61, %v4263_v58  ;;  %3364 = vmatpush1.bf16.msra.mxu1 %v3295_v4 }
  0x59   : > { %3500 = vrot.lane.b32.xlu0 %v4145_v63, %s3931_s7  ;;  %3296 = vmatpush1.bf16.msra.mxu0 %v3295_v4  ;;  %v1444_v4 = vld [vmem:[%s6143_s1 + $0x38] sm:$0xff] }
  0x5a   : > { %3349 = vmatprep.subr.bf16.mxu1 %v3933_v34  ;;  %3297 = vmatprep.subr.bf16.mxu0 %v3933_v34 }
  0x5c   : > { %3515 = vrot.lane.b32.xlu1 %v4153_v8, %s3931_s7  ;;  %3365 = vmatpush1.bf16.msra.mxu1 %v3298_v35 }
  0x5d   : > { %3510 = vrot.lane.b32.xlu0 %v4157_v9, %s3931_s7  ;;  %3299 = vmatpush1.bf16.msra.mxu0 %v3298_v35  ;;  %v1445_v35 = vld [vmem:[%s6143_s1 + $0x40] sm:$0xff] }
  0x5e   : > { %3350 = vmatprep.subr.bf16.mxu1 %v3933_v34  ;;  %3300 = vmatprep.subr.bf16.mxu0 %v3933_v34 }
  0x60   : > { %3525 = vrot.lane.b32.xlu1 %v4165_v18, %s3931_s7 }
  0x61   : > { %3520 = vrot.lane.b32.xlu0 %v4169_v19, %s3931_s7 }
  0x64   : > { %3535 = vrot.lane.b32.xlu1 %v4177_v26, %s3931_s7 }
  0x65   : > { %3530 = vrot.lane.b32.xlu0 %v4181_v27, %s3931_s7 }
  0x68   : > { %3545 = vrot.lane.b32.xlu1 %v4189_v42, %s3931_s7 }
  0x69   : > { %3540 = vrot.lane.b32.xlu0 %v4193_v43, %s3931_s7 }
  0x6c   : > { %3555 = vrot.lane.b32.xlu1 %v4201_v52, %s3931_s7 }
  0x6d   : > { %3550 = vrot.lane.b32.xlu0 %v4205_v53, %s3931_s7 }
  0x70   : > { %3565 = vrot.lane.b32.xlu1 %v4213_v59, %s3931_s7 }
  0x71   : > { %3560 = vrot.lane.b32.xlu0 %v4217_v60, %s3931_s7 }
  0x74   : > { %3575 = vrot.lane.b32.xlu1 %v4225_v7, %s3932_s8 }
  0x75   : > { %3570 = vrot.lane.b32.xlu0 %v3569_v10, %s3932_s8  ;;  %v4278_v10 = vpack.i.bf16 %v2827_v57, %v2826_v55  ;;  %v2835_v55 = vld [vmem:[%s4012_s5 + $0x128] sm:$0xff] }
  0x76   : > { %v2832_v57 = vld [vmem:[%s4012_s5 + $0x108] sm:$0xff]  ;;  %v4317_v16 = vpack.i.bf16 %v2835_v55, %v2834_v50 }
  0x77   : > { %v4321_v17 = vpack.i.bf16 %v2833_v2, %v2832_v57  ;;  %v1446_v50 = vld [vmem:[%s6143_s1 + $0x48] sm:$0xff]  ;;  %v3634_v57 = vpack.i.bf16 %v4327_v25, %v4324_v20  ;;  %v4345_v2 = vpack.i.bf16 %v2837_v33, %v2836_v32  ;;  %v1448_v32 = vld [vmem:[%s6143_s1 + $0x58] sm:$0xff] }
  0x78   : > { %3585 = vrot.lane.b32.xlu1 %v4235_v21, %s3932_s8  ;;  %v3304_v55 = vpack.c.bf16 %v1446_v50, %v1445_v35  ;;  %v1447_v35 = vld [vmem:[%s6143_s1 + $0x50] sm:$0xff] }
  0x79   : > { %3580 = vrot.lane.b32.xlu0 %v4238_v24, %s3932_s8  ;;  %v3307_v33 = vpack.c.bf16 %v1448_v32, %v1447_v35  ;;  %v1451_v32 = vld [vmem:[%s6143_s1 + $0x70] sm:$0xff] }
  0x7c   : > { %3595 = vrot.lane.b32.xlu1 %v4254_v51, %s3932_s8 }
  0x7d   : > { %3590 = vrot.lane.b32.xlu0 %v4258_v54, %s3932_s8 }
  0x80   : > { %3605 = vrot.lane.b32.xlu1 %v4278_v10, %s3932_s8 }
  0x81   : > { %3600 = vrot.lane.b32.xlu0 %v3599_v11, %s3932_s8  ;;  %v3301_v11 = vpack.c.bf16 %v1444_v4, %v1443_v3  ;;  %v4348_v3 = vld [vmem:[%s4012_s5 + $0x180] sm:$0xff]  ;;  %v4351_v4 = vld [vmem:[%s4012_s5 + $0x188] sm:$0xff] }
  0x82   : > { %v3644_v50 = vpack.i.bf16 %v4351_v4, %v4348_v3 }
  0x83   : > { %3366 = vmatpush1.bf16.msra.mxu1 %v3301_v11  ;;  %3302 = vmatpush1.bf16.msra.mxu0 %v3301_v11  ;;  %v4354_v11 = vld [vmem:[%s4012_s5 + $0x168] sm:$0xff] }
  0x84   : > { %3615 = vrot.lane.b32.xlu1 %v4298_v44, %s3932_s8  ;;  %3351 = vmatprep.subr.bf16.mxu1 %v3933_v34 }
  0x85   : > { %3610 = vrot.lane.b32.xlu0 %v4301_v45, %s3932_s8  ;;  %3303 = vmatprep.subr.bf16.mxu0 %v3933_v34 }
  0x87   : > { %3367 = vmatpush1.bf16.msra.mxu1 %v3304_v55  ;;  %3305 = vmatpush1.bf16.msra.mxu0 %v3304_v55  ;;  %v3639_v55 = vpack.i.bf16 %v4357_v47, %v4354_v11 }
  0x88   : > { %3625 = vrot.lane.b32.xlu1 %v4317_v16, %s3932_s8  ;;  %3352 = vmatprep.subr.bf16.mxu1 %v3933_v34 }
  0x89   : > { %3620 = vrot.lane.b32.xlu0 %v4321_v17, %s3932_s8  ;;  %3306 = vmatprep.subr.bf16.mxu0 %v3933_v34 }
  0x8b   : > { %3368 = vmatpush1.bf16.msra.mxu1 %v3307_v33  ;;  %3308 = vmatpush1.bf16.msra.mxu0 %v3307_v33  ;;  %v1452_v33 = vld [vmem:[%s6143_s1 + $0x78] sm:$0xff] }
  0x8c   : > { %3635 = vrot.lane.b32.xlu1 %v3634_v57, %s3932_s8  ;;  %3353 = vmatprep.subr.bf16.mxu1 %v3933_v34  ;;  %v1450_v57 = vld [vmem:[%s6143_s1 + $0x68] sm:$0xff]  ;;  %v3313_v38 = vpack.c.bf16 %v1452_v33, %v1451_v32 }
  0x8d   : > { %3630 = vrot.lane.b32.xlu0 %v4345_v2, %s3932_s8  ;;  %3309 = vmatprep.subr.bf16.mxu0 %v3933_v34  ;;  %v3310_v35 = vpack.c.bf16 %v1450_v57, %v1449_v39  ;;  %v1453_v39 = vld [vmem:[%s6143_s1 + $0x80] sm:$0xff]  ;;  %v1462_v32 = vld [vmem:[%s6143_s1 + $0xc8] sm:$0xff] }
  0x8f   : > { %3369 = vmatpush1.bf16.msra.mxu1 %v3310_v35  ;;  %3311 = vmatpush1.bf16.msra.mxu0 %v3310_v35  ;;  %v1461_v35 = vld [vmem:[%s6143_s1 + $0xc0] sm:$0xff] }
  0x90   : > { %3645 = vrot.lane.b32.xlu1 %v3644_v50, %s3932_s8  ;;  %3354 = vmatprep.subr.bf16.mxu1 %v3933_v34  ;;  %v1454_v50 = vld [vmem:[%s6143_s1 + $0x88] sm:$0xff] }
  0x91   : > { %3640 = vrot.lane.b32.xlu0 %v3639_v55, %s3932_s8  ;;  %3312 = vmatprep.subr.bf16.mxu0 %v3933_v34  ;;  %v3316_v55 = vpack.c.bf16 %v1454_v50, %v1453_v39  ;;  %v2907_v39 = vld [vmem:[%s4012_s5 + $0x18a] sm:$0xff] }
  0x93   : > { %3370 = vmatpush1.bf16.msra.mxu1 %v3313_v38  ;;  %3314 = vmatpush1.bf16.msra.mxu0 %v3313_v38  ;;  %v1455_v38 = vld [vmem:[%s6143_s1 + $0x90] sm:$0xff] }
  0x94   : > { %3655 = vrot.lane.b32.xlu1 %v4145_v63, %s3930_s6  ;;  %3355 = vmatprep.subr.bf16.mxu1 %v3933_v34 }
  0x95   : > { %3650 = vrot.lane.b32.xlu0 %v4133_v56, %s3930_s6  ;;  %3315 = vmatprep.subr.bf16.mxu0 %v3933_v34  ;;  %v1456_v56 = vld [vmem:[%s6143_s1 + $0x98] sm:$0xff] }
  0x96   : > { %v3319_v63 = vpack.c.bf16 %v1456_v56, %v1455_v38  ;;  %v1464_v38 = vld [vmem:[%s6143_s1 + $0xd8] sm:$0xff] }
  0x97   : > { %3371 = vmatpush1.bf16.msra.mxu1 %v3316_v55  ;;  %3317 = vmatpush1.bf16.msra.mxu0 %v3316_v55  ;;  %v1463_v55 = vld [vmem:[%s6143_s1 + $0xd0] sm:$0xff] }
  0x98   : > { %3665 = vrot.lane.b32.xlu1 %v4157_v9, %s3930_s6  ;;  %3356 = vmatprep.subr.bf16.mxu1 %v3933_v34  ;;  %v1458_v9 = vld [vmem:[%s6143_s1 + $0xa8] sm:$0xff] }
  0x99   : > { %3660 = vrot.lane.b32.xlu0 %v4142_v62, %s3930_s6  ;;  %3318 = vmatprep.subr.bf16.mxu0 %v3933_v34  ;;  %v1457_v62 = vld [vmem:[%s6143_s1 + $0xa0] sm:$0xff] }
  0x9a   : > { %v3322_v57 = vpack.c.bf16 %v1458_v9, %v1457_v62  ;;  %v1465_v62 = vld [vmem:[%s6143_s1 + $0xe0] sm:$0xff]  ;;  %v1466_v9 = vld [vmem:[%s6143_s1 + $0xe8] sm:$0xff] }
  0x9b   : > { %3372 = vmatpush1.bf16.msra.mxu1 %v3319_v63  ;;  %3320 = vmatpush1.bf16.msra.mxu0 %v3319_v63 }
  0x9c   : > { %3675 = vrot.lane.b32.xlu1 %v4169_v19, %s3930_s6  ;;  %3357 = vmatprep.subr.bf16.mxu1 %v3933_v34  ;;  %v1460_v19 = vld [vmem:[%s6143_s1 + $0xb8] sm:$0xff] }
  0x9d   : > { %3670 = vrot.lane.b32.xlu0 %v4153_v8, %s3930_s6  ;;  %3321 = vmatprep.subr.bf16.mxu0 %v3933_v34  ;;  %v1459_v8 = vld [vmem:[%s6143_s1 + $0xb0] sm:$0xff] }
  0x9f   : > { %3373 = vmatpush1.bf16.msra.mxu1 %v3322_v57  ;;  %3323 = vmatpush1.bf16.msra.mxu0 %v3322_v57 }
  0xa0   : > { %3685 = vrot.lane.b32.xlu1 %v4181_v27, %s3930_s6  ;;  %3358 = vmatprep.subr.bf16.mxu1 %v3933_v34  ;;  %v3325_v27 = vpack.c.bf16 %v1460_v19, %v1459_v8  ;;  %v1467_v8 = vld [vmem:[%s6143_s1 + $0xf0] sm:$0xff]  ;;  %v1468_v19 = vld [vmem:[%s6143_s1 + $0xf8] sm:$0xff] }
  0xa1   : > { %3680 = vrot.lane.b32.xlu0 %v4165_v18, %s3930_s6  ;;  %3324 = vmatprep.subr.bf16.mxu0 %v3933_v34 }
  0xa3   : > { %3374 = vmatpush1.bf16.msra.mxu1 %v3325_v27  ;;  %3326 = vmatpush1.bf16.msra.mxu0 %v3325_v27 }
  0xa4   : > { %3695 = vrot.lane.b32.xlu1 %v4193_v43, %s3930_s6  ;;  %3359 = vmatprep.subr.bf16.mxu1 %v3933_v34  ;;  %v3328_v43 = vpack.c.bf16 %v1462_v32, %v1461_v35  ;;  %v3337_v35 = vpack.c.bf16 %v1468_v19, %v1467_v8  ;;  %v1470_v32 = vld [vmem:[%s6143_s1 + $0x108] sm:$0xff] }
  0xa5   : > { %3690 = vrot.lane.b32.xlu0 %v4177_v26, %s3930_s6  ;;  %3327 = vmatprep.subr.bf16.mxu0 %v3933_v34  ;;  %v2906_v26 = vld [vmem:[%s4012_s5 + $0x182] sm:$0xff] }
  0xa6   : > { %v4444_v18 = vpop.permute.xlu1 %3420  ;;  %v3724_v56 = vpack.i.bf16 %v2907_v39, %v2906_v26 }
  0xa7   : > { %v4453_v33 = vpop.permute.xlu0 %3410  ;;  %3375 = vmatpush1.bf16.msra.mxu1 %v3328_v43  ;;  %3329 = vmatpush1.bf16.msra.mxu0 %v3328_v43 }
  0xa8   : > { %3705 = vrot.lane.b32.xlu1 %v4205_v53, %s3930_s6  ;;  %3360 = vmatprep.subr.bf16.mxu1 %v3933_v34 }
  0xa9   : > { %3700 = vrot.lane.b32.xlu0 %v4189_v42, %s3930_s6  ;;  %3330 = vmatprep.subr.bf16.mxu0 %v3933_v34  ;;  %v3331_v42 = vpack.c.bf16 %v1464_v38, %v1463_v55  ;;  %v3764_v55 = vpack.i.bf16 %v4354_v11, %v4327_v25  ;;  %v6194_v25 = vpack.i.bf16 %v4089_v37, %v4018_v1  ;;  %v2970_v37 = vld [vmem:[%s4012_s5 + $0x199] sm:$0xff] }
  0xaa   : > { %v4462_v50 = vpop.permute.xlu1 %3425  ;;  %v3779_v11 = vpack.i.bf16 %v4348_v3, %v4357_v47  ;;  %v2969_v3 = vld [vmem:[%s4012_s5 + $0x189] sm:$0xff] }
  0xab   : > { %v4471_v53 = vpop.permute.xlu0 %3415  ;;  %3376 = vmatpush1.bf16.msra.mxu1 %v3331_v42  ;;  %3332 = vmatpush1.bf16.msra.mxu0 %v3331_v42 }
  0xac   : > { %3715 = vrot.lane.b32.xlu1 %v4217_v60, %s3930_s6  ;;  %3361 = vmatprep.subr.bf16.mxu1 %v3933_v34  ;;  %v3334_v60 = vpack.c.bf16 %v1466_v9, %v1465_v62  ;;  %v2939_v62 = vld [vmem:[%s4012_s5 + $0x1a0] sm:$0xff] }
  0xad   : > { %3710 = vrot.lane.b32.xlu0 %v4201_v52, %s3930_s6  ;;  %3333 = vmatprep.subr.bf16.mxu0 %v3933_v34 }
  0xae   : > { %v4478_v63 = vpop.permute.xlu1 %3435 }
  0xaf   : > { %6185 = vst [vmem:[#allocation5_spill] sm:$0xff] %v4478_v63  ;;  %v4487_v57 = vpop.permute.xlu0 %3430  ;;  %3377 = vmatpush1.bf16.msra.mxu1 %v3334_v60  ;;  %3335 = vmatpush1.bf16.msra.mxu0 %v3334_v60  ;;  %v3809_v60 = vpack.i.bf16 %v4266_v61, %v2939_v62  ;;  %v213_v63 = vld [vmem:[%s4012_s5 + $0x158] sm:$0xff] }
  0xb0   : > { %3725 = vrot.lane.b32.xlu1 %v3724_v56, %s3930_s6  ;;  %3362 = vmatprep.subr.bf16.mxu1 %v3933_v34  ;;  %v3804_v56 = vpack.i.bf16 %v2970_v37, %v4037_v12 }
  0xb1   : > { %3720 = vrot.lane.b32.xlu0 %v4213_v59, %s3930_s6  ;;  %3336 = vmatprep.subr.bf16.mxu0 %v3933_v34  ;;  %v1469_v59 = vld [vmem:[%s6143_s1 + $0x100] sm:$0xff] }
  0xb2   : > { %v4493_v52 = vpop.permute.xlu1 %3445  ;;  %v4515_v43 = vpack.c.bf16 %v1470_v32, %v1469_v59 }
  0xb3   : > { %6186 = vst [vmem:[#allocation6_spill] sm:$0xff] %v4493_v52  ;;  %v4502_v27 = vpop.permute.xlu0 %3440  ;;  %3378 = vmatpush1.bf16.msra.mxu1 %v3337_v35  ;;  %3338 = vmatpush1.bf16.msra.mxu0 %v3337_v35  ;;  %v208_v52 = vld [vmem:[%s4012_s5 + $0x120] sm:$0xff] }
  0xb4   : > { %6187 = vst [vmem:[#allocation7_spill] sm:$0xff] %v4502_v27  ;;  %3735 = vrot.lane.b32.xlu1 %v4238_v24, %s3931_s7  ;;  %3340 = vmatprep.subr.bf16.mxu1 %v4515_v43  ;;  %v3754_v24 = vpack.i.bf16 %v4324_v20, %v4263_v58 }
  0xb5   : > { %3730 = vrot.lane.b32.xlu0 %v4225_v7, %s3931_s7 }
  0xb6   : > { %v4517_v26 = vpop.permute.xlu1 %3455 }
  0xb7   : > { %6188 = vst [vmem:[#allocation8_spill] sm:$0xff] %v4517_v26  ;;  %v4519_v34 = vpop.permute.xlu0 %3450 }
  0xb8   : > { %6189 = vst [vmem:[#allocation9_spill] sm:$0xff] %v4519_v34  ;;  %3745 = vrot.lane.b32.xlu1 %v4258_v54, %s3931_s7  ;;  %v186_v34 = vld [vmem:[%s4012_s5 + $0x18] sm:$0xff] }
  0xb9   : > { %3740 = vrot.lane.b32.xlu0 %v4235_v21, %s3931_s7 }
  0xba   : > { %v4528_v7 = vpop.permute.xlu1 %3465 }
  0xbb   : > { %6190 = vst [vmem:[#allocation10_spill] sm:$0xff] %v4528_v7  ;;  %v4530_v39 = vpop.permute.xlu0 %3460  ;;  %v3412_v7 = vunpack.i.l.bf16 %v4453_v33 }
  0xbc   : > { %6191 = vst [vmem:[#allocation11_spill] sm:$0xff] %v4530_v39  ;;  %3755 = vrot.lane.b32.xlu1 %v3754_v24, %s3931_s7  ;;  %v185_v39 = vld [vmem:[%s4012_s5 + $0x8] sm:$0xff] }
  0xbd   : > { %3750 = vrot.lane.b32.xlu0 %v4254_v51, %s3931_s7  ;;  %v6193_v51 = vpack.i.bf16 %v4086_v36, %v4025_v5  ;;  %v6195_v5 = vpack.i.bf16 %v4108_v46, %v4028_v6  ;;  %v3794_v36 = vpack.i.bf16 %v2938_v0, %v4351_v4  ;;  %v3799_v6 = vpack.i.bf16 %v2969_v3, %v4046_v15  ;;  %v2971_v46 = vld [vmem:[%s4012_s5 + $0x1a1] sm:$0xff] }
  0xbe   : > { %v4537_v54 = vpop.permute.xlu1 %3475 }
  0xbf   : > { %v4539_v58 = vpop.permute.xlu0 %3470  ;;  %v3478_v26 = vunpack.i.h.bf16 %v4537_v54 }
  0xc0   : > { %3765 = vrot.lane.b32.xlu1 %v3764_v55, %s3931_s7 }
  0xc1   : > { %3760 = vrot.lane.b32.xlu0 %v3759_v29, %s3932_s8  ;;  %v2968_v29 = vld [vmem:[%s4012_s5 + $0x181] sm:$0xff] }
  0xc2   : > { %v4546_v21 = vpop.permute.xlu1 %3485  ;;  %v3789_v1 = vpack.i.bf16 %v2968_v29, %v4043_v14  ;;  %v3814_v14 = vpack.i.bf16 %v2971_v46, %v4040_v13 }
  0xc3   : > { %6192 = vst [vmem:[#allocation12_spill] sm:$0xff] %v4546_v21  ;;  %v4548_v20 = vpop.permute.xlu0 %3480 }
  0xc4   : > { %3775 = vrot.lane.b32.xlu1 %v6193_v51, %s3932_s8 }
  0xc5   : > { %3770 = vrot.lane.b32.xlu0 %v6194_v25, %s3932_s8 }
  0xc6   : > { %v4561_v28 = vpop.permute.xlu1 %3495 }
  0xc7   : > { %v4564_v38 = vpop.permute.xlu0 %3490  ;;  %v3498_v27 = vunpack.i.h.bf16 %v4561_v28 }
  0xc8   : > { %3785 = vrot.lane.b32.xlu1 %v6195_v5, %s3932_s8 }
  0xc9   : > { %3780 = vrot.lane.b32.xlu0 %v3779_v11, %s3931_s7 }
  0xca   : > { %v4574_v47 = vpop.permute.xlu1 %3505 }
  0xcb   : > { %v4577_v42 = vpop.permute.xlu0 %3500 }
  0xcc   : > { %3795 = vrot.lane.b32.xlu1 %v3794_v36, %s3931_s7 }
  0xcd   : > { %3790 = vrot.lane.b32.xlu0 %v3789_v1, %s3932_s8 }
  0xce   : > { %v4584_v4 = vpop.permute.xlu1 %3515 }
  0xcf   : > { %6196 = vst [vmem:[#allocation13_spill] sm:$0xff] %v4584_v4  ;;  %v4587_v9 = vpop.permute.xlu0 %3510 }
  0xd0   : > { %6197 = vst [vmem:[#allocation14_spill] sm:$0xff] %v4587_v9  ;;  %3805 = vrot.lane.b32.xlu1 %v3804_v56, %s3932_s8  ;;  %v2869_v9 = vld [vmem:[%s4012_s5 + $0x141] sm:$0xff] }
  0xd1   : > { %3800 = vrot.lane.b32.xlu0 %v3799_v6, %s3932_s8 }
  0xd2   : > { %v4593_v8 = vpop.permute.xlu1 %3525 }
  0xd3   : > { %6198 = vst [vmem:[#allocation15_spill] sm:$0xff] %v4593_v8  ;;  %v4595_v12 = vpop.permute.xlu0 %3520 }
  0xd4   : > { %6199 = vst [vmem:[#allocation16_spill] sm:$0xff] %v4595_v12  ;;  %3815 = vrot.lane.b32.xlu1 %v3814_v14, %s3932_s8  ;;  %v3422_v14 = vunpack.i.l.bf16 %v4444_v18 }
  0xd5   : > { %3810 = vrot.lane.b32.xlu0 %v3809_v60, %s3931_s7 }
  0xd6   : > { %v4599_v15 = vpop.permute.xlu1 %3535 }
  0xd7   : > { %6200 = vst [vmem:[#allocation17_spill] sm:$0xff] %v4599_v15  ;;  %v4601_v19 = vpop.permute.xlu0 %3530  ;;  %v3417_v15 = vunpack.i.l.bf16 %v4471_v53 }
  0xd8   : > { %6201 = vst [vmem:[#allocation18_spill] sm:$0xff] %v4601_v19  ;;  %3825 = vrot.lane.b32.xlu1 %v4059_v22, %s3932_s8 }
  0xd9   : > { %3820 = vrot.lane.b32.xlu0 %v4062_v23, %s3932_s8 }
  0xda   : > { %v4607_v13 = vpop.permute.xlu1 %3545 }
  0xdb   : > { %6202 = vst [vmem:[#allocation19_spill] sm:$0xff] %v4607_v13  ;;  %v4609_v61 = vpop.permute.xlu0 %3540  ;;  %v3413_v13 = vunpack.i.h.bf16 %v4453_v33  ;;  %v190_v33 = vld [vmem:[%s4012_s5 + $0x48] sm:$0xff] }
  0xdc   : > { %6203 = vst [vmem:[#allocation20_spill] sm:$0xff] %v4609_v61  ;;  %3835 = vrot.lane.b32.xlu1 %v4079_v31, %s3932_s8  ;;  %v184_v61 = vld [vmem:[%s4012_s5] sm:$0xff] }
  0xdd   : > { %3830 = vrot.lane.b32.xlu0 %v4278_v10, %s3931_s7  ;;  %v1243_v8 = vsel %vm1242_vm0, %v184_v61, %v3412_v7  ;;  %v3483_v7 = vunpack.i.h.bf16 %v4548_v20  ;;  %v3497_v61 = vunpack.i.l.bf16 %v4561_v28  ;;  %v1471_v28 = vld [vmem:[%s6143_s1 + $0x110] sm:$0xff] }
  0xde   : > { %v4615_v35 = vpop.permute.xlu1 %3555 }
  0xdf   : > { %v4617_v59 = vpop.permute.xlu0 %3550 }
  0xe0   : > { %3845 = vrot.lane.b32.xlu1 %v4075_v30, %s3932_s8 }
  0xe1   : > { %3840 = vrot.lane.b32.xlu0 %v4301_v45, %s3931_s7 }
  0xe2   : > { %v4623_v22 = vpop.permute.xlu1 %3565 }
  0xe3   : > { %v4625_v23 = vpop.permute.xlu0 %3560 }
  0xe4   : > { %3855 = vrot.lane.b32.xlu1 %v4101_v41, %s3932_s8 }
  0xe5   : > { %3850 = vrot.lane.b32.xlu0 %v4298_v44, %s3931_s7 }
  0xe6   : > { %v4631_v31 = vpop.permute.xlu1 %3575 }
  0xe7   : > { %v4633_v10 = vpop.permute.xlu0 %3570 }
  0xe8   : > { %3865 = vrot.lane.b32.xlu1 %v4097_v40, %s3932_s8 }
  0xe9   : > { %3860 = vrot.lane.b32.xlu0 %v4321_v17, %s3931_s7 }
  0xea   : > { %v4639_v30 = vpop.permute.xlu1 %3585 }
  0xeb   : > { %v4641_v45 = vpop.permute.xlu0 %3580 }
  0xec   : > { %3875 = vrot.lane.b32.xlu1 %v4118_v49, %s3932_s8 }
  0xed   : > { %3870 = vrot.lane.b32.xlu0 %v4317_v16, %s3931_s7 }
  0xee   : > { %v4647_v41 = vpop.permute.xlu1 %3595 }
  0xef   : > { %6204 = vst [vmem:[#allocation21_spill] sm:$0xff] %v4647_v41  ;;  %v4649_v44 = vpop.permute.xlu0 %3590  ;;  %v3482_v41 = vunpack.i.l.bf16 %v4548_v20 }
  0xf0   : > { %6205 = vst [vmem:[#allocation22_spill] sm:$0xff] %v4649_v44  ;;  %3885 = vrot.lane.b32.xlu1 %v4114_v48, %s3932_s8 }
  0xf1   : > { %3880 = vrot.lane.b32.xlu0 %v4345_v2, %s3931_s7 }
  0xf2   : > { %v4655_v40 = vpop.permute.xlu1 %3605 }
  0xf3   : > { %6206 = vst [vmem:[#allocation23_spill] sm:$0xff] %v4655_v40  ;;  %v4657_v17 = vpop.permute.xlu0 %3600 }
  0xf4   : > { %6207 = vst [vmem:[#allocation24_spill] sm:$0xff] %v4657_v17  ;;  %v210_v17 = vld [vmem:[%s4012_s5 + $0x138] sm:$0xff] }
  0xf6   : > { %v4659_v32 = vpop.permute.xlu1 %3615 }
  0xf7   : > { %6208 = vst [vmem:[#allocation25_spill] sm:$0xff] %v4659_v32  ;;  %v4661_v49 = vpop.permute.xlu0 %3610  ;;  %v3418_v32 = vunpack.i.h.bf16 %v4471_v53  ;;  %v3473_v53 = vunpack.i.h.bf16 %v4539_v58 }
  0xf8   : > { %6209 = vst [vmem:[#allocation26_spill] sm:$0xff] %v4661_v49  ;;  %v3472_v49 = vunpack.i.l.bf16 %v4539_v58 }
  0xfa   : > { %v4663_v24 = vpop.permute.xlu1 %3625 }
  0xfb   : > { %6210 = vst [vmem:[#allocation27_spill] sm:$0xff] %v4663_v24  ;;  %v4665_v16 = vpop.permute.xlu0 %3620  ;;  %v3423_v24 = vunpack.i.h.bf16 %v4444_v18 }
  0xfc   : > { %6211 = vst [vmem:[#allocation28_spill] sm:$0xff] %v4665_v16  ;;  %v188_v16 = vld [vmem:[%s4012_s5 + $0x30] sm:$0xff] }
  0xfd   : > { %v1247_v40 = vsel %vm1242_vm0, %v188_v16, %v3422_v14  ;;  %v209_v16 = vld [vmem:[%s4012_s5 + $0x128] sm:$0xff] }
  0xfe   : > { %v4667_v55 = vpop.permute.xlu1 %3635  ;;  %v214_v14 = vld [vmem:[%s4012_s5 + $0x168] sm:$0xff] }
  0xff   : > { %v4669_v51 = vpop.permute.xlu0 %3630 }
 0x102   : > { %v4671_v48 = vpop.permute.xlu1 %3645 }
 0x103   : > { %v4673_v25 = vpop.permute.xlu0 %3640 }
 0x106   : > { %v4675_v2 = vpop.permute.xlu1 %3655 }
 0x107   : > { %v4677_v11 = vpop.permute.xlu0 %3650 }
 0x10a   : > { %v4679_v0 = vpop.permute.xlu1 %3665 }
 0x10b   : > { %v4681_v29 = vpop.permute.xlu0 %3660 }
 0x10e   : > { %v4683_v5 = vpop.permute.xlu1 %3675 }
 0x10f   : > { %6212 = vst [vmem:[#allocation29_spill] sm:$0xff] %v4683_v5  ;;  %v4685_v36 = vpop.permute.xlu0 %3670  ;;  %v3553_v5 = vunpack.i.h.bf16 %v4617_v59 }
 0x112   : > { %v4687_v1 = vpop.permute.xlu1 %3685 }
 0x113   : > { %6213 = vst [vmem:[#allocation30_spill] sm:$0xff] %v4687_v1  ;;  %v4689_v37 = vpop.permute.xlu0 %3680  ;;  %v1244_v1 = vsel %vm1242_vm0, %v185_v39, %v3413_v13  ;;  %v1245_v13 = vsel %vm1242_vm0, %v186_v34, %v3417_v15  ;;  %v3493_v34 = vunpack.i.h.bf16 %v4564_v38  ;;  %v3492_v15 = vunpack.i.l.bf16 %v4564_v38 }
 0x114   : > { %6214 = vst [vmem:[#allocation31_spill] sm:$0xff] %v4689_v37  ;;  %v3487_v37 = vunpack.i.l.bf16 %v4546_v21  ;;  %v3558_v38 = vunpack.i.h.bf16 %v4615_v35  ;;  %v2845_v21 = vld [vmem:[%s4012_s5 + $0x21] sm:$0xff] }
 0x116   : > { %v4691_v3 = vpop.permute.xlu1 %3695 }
 0x117   : > { %6215 = vst [vmem:[#allocation32_spill] sm:$0xff] %v4691_v3  ;;  %v4693_v56 = vpop.permute.xlu0 %3690  ;;  %v3477_v3 = vunpack.i.l.bf16 %v4537_v54  ;;  %v211_v54 = vld [vmem:[%s4012_s5 + $0x140] sm:$0xff] }
 0x118   : > { %6216 = vst [vmem:[#allocation33_spill] sm:$0xff] %v4693_v56  ;;  %v187_v56 = vld [vmem:[%s4012_s5 + $0x20] sm:$0xff]  ;;  %v1270_v20 = vsel %vm1242_vm0, %v211_v54, %v3478_v26  ;;  %v3502_v26 = vunpack.i.l.bf16 %v4577_v42  ;;  %v4775_v54 = vsel %vm1275_vm1, %v1245_v13, %v3497_v61  ;;  %v1276_v61 = vsel %vm1275_vm1, %v1243_v8, %v3492_v15 }
 0x119   : > { %v1277_v13 = vsel %vm1275_vm1, %v1244_v1, %v3493_v34  ;;  %v4807_v1 = vsel %vm1275_vm1, %v1270_v20, %v3558_v38  ;;  %v2844_v38 = vld [vmem:[%s4012_s5 + $0x19] sm:$0xff] }
 0x11a   : > { %v4695_v6 = vpop.permute.xlu1 %3705 }
 0x11b   : > { %6217 = vst [vmem:[#allocation34_spill] sm:$0xff] %v4695_v6  ;;  %v4697_v46 = vpop.permute.xlu0 %3700  ;;  %v3427_v6 = vunpack.i.l.bf16 %v4462_v50 }
 0x11c   : > { %6218 = vst [vmem:[#allocation35_spill] sm:$0xff] %v4697_v46  ;;  %v189_v46 = vld [vmem:[%s4012_s5 + $0x38] sm:$0xff] }
 0x11d   : > { %v1248_v12 = vsel %vm1242_vm0, %v189_v46, %v3423_v24  ;;  %v4737_v58 = vsel %vm1242_vm0, %v190_v33, %v3427_v6  ;;  %v1246_v24 = vsel %vm1242_vm0, %v187_v56, %v3418_v32  ;;  %v212_v46 = vld [vmem:[%s4012_s5 + $0x150] sm:$0xff]  ;;  %v1267_v6 = vsel %vm1242_vm0, %v208_v52, %v3472_v49  ;;  %v1472_v52 = vld [vmem:[%s6143_s1 + $0x118] sm:$0xff] }
 0x11e   : > { %v4699_v62 = vpop.permute.xlu1 %3715  ;;  %v1269_v33 = vsel %vm1242_vm0, %v210_v17, %v3477_v3  ;;  %v1268_v32 = vsel %vm1242_vm0, %v209_v16, %v3473_v53  ;;  %v3503_v17 = vunpack.i.h.bf16 %v4577_v42  ;;  %v1271_v49 = vsel %vm1242_vm0, %v212_v46, %v3482_v41 }
 0x11f   : > { %v4702_v60 = vpop.permute.xlu0 %3710  ;;  %v4768_v3 = vsel %vm1242_vm0, %v214_v14, %v3487_v37  ;;  %v3557_v56 = vunpack.i.l.bf16 %v4615_v35  ;;  %v1272_v16 = vsel %vm1242_vm0, %v213_v63, %v3483_v7  ;;  %v3552_v42 = vunpack.i.l.bf16 %v4617_v59 }
 0x120   : > { %v4783_v41 = vsel %vm1275_vm1, %v1246_v24, %v3498_v27  ;;  %v4785_v37 = vpack.c.bf16 %v1472_v52, %v1471_v28  ;;  %v3562_v46 = vunpack.i.l.bf16 %v4625_v23  ;;  %v3563_v7 = vunpack.i.h.bf16 %v4625_v23 }
 0x121   : > { %v4794_v59 = vsel %vm1275_vm1, %v1247_v40, %v3502_v26  ;;  %v4797_v27 = vsel %vm1275_vm1, %v1248_v12, %v3503_v17  ;;  %v3573_v24 = vunpack.i.h.bf16 %v4633_v10  ;;  %v3572_v14 = vunpack.i.l.bf16 %v4633_v10 }
 0x122   : > { %v4714_v18 = vpop.permute.xlu1 %3725  ;;  %v4804_v8 = vsel %vm1275_vm1, %v1269_v33, %v3557_v56  ;;  %v3633_v23 = vunpack.i.h.bf16 %v4669_v51  ;;  %v3632_v40 = vunpack.i.l.bf16 %v4669_v51  ;;  %v1300_v34 = vsel %vm1275_vm1, %v1267_v6, %v3552_v42  ;;  %v2868_v56 = vld [vmem:[%s4012_s5 + $0x139] sm:$0xff] }
 0x123   : > { %v4720_v19 = vpop.permute.xlu0 %3720  ;;  %v1301_v10 = vsel %vm1275_vm1, %v1268_v32, %v3553_v5  ;;  %v3652_v52 = vunpack.i.l.bf16 %v4677_v11  ;;  %v3712_v33 = vunpack.i.l.bf16 %v4702_v60  ;;  %v4819_v17 = vsel %vm1275_vm1, %v1271_v49, %v3562_v46 }
 0x124   : > { %v4827_v5 = vsel %vm1275_vm1, %v1272_v16, %v3563_v7  ;;  %v1309_v49 = vsel %vm1308_vm2, %v1276_v61, %v3572_v14  ;;  %v1310_v46 = vsel %vm1308_vm2, %v1277_v13, %v3573_v24  ;;  %v3653_v35 = vunpack.i.h.bf16 %v4677_v11 }
 0x125   : > { %v3713_v15 = vunpack.i.h.bf16 %v4702_v60  ;;  %v1333_v20 = vsel %vm1308_vm2, %v1300_v34, %v3632_v40  ;;  %v1334_v16 = vsel %vm1308_vm2, %v1301_v10, %v3633_v23  ;;  %v1341_v6 = vsel %vm1242_vm0, %v2844_v38, %v3652_v52 }
 0x126   : > { %v4741_v39 = vpop.permute.xlu1 %3735  ;;  %v1365_v32 = vsel %vm1242_vm0, %v2868_v56, %v3712_v33  ;;  %v3657_v24 = vunpack.i.l.bf16 %v4675_v2  ;;  %v3717_v14 = vunpack.i.l.bf16 %v4699_v62  ;;  %v1342_v52 = vsel %vm1242_vm0, %v2845_v21, %v3653_v35 }
 0x127   : > { %v4748_v4 = vpop.permute.xlu0 %3730  ;;  %v3737_v34 = vunpack.i.l.bf16 %v4741_v39  ;;  %v1366_v33 = vsel %vm1242_vm0, %v2869_v9, %v3713_v15 }
 0x128   : > { %v3732_v26 = vunpack.i.l.bf16 %v4748_v4  ;;  %v3733_v61 = vunpack.i.h.bf16 %v4748_v4 }
 0x12a   : > { %v4772_v53 = vpop.permute.xlu1 %3745  ;;  %v1373_v11 = vsel %vm1275_vm1, %v1341_v6, %v3732_v26  ;;  %v2846_v26 = vld [vmem:[%s4012_s5 + $0x31] sm:$0xff] }
 0x12b   : > { %v4780_v44 = vpop.permute.xlu0 %3740 }
 0x12e   : > { %v4801_v28 = vpop.permute.xlu1 %3755 }
 0x12f   : > { %6219 = vst [vmem:[#allocation36_spill] sm:$0xff] %v4801_v28  ;;  %v4811_v12 = vpop.permute.xlu0 %3750  ;;  %v3758_v51 = vunpack.i.h.bf16 %v4801_v28 }
 0x131   : > { %v1397_v60 = vsel %vm1275_vm1, %v1365_v32, %v3758_v51  ;;  %v2870_v51 = vld [vmem:[%s4012_s5 + $0x151] sm:$0xff] }
 0x132   : > { %v3766_v42 = vpop.permute.xlu1 %3765 }
 0x133   : > { %v3761_v63 = vpop.permute.xlu0 %3760  ;;  %v3767_v13 = vunpack.i.l.bf16 %v3766_v42  ;;  %v3768_v10 = vunpack.i.h.bf16 %v3766_v42  ;;  %v3718_v42 = vunpack.i.h.bf16 %v4699_v62 }
 0x134   : > { %v3763_v7 = vunpack.i.h.bf16 %v3761_v63  ;;  %v3762_v28 = vunpack.i.l.bf16 %v3761_v63 }
 0x135   : > { %v1398_v21 = vsel %vm1275_vm1, %v1366_v33, %v3767_v13 }
 0x136   : > { %v3776_v63 = vpop.permute.xlu1 %3775  ;;  %v1405_v23 = vsel %vm1308_vm2, %v1373_v11, %v3762_v28  ;;  %v1429_v40 = vsel %vm1308_vm2, %v1397_v60, %v3763_v7  ;;  %v3658_v28 = vunpack.i.h.bf16 %v4675_v2  ;;  %v1374_v7 = vsel %vm1275_vm1, %v1342_v52, %v3733_v61  ;;  %v2847_v60 = vld [vmem:[%s4012_s5 + $0x39] sm:$0xff] }
 0x137   : > { %v3771_v4 = vpop.permute.xlu0 %3770  ;;  %1640 = vmatprep.mubr.f32.mxu0 %v1405_v23  ;;  %1760 = vmatprep.mubr.f32.mxu1 %v1429_v40  ;;  %v3778_v38 = vunpack.i.h.bf16 %v3776_v63  ;;  %v3777_v56 = vunpack.i.l.bf16 %v3776_v63  ;;  %v1343_v11 = vsel %vm1242_vm0, %v2846_v26, %v3657_v24  ;;  %v3738_v2 = vunpack.i.h.bf16 %v4741_v39 }
 0x138   : > { %v3773_v6 = vunpack.i.h.bf16 %v3771_v4  ;;  %v3772_v32 = vunpack.i.l.bf16 %v3771_v4  ;;  %1641 = vmatmul.mubr.f32.vlgmr.msra.gmra.mrb[0].mxu0 %v1309_v49  ;;  %1761 = vmatmul.mubr.f32.vlgmr.msra.gmra.mrb[0].mxu1 %v1333_v20  ;;  %v1367_v20 = vsel %vm1242_vm0, %v2870_v51, %v3717_v14  ;;  %v2871_v49 = vld [vmem:[%s4012_s5 + $0x159] sm:$0xff]  ;;  %v1375_v61 = vsel %vm1275_vm1, %v1343_v11, %v3737_v34 }
 0x139   : > { %3342 = vmatpush3.bf16.msra.mxu1 %v4515_v43  ;;  %v1399_v13 = vsel %vm1275_vm1, %v1367_v20, %v3768_v10  ;;  %v1407_v24 = vsel %vm1308_vm2, %v1375_v61, %v3777_v56  ;;  %v3638_v40 = vunpack.i.h.bf16 %v4667_v55  ;;  %v6220_v39 = vunpack.i.l.bf16 %v4631_v31 }
 0x13a   : > { %v3786_v9 = vpop.permute.xlu1 %3785  ;;  %v1406_v35 = vsel %vm1308_vm2, %v1374_v7, %v3772_v32  ;;  %v1430_v15 = vsel %vm1308_vm2, %v1398_v21, %v3773_v6  ;;  %3344 = vmatprep.subr.bf16.mxu1 %v4785_v37  ;;  %v1431_v14 = vsel %vm1308_vm2, %v1399_v13, %v3778_v38  ;;  %v6221_v10 = vunpack.i.l.bf16 %v4667_v55  ;;  %v2848_v6 = vld [vmem:[%s4012_s5 + $0x49] sm:$0xff] }
 0x13b   : > { %v3788_v43 = vunpack.i.h.bf16 %v3786_v9  ;;  %v3781_v62 = vpop.permute.xlu0 %3780  ;;  %1645 = vmatprep.mubr.f32.mxu0 %v1406_v35  ;;  %1765 = vmatprep.mubr.f32.mxu1 %v1430_v15  ;;  %v3787_v63 = vunpack.i.l.bf16 %v3786_v9  ;;  %v1311_v34 = vsel %vm1308_vm2, %v4775_v54, %v6220_v39  ;;  %v3662_v4 = vunpack.i.l.bf16 %v4681_v29  ;;  %v2872_v32 = vld [vmem:[%s4012_s5 + $0x169] sm:$0xff] }
 0x13c   : > { %v3782_v23 = vunpack.i.l.bf16 %v3781_v62  ;;  %1646 = vmatmul.mubr.f32.gmra.mrb[2].mxu0 %v1310_v46  ;;  %1766 = vmatmul.mubr.f32.gmra.mrb[2].mxu1 %v1334_v16  ;;  %v1335_v46 = vsel %vm1308_vm2, %v4804_v8, %v6221_v10  ;;  %v1368_v16 = vsel %vm1242_vm0, %v2871_v49, %v3718_v42  ;;  %v3722_v52 = vunpack.i.l.bf16 %v4720_v19 }
 0x13d   : > { %1650 = vmatprep.mubr.f32.mxu0 %v1407_v24  ;;  %1770 = vmatprep.mubr.f32.mxu1 %v1431_v14  ;;  %v1344_v26 = vsel %vm1242_vm0, %v2847_v60, %v3658_v28  ;;  %v3742_v54 = vunpack.i.l.bf16 %v4780_v44  ;;  %v3783_v55 = vunpack.i.h.bf16 %v3781_v62  ;;  %v6222_v21 = vunpack.i.h.bf16 %v4631_v31  ;;  %v2849_v60 = vld [vmem:[%s4012_s5 + $0x51] sm:$0xff] }
 0x13e   : > { %v4882_v33 = vpop.permute.xlu1 %3795  ;;  %v1400_v51 = vsel %vm1275_vm1, %v1368_v16, %v3782_v23  ;;  %3346 = vmatpush3.bf16.msra.mxu1 %v4785_v37  ;;  %v1376_v8 = vsel %vm1275_vm1, %v1344_v26, %v3738_v2  ;;  %v3583_v9 = vunpack.i.h.bf16 %v4641_v45  ;;  %v3582_v35 = vunpack.i.l.bf16 %v4641_v45  ;;  %v2874_v26 = vld [vmem:[%s4012_s5 + $0x181] sm:$0xff] }
 0x13f   : > { %v3791_v38 = vpop.permute.xlu0 %3790  ;;  %v1432_v56 = vsel %vm1308_vm2, %v1400_v51, %v3788_v43  ;;  %v1408_v28 = vsel %vm1308_vm2, %v1376_v8, %v3787_v63  ;;  %v1312_v37 = vsel %vm1308_vm2, %v4783_v41, %v6222_v21  ;;  %v3642_v15 = vunpack.i.l.bf16 %v4673_v25 }
 0x140   : > { %v3793_v42 = vunpack.i.h.bf16 %v3791_v38  ;;  %v3792_v7 = vunpack.i.l.bf16 %v3791_v38  ;;  %1651 = vmatmul.mubr.f32.gmra.mrb[4].mxu0 %v1311_v34  ;;  %1771 = vmatmul.mubr.f32.gmra.mrb[4].mxu1 %v1335_v46  ;;  %v1336_v11 = vsel %vm1308_vm2, %v4807_v1, %v3638_v40  ;;  %v3663_v20 = vunpack.i.h.bf16 %v4681_v29  ;;  %v2873_v1 = vld [vmem:[%s4012_s5 + $0x171] sm:$0xff]  ;;  %v2875_v38 = vld [vmem:[%s4012_s5 + $0x189] sm:$0xff] }
 0x141   : > { %1655 = vmatprep.mubr.f32.mxu0 %v1408_v28  ;;  %1775 = vmatprep.mubr.f32.mxu1 %v1432_v56  ;;  %v3723_v31 = vunpack.i.h.bf16 %v4720_v19  ;;  %v1345_v49 = vsel %vm1242_vm0, %v2848_v6, %v3662_v4  ;;  %v1369_v41 = vsel %vm1242_vm0, %v2872_v32, %v3722_v52  ;;  %v3743_v2 = vunpack.i.h.bf16 %v4780_v44 }
 0x142   : > { %v3797_v45 = vunpack.i.l.bf16 %v4882_v33  ;;  %v3806_v43 = vpop.permute.xlu1 %3805  ;;  %v1377_v61 = vsel %vm1275_vm1, %v1345_v49, %v3742_v54  ;;  %v1401_v13 = vsel %vm1275_vm1, %v1369_v41, %v3783_v55  ;;  %v3643_v44 = vunpack.i.h.bf16 %v4673_v25 }
 0x143   : > { %v3801_v62 = vpop.permute.xlu0 %3800  ;;  %v1409_v19 = vsel %vm1308_vm2, %v1377_v61, %v3792_v7  ;;  %v1433_v23 = vsel %vm1308_vm2, %v1401_v13, %v3793_v42  ;;  %v3667_v24 = vunpack.i.l.bf16 %v4679_v0  ;;  %v1313_v14 = vsel %vm1308_vm2, %v4794_v59, %v3582_v35 }
 0x144   : > { %v3803_v63 = vunpack.i.h.bf16 %v3801_v62  ;;  %v3802_v29 = vunpack.i.l.bf16 %v3801_v62  ;;  %1656 = vmatmul.mubr.f32.gmra.mrb[6].mxu0 %v1312_v37  ;;  %1776 = vmatmul.mubr.f32.gmra.mrb[6].mxu1 %v1336_v11  ;;  %v1337_v40 = vsel %vm1308_vm2, %v4819_v17, %v3642_v15  ;;  %v3728_v39 = vunpack.i.h.bf16 %v4714_v18  ;;  %v2850_v17 = vld [vmem:[%s4012_s5 + $0x61] sm:$0xff]  ;;  %v2851_v11 = vld [vmem:[%s4012_s5 + $0x69] sm:$0xff] }
 0x145   : > { %1660 = vmatprep.mubr.f32.mxu0 %v1409_v19  ;;  %1780 = vmatprep.mubr.f32.mxu1 %v1433_v23  ;;  %v3727_v34 = vunpack.i.l.bf16 %v4714_v18  ;;  %v1346_v10 = vsel %vm1242_vm0, %v2849_v60, %v3663_v20  ;;  %v1370_v25 = vsel %vm1242_vm0, %v2873_v1, %v3723_v31  ;;  %v3747_v46 = vunpack.i.l.bf16 %v4772_v53  ;;  %v191_v62 = vld [vmem:[%s4012_s5 + $0x50] sm:$0xff]  ;;  %v2852_v19 = vld [vmem:[%s4012_s5 + $0x79] sm:$0xff] }
 0x146   : > { %v3798_v16 = vunpack.i.h.bf16 %v4882_v33  ;;  %v1378_v59 = vsel %vm1275_vm1, %v1346_v10, %v3743_v2  ;;  %v1402_v52 = vsel %vm1275_vm1, %v1370_v25, %v3797_v45  ;;  %v3808_v51 = vunpack.i.h.bf16 %v3806_v43  ;;  %v3816_v56 = vpop.permute.xlu1 %3815  ;;  %v6228_v25 = vld [vmem:[#allocation12_spill] sm:$0xff] }
 0x147   : > { %v4926_v4 = vpop.permute.xlu0 %3810  ;;  %v3807_v54 = vunpack.i.l.bf16 %v3806_v43  ;;  %v1410_v18 = vsel %vm1308_vm2, %v1378_v59, %v3802_v29  ;;  %v1434_v55 = vsel %vm1308_vm2, %v1402_v52, %v3803_v63  ;;  %v3587_v33 = vunpack.i.l.bf16 %v4639_v30  ;;  %v215_v63 = vld [vmem:[%s4012_s5 + $0x170] sm:$0xff] }
 0x148   : > { %1661 = vmatmul.mubr.f32.gmra.mrb[8].mxu0 %v1313_v14  ;;  %1781 = vmatmul.mubr.f32.gmra.mrb[8].mxu1 %v1337_v40  ;;  %v3647_v8 = vunpack.i.l.bf16 %v4671_v48  ;;  %v3812_v6 = vunpack.i.l.bf16 %v4926_v4  ;;  %v1314_v32 = vsel %vm1308_vm2, %v4797_v27, %v3583_v9  ;;  %v3668_v42 = vunpack.i.h.bf16 %v4679_v0  ;;  %v6226_v40 = vld [vmem:[#allocation14_spill] sm:$0xff] }
 0x149   : > { %1665 = vmatprep.mubr.f32.mxu0 %v1410_v18  ;;  %1785 = vmatprep.mubr.f32.mxu1 %v1434_v55  ;;  %v1338_v7 = vsel %vm1308_vm2, %v4827_v5, %v3643_v44  ;;  %v1347_v28 = vsel %vm1242_vm0, %v2850_v17, %v3667_v24  ;;  %v1371_v21 = vsel %vm1242_vm0, %v2874_v26, %v3727_v34  ;;  %v3748_v37 = vunpack.i.h.bf16 %v4772_v53  ;;  %v2972_v26 = vld [vmem:[%s4012_s5 + $0x32] sm:$0xff] }
 0x14a   : > { %v1379_v35 = vsel %vm1275_vm1, %v1347_v28, %v3747_v46  ;;  %v1403_v15 = vsel %vm1275_vm1, %v1371_v21, %v3798_v16  ;;  %v1372_v20 = vsel %vm1242_vm0, %v2875_v38, %v3728_v39  ;;  %v3818_v27 = vunpack.i.h.bf16 %v3816_v56 }
 0x14b   : > { %v3817_v9 = vunpack.i.l.bf16 %v3816_v56  ;;  %v1411_v0 = vsel %vm1308_vm2, %v1379_v35, %v3807_v54  ;;  %v1435_v5 = vsel %vm1308_vm2, %v1403_v15, %v3808_v51  ;;  %v3568_v31 = vunpack.i.h.bf16 %v4623_v22  ;;  %v4953_v53 = vpop.permute.xlu0 %3820  ;;  %v192_v51 = vld [vmem:[%s4012_s5 + $0x60] sm:$0xff]  ;;  %v6230_v54 = vld [vmem:[#allocation22_spill] sm:$0xff] }
 0x14c   : > { %1666 = vmatmul.mubr.f32.gmra.mrb[10].mxu0 %v1314_v32  ;;  %1786 = vmatmul.mubr.f32.gmra.mrb[10].mxu1 %v1338_v7  ;;  %v6223_v49 = vunpack.i.l.bf16 %v4574_v47  ;;  %v6224_v2 = vunpack.i.l.bf16 %v4623_v22  ;;  %v1404_v43 = vsel %vm1275_vm1, %v1372_v20, %v3812_v6  ;;  %v3588_v61 = vunpack.i.h.bf16 %v4639_v30  ;;  %v5003_v6 = vpop.permute.xlu1 %3825  ;;  %v2973_v32 = vld [vmem:[%s4012_s5 + $0x3a] sm:$0xff]  ;;  %v6231_v7 = vld [vmem:[#allocation29_spill] sm:$0xff]  ;;  %v2974_v35 = vld [vmem:[%s4012_s5 + $0x4a] sm:$0xff] }
 0x14d   : > { %1670 = vmatprep.mubr.f32.mxu0 %v1411_v0  ;;  %1790 = vmatprep.mubr.f32.mxu1 %v1435_v5  ;;  %v3672_v13 = vunpack.i.l.bf16 %v4685_v36  ;;  %v1348_v1 = vsel %vm1242_vm0, %v2851_v11, %v3668_v42  ;;  %v3648_v29 = vunpack.i.h.bf16 %v4671_v48  ;;  %v3822_v23 = vunpack.i.l.bf16 %v4953_v53  ;;  %v6232_v11 = vld [vmem:[#allocation36_spill] sm:$0xff]  ;;  %v2854_v0 = vld [vmem:[%s4012_s5 + $0x91] sm:$0xff] }
 0x14e   : > { %v1282_v41 = vsel %vm1275_vm1, %v4737_v58, %v6223_v49  ;;  %v1306_v45 = vsel %vm1275_vm1, %v4768_v3, %v6224_v2  ;;  %v3752_v58 = vunpack.i.l.bf16 %v4811_v12  ;;  %v1380_v3 = vsel %vm1275_vm1, %v1348_v1, %v3748_v37  ;;  %v2975_v2 = vld [vmem:[%s4012_s5 + $0x52] sm:$0xff]  ;;  %v2976_v1 = vld [vmem:[%s4012_s5 + $0x62] sm:$0xff] }
 0x14f   : > { %v1315_v60 = vsel %vm1308_vm2, %v1282_v41, %v3587_v33  ;;  %v1339_v22 = vsel %vm1308_vm2, %v1306_v45, %v3647_v8  ;;  %v1412_v30 = vsel %vm1308_vm2, %v1380_v3, %v3817_v9  ;;  %v1436_v44 = vsel %vm1308_vm2, %v1404_v43, %v3818_v27  ;;  %v2853_v33 = vld [vmem:[%s4012_s5 + $0x81] sm:$0xff] }
 0x150   : > { %1671 = vmatmul.mubr.f32.gmra.mrb[12].mxu0 %v1315_v60  ;;  %1791 = vmatmul.mubr.f32.gmra.mrb[12].mxu1 %v1339_v22  ;;  %v6225_v24 = vunpack.i.h.bf16 %v4462_v50  ;;  %v3432_v14 = vunpack.i.l.bf16 %v4487_v57  ;;  %v3512_v39 = vunpack.i.l.bf16 %v6226_v40  ;;  %v6227_v34 = vunpack.i.h.bf16 %v4574_v47  ;;  %v6234_v45 = vld [vmem:[#allocation13_spill] sm:$0xff] }
 0x151   : > { %1675 = vmatprep.mubr.f32.mxu0 %v1412_v30  ;;  %1795 = vmatprep.mubr.f32.mxu1 %v1436_v44  ;;  %v6229_v46 = vunpack.i.h.bf16 %v6228_v25  ;;  %v3673_v59 = vunpack.i.h.bf16 %v4685_v36  ;;  %v1349_v17 = vsel %vm1242_vm0, %v2852_v19, %v3672_v13  ;;  %v3592_v18 = vunpack.i.l.bf16 %v6230_v54  ;;  %v6236_v30 = vld [vmem:[#allocation31_spill] sm:$0xff] }
 0x152   : > { %v1250_v48 = vsel %vm1242_vm0, %v191_v62, %v6225_v24  ;;  %v3753_v47 = vunpack.i.h.bf16 %v4811_v12  ;;  %v1381_v38 = vsel %vm1275_vm1, %v1349_v17, %v3752_v58  ;;  %v3823_v36 = vunpack.i.h.bf16 %v4953_v53  ;;  %v6233_v53 = vld [vmem:[#allocation5_spill] sm:$0xff] }
 0x153   : > { %v1283_v10 = vsel %vm1275_vm1, %v1250_v48, %v6227_v34  ;;  %v1274_v16 = vsel %vm1242_vm0, %v215_v63, %v6229_v46  ;;  %v1413_v8 = vsel %vm1308_vm2, %v1381_v38, %v3822_v23  ;;  %v3433_v56 = vunpack.i.h.bf16 %v4487_v57  ;;  %v193_v57 = vld [vmem:[%s4012_s5 + $0x68] sm:$0xff]  ;;  %v194_v63 = vld [vmem:[%s4012_s5 + $0x78] sm:$0xff] }
 0x154   : > { %v1316_v50 = vsel %vm1308_vm2, %v1283_v10, %v3588_v61  ;;  %v1307_v52 = vsel %vm1275_vm1, %v1274_v16, %v3568_v31  ;;  %v1251_v12 = vsel %vm1242_vm0, %v192_v51, %v3432_v14  ;;  %v3513_v42 = vunpack.i.h.bf16 %v6226_v40  ;;  %v5028_v61 = vpop.permute.xlu0 %3830  ;;  %v2855_v23 = vld [vmem:[%s4012_s5 + $0x99] sm:$0xff]  ;;  %v3836_v40 = vpop.permute.xlu1 %3835  ;;  %v2977_v34 = vld [vmem:[%s4012_s5 + $0x6a] sm:$0xff] }
 0x155   : > { %v1340_v55 = vsel %vm1308_vm2, %v1307_v52, %v3648_v29  ;;  %1676 = vmatmul.mubr.f32.gmra.mrb[14].mxu0 %v1316_v50  ;;  %v3677_v28 = vunpack.i.l.bf16 %v6231_v7  ;;  %v1284_v21 = vsel %vm1275_vm1, %v1251_v12, %v3512_v39  ;;  %v1350_v37 = vsel %vm1242_vm0, %v2853_v33, %v3673_v59  ;;  %v6235_v29 = vld [vmem:[#allocation21_spill] sm:$0xff]  ;;  %v2978_v59 = vld [vmem:[%s4012_s5 + $0x7a] sm:$0xff] }
 0x156   : > { %1796 = vmatmul.mubr.f32.gmra.mrb[14].mxu1 %v1340_v55  ;;  %1680 = vmatprep.mubr.f32.mxu0 %v1413_v8  ;;  %v3593_v15 = vunpack.i.h.bf16 %v6230_v54  ;;  %v3757_v20 = vunpack.i.l.bf16 %v6232_v11  ;;  %v1317_v27 = vsel %vm1308_vm2, %v1284_v21, %v3592_v18  ;;  %v1382_v9 = vsel %vm1275_vm1, %v1350_v37, %v3753_v47  ;;  %v2856_v10 = vld [vmem:[%s4012_s5 + $0xa9] sm:$0xff]  ;;  %v195_v50 = vld [vmem:[%s4012_s5 + $0x80] sm:$0xff]  ;;  %v6237_v55 = vld [vmem:[#allocation7_spill] sm:$0xff] }
 0x157   : > { %3243 = vmatprep.mubr.msk.f32.mxu1 %vm1242_vm0, %v2972_v26  ;;  %v3827_v5 = vunpack.i.l.bf16 %v5003_v6  ;;  %v1414_v31 = vsel %vm1308_vm2, %v1382_v9, %v3823_v36  ;;  %v3437_v49 = vunpack.i.l.bf16 %v6233_v53  ;;  %v1252_v41 = vsel %vm1242_vm0, %v193_v57, %v3433_v56  ;;  %v2979_v8 = vld [vmem:[%s4012_s5 + $0x82] sm:$0xff]  ;;  %v6238_v12 = vld [vmem:[#allocation16_spill] sm:$0xff]  ;;  %v196_v21 = vld [vmem:[%s4012_s5 + $0x90] sm:$0xff] }
 0x158   : > { %v3517_v43 = vunpack.i.l.bf16 %v6234_v45  ;;  %v3678_v62 = vunpack.i.h.bf16 %v6231_v7  ;;  %v1285_v13 = vsel %vm1275_vm1, %v1252_v41, %v3513_v42  ;;  %v1351_v60 = vsel %vm1242_vm0, %v2854_v0, %v3677_v28  ;;  %v5069_v42 = vpop.permute.xlu0 %3840  ;;  %v2980_v28 = vld [vmem:[%s4012_s5 + $0x92] sm:$0xff]  ;;  %v6239_v37 = vld [vmem:[#allocation24_spill] sm:$0xff] }
 0x159   : > { %1681 = vmatmul.mubr.f32.gmra.mrb[16].mxu0 %v1317_v27  ;;  %v3597_v58 = vunpack.i.l.bf16 %v6235_v29  ;;  %v3813_v22 = vunpack.i.h.bf16 %v4926_v4  ;;  %v1318_v3 = vsel %vm1308_vm2, %v1285_v13, %v3593_v15  ;;  %v1383_v19 = vsel %vm1275_vm1, %v1351_v60, %v3757_v20  ;;  %v6240_v15 = vld [vmem:[#allocation30_spill] sm:$0xff] }
 0x15a   : > { %3244 = vmatmul.mubr.msk.f32.vlgmr.msra.gmra.mrb[16].mxu1 %vm1242_vm0, %v2973_v32  ;;  %1685 = vmatprep.mubr.f32.mxu0 %v1414_v31  ;;  %v3682_v44 = vunpack.i.l.bf16 %v6236_v30  ;;  %v3828_v24 = vunpack.i.h.bf16 %v5003_v6  ;;  %v1415_v48 = vsel %vm1308_vm2, %v1383_v19, %v3827_v5  ;;  %v3438_v14 = vunpack.i.h.bf16 %v6233_v53  ;;  %v2857_v6 = vld [vmem:[%s4012_s5 + $0xb1] sm:$0xff]  ;;  %v3846_v31 = vpop.permute.xlu1 %3845 }
 0x15b   : > { %3246 = vmatprep.mubr.msk.f32.mxu1 %vm1242_vm0, %v2974_v35  ;;  %v3832_v4 = vunpack.i.l.bf16 %v5028_v61  ;;  %v1253_v39 = vsel %vm1242_vm0, %v194_v63, %v3437_v49  ;;  %v3518_v25 = vunpack.i.h.bf16 %v6234_v45  ;;  %v1352_v16 = vsel %vm1242_vm0, %v2855_v23, %v3678_v62  ;;  %v2981_v49 = vld [vmem:[%s4012_s5 + $0x9a] sm:$0xff]  ;;  %v2982_v62 = vld [vmem:[%s4012_s5 + $0xaa] sm:$0xff] }
 0x15c   : > { %v1286_v46 = vsel %vm1275_vm1, %v1253_v39, %v3517_v43  ;;  %v3598_v52 = vunpack.i.h.bf16 %v6235_v29  ;;  %v1384_v26 = vsel %vm1275_vm1, %v1352_v16, %v3813_v22  ;;  %v3683_v51 = vunpack.i.h.bf16 %v6236_v30  ;;  %v6241_v22 = vld [vmem:[#allocation6_spill] sm:$0xff]  ;;  %v2983_v30 = vld [vmem:[%s4012_s5 + $0xb2] sm:$0xff]  ;;  %v2984_v39 = vld [vmem:[%s4012_s5 + $0xc2] sm:$0xff] }
 0x15d   : > { %1686 = vmatmul.mubr.f32.gmra.mrb[18].mxu0 %v1318_v3  ;;  %v1319_v17 = vsel %vm1308_vm2, %v1286_v46, %v3597_v58  ;;  %v3837_v54 = vunpack.i.l.bf16 %v3836_v40  ;;  %v1416_v18 = vsel %vm1308_vm2, %v1384_v26, %v3828_v24  ;;  %v1353_v47 = vsel %vm1242_vm0, %v2856_v10, %v3682_v44  ;;  %v2859_v24 = vld [vmem:[%s4012_s5 + $0xc9] sm:$0xff]  ;;  %v6243_v10 = vld [vmem:[#allocation23_spill] sm:$0xff] }
 0x15e   : > { %3247 = vmatmul.mubr.msk.f32.gmra.mrb[18].mxu1 %vm1242_vm0, %v2975_v2  ;;  %1690 = vmatprep.mubr.f32.mxu0 %v1415_v48  ;;  %v3442_v38 = vunpack.i.l.bf16 %v6237_v55  ;;  %v3833_v33 = vunpack.i.h.bf16 %v5028_v61  ;;  %v1254_v36 = vsel %vm1242_vm0, %v195_v50, %v3438_v14  ;;  %v1385_v56 = vsel %vm1275_vm1, %v1353_v47, %v3832_v4  ;;  %v2858_v2 = vld [vmem:[%s4012_s5 + $0xc1] sm:$0xff]  ;;  %v197_v61 = vld [vmem:[%s4012_s5 + $0x98] sm:$0xff]  ;;  %v5105_v4 = vpop.permute.xlu0 %3850  ;;  %v2985_v47 = vld [vmem:[%s4012_s5 + $0xca] sm:$0xff] }
 0x15f   : > { %3249 = vmatprep.mubr.msk.f32.mxu1 %vm1242_vm0, %v2976_v1  ;;  %v3522_v32 = vunpack.i.l.bf16 %v6238_v12  ;;  %v1287_v7 = vsel %vm1275_vm1, %v1254_v36, %v3518_v25  ;;  %v3602_v35 = vunpack.i.l.bf16 %v6239_v37  ;;  %v3687_v11 = vunpack.i.l.bf16 %v6240_v15  ;;  %v6242_v48 = vld [vmem:[#allocation15_spill] sm:$0xff]  ;;  %v6244_v16 = vld [vmem:[#allocation33_spill] sm:$0xff] }
 0x160   : > { %v1320_v57 = vsel %vm1308_vm2, %v1287_v7, %v3598_v52  ;;  %v3838_v20 = vunpack.i.h.bf16 %v3836_v40  ;;  %v1417_v27 = vsel %vm1308_vm2, %v1385_v56, %v3837_v54  ;;  %v1354_v9 = vsel %vm1242_vm0, %v2857_v6, %v3683_v51  ;;  %v3856_v54 = vpop.permute.xlu1 %3855  ;;  %v199_v56 = vld [vmem:[%s4012_s5 + $0xb0] sm:$0xff] }
 0x161   : > { %1691 = vmatmul.mubr.f32.gmra.mrb[20].mxu0 %v1319_v17  ;;  %v3443_v0 = vunpack.i.h.bf16 %v6237_v55  ;;  %v3842_v5 = vunpack.i.l.bf16 %v5069_v42  ;;  %v1255_v53 = vsel %vm1242_vm0, %v196_v21, %v3442_v38  ;;  %v1386_v41 = vsel %vm1275_vm1, %v1354_v9, %v3833_v33  ;;  %v2860_v38 = vld [vmem:[%s4012_s5 + $0xd9] sm:$0xff]  ;;  %v6245_v21 = vld [vmem:[#allocation9_spill] sm:$0xff] }
 0x162   : > { %3250 = vmatmul.mubr.msk.f32.gmra.mrb[20].mxu1 %vm1242_vm0, %v2977_v34  ;;  %1695 = vmatprep.mubr.f32.mxu0 %v1416_v18  ;;  %v3523_v45 = vunpack.i.h.bf16 %v6238_v12  ;;  %v1288_v43 = vsel %vm1275_vm1, %v1255_v53, %v3522_v32  ;;  %v3603_v13 = vunpack.i.h.bf16 %v6239_v37  ;;  %v3688_v1 = vunpack.i.h.bf16 %v6240_v15  ;;  %v198_v34 = vld [vmem:[%s4012_s5 + $0xa8] sm:$0xff]  ;;  %v200_v53 = vld [vmem:[%s4012_s5 + $0xc0] sm:$0xff] }
 0x163   : > { %3252 = vmatprep.mubr.msk.f32.mxu1 %vm1242_vm0, %v2978_v59  ;;  %v1321_v60 = vsel %vm1308_vm2, %v1288_v43, %v3602_v35  ;;  %v3847_v63 = vunpack.i.l.bf16 %v3846_v31  ;;  %v1418_v29 = vsel %vm1308_vm2, %v1386_v41, %v3838_v20  ;;  %v1355_v58 = vsel %vm1242_vm0, %v2858_v2, %v3687_v11  ;;  %v2987_v15 = vld [vmem:[%s4012_s5 + $0xe2] sm:$0xff] }
 0x164   : > { %v3447_v3 = vunpack.i.l.bf16 %v6241_v22  ;;  %v3843_v19 = vunpack.i.h.bf16 %v5069_v42  ;;  %v1256_v23 = vsel %vm1242_vm0, %v197_v61, %v3443_v0  ;;  %v1387_v44 = vsel %vm1275_vm1, %v1355_v58, %v3842_v5  ;;  %v2861_v20 = vld [vmem:[%s4012_s5 + $0xe1] sm:$0xff]  ;;  %v5141_v0 = vpop.permute.xlu0 %3860 }
 0x165   : > { %1696 = vmatmul.mubr.f32.gmra.mrb[22].mxu0 %v1320_v57  ;;  %v3527_v14 = vunpack.i.l.bf16 %v6242_v48  ;;  %v1289_v40 = vsel %vm1275_vm1, %v1256_v23, %v3523_v45  ;;  %v3607_v25 = vunpack.i.l.bf16 %v6243_v10  ;;  %v3692_v59 = vunpack.i.l.bf16 %v6244_v16  ;;  %v6248_v45 = vld [vmem:[#allocation32_spill] sm:$0xff] }
 0x166   : > { %3253 = vmatmul.mubr.msk.f32.gmra.mrb[22].mxu1 %vm1242_vm0, %v2979_v8  ;;  %1700 = vmatprep.mubr.f32.mxu0 %v1417_v27  ;;  %v1322_v46 = vsel %vm1308_vm2, %v1289_v40, %v3603_v13  ;;  %v3848_v50 = vunpack.i.h.bf16 %v3846_v31  ;;  %v1419_v52 = vsel %vm1308_vm2, %v1387_v44, %v3847_v63  ;;  %v1356_v17 = vsel %vm1242_vm0, %v2859_v24, %v3688_v1  ;;  %v2986_v8 = vld [vmem:[%s4012_s5 + $0xda] sm:$0xff]  ;;  %v6246_v27 = vld [vmem:[#allocation18_spill] sm:$0xff]  ;;  %v2988_v31 = vld [vmem:[%s4012_s5 + $0xf2] sm:$0xff]  ;;  %v3866_v63 = vpop.permute.xlu1 %3865 }
 0x167   : > { %3255 = vmatprep.mubr.msk.f32.mxu1 %vm1242_vm0, %v2980_v28  ;;  %v3448_v26 = vunpack.i.h.bf16 %v6241_v22  ;;  %v3852_v51 = vunpack.i.l.bf16 %v5105_v4  ;;  %v1257_v18 = vsel %vm1242_vm0, %v198_v34, %v3447_v3  ;;  %v1388_v55 = vsel %vm1275_vm1, %v1356_v17, %v3843_v19  ;;  %v2989_v58 = vld [vmem:[%s4012_s5 + $0xfa] sm:$0xff]  ;;  %v2862_v3 = vld [vmem:[%s4012_s5 + $0xf1] sm:$0xff]  ;;  %v201_v44 = vld [vmem:[%s4012_s5 + $0xc8] sm:$0xff] }
 0x168   : > { %v3528_v33 = vunpack.i.h.bf16 %v6242_v48  ;;  %v1290_v36 = vsel %vm1275_vm1, %v1257_v18, %v3527_v14  ;;  %v3608_v6 = vunpack.i.h.bf16 %v6243_v10  ;;  %v3693_v32 = vunpack.i.h.bf16 %v6244_v16  ;;  %v6249_v34 = vld [vmem:[#allocation8_spill] sm:$0xff]  ;;  %v2991_v16 = vld [vmem:[%s4012_s5 + $0x112] sm:$0xff] }
 0x169   : > { %1701 = vmatmul.mubr.f32.gmra.mrb[24].mxu0 %v1321_v60  ;;  %v1323_v12 = vsel %vm1308_vm2, %v1290_v36, %v3607_v25  ;;  %v3857_v42 = vunpack.i.l.bf16 %v3856_v54  ;;  %v1420_v7 = vsel %vm1308_vm2, %v1388_v55, %v3848_v50  ;;  %v1357_v28 = vsel %vm1242_vm0, %v2860_v38, %v3692_v59  ;;  %v2863_v50 = vld [vmem:[%s4012_s5 + $0xf9] sm:$0xff] }
 0x16a   : > { %3256 = vmatmul.mubr.msk.f32.gmra.mrb[24].mxu1 %vm1242_vm0, %v2981_v49  ;;  %1705 = vmatprep.mubr.f32.mxu0 %v1418_v29  ;;  %v3452_v37 = vunpack.i.l.bf16 %v6245_v21  ;;  %v3853_v35 = vunpack.i.h.bf16 %v5105_v4  ;;  %v1258_v57 = vsel %vm1242_vm0, %v199_v56, %v3448_v26  ;;  %v1389_v11 = vsel %vm1275_vm1, %v1357_v28, %v3852_v51  ;;  %v6247_v49 = vld [vmem:[#allocation26_spill] sm:$0xff]  ;;  %v5177_v26 = vpop.permute.xlu0 %3870  ;;  %v202_v18 = vld [vmem:[%s4012_s5 + $0xd8] sm:$0xff] }
 0x16b   : > { %3258 = vmatprep.mubr.msk.f32.mxu1 %vm1242_vm0, %v2982_v62  ;;  %v3532_v9 = vunpack.i.l.bf16 %v6246_v27  ;;  %v1291_v5 = vsel %vm1275_vm1, %v1258_v57, %v3528_v33  ;;  %v3612_v41 = vunpack.i.l.bf16 %v6247_v49  ;;  %v3697_v43 = vunpack.i.l.bf16 %v6248_v45  ;;  %v6252_v33 = vld [vmem:[#allocation35_spill] sm:$0xff]  ;;  %v2993_v28 = vld [vmem:[%s4012_s5 + $0x12a] sm:$0xff] }
 0x16c   : > { %v1324_v2 = vsel %vm1308_vm2, %v1291_v5, %v3608_v6  ;;  %v3858_v62 = vunpack.i.h.bf16 %v3856_v54  ;;  %v1421_v61 = vsel %vm1308_vm2, %v1389_v11, %v3857_v42  ;;  %v1358_v13 = vsel %vm1242_vm0, %v2861_v20, %v3693_v32  ;;  %v2992_v54 = vld [vmem:[%s4012_s5 + $0x122] sm:$0xff]  ;;  %v3876_v42 = vpop.permute.xlu1 %3875 }
 0x16d   : > { %1706 = vmatmul.mubr.f32.gmra.mrb[26].mxu0 %v1322_v46  ;;  %v3453_v60 = vunpack.i.h.bf16 %v6245_v21  ;;  %v3862_v1 = vunpack.i.l.bf16 %v5141_v0  ;;  %v1259_v29 = vsel %vm1242_vm0, %v200_v53, %v3452_v37  ;;  %v1390_v22 = vsel %vm1275_vm1, %v1358_v13, %v3853_v35  ;;  %v2864_v37 = vld [vmem:[%s4012_s5 + $0x109] sm:$0xff]  ;;  %v203_v11 = vld [vmem:[%s4012_s5 + $0xe0] sm:$0xff]  ;;  %v6253_v53 = vld [vmem:[#allocation11_spill] sm:$0xff] }
 0x16e   : > { %3259 = vmatmul.mubr.msk.f32.gmra.mrb[26].mxu1 %vm1242_vm0, %v2983_v30  ;;  %1710 = vmatprep.mubr.f32.mxu0 %v1419_v52  ;;  %v3533_v19 = vunpack.i.h.bf16 %v6246_v27  ;;  %v1292_v23 = vsel %vm1275_vm1, %v1259_v29, %v3532_v9  ;;  %v2990_v30 = vld [vmem:[%s4012_s5 + $0x10a] sm:$0xff]  ;;  %v3613_v24 = vunpack.i.h.bf16 %v6247_v49  ;;  %v3698_v14 = vunpack.i.h.bf16 %v6248_v45  ;;  %v6250_v52 = vld [vmem:[#allocation17_spill] sm:$0xff] }
 0x16f   : > { %3261 = vmatprep.mubr.msk.f32.mxu1 %vm1242_vm0, %v2984_v39  ;;  %v1325_v48 = vsel %vm1308_vm2, %v1292_v23, %v3612_v41  ;;  %v3867_v4 = vunpack.i.l.bf16 %v3866_v63  ;;  %v1422_v40 = vsel %vm1308_vm2, %v1390_v22, %v3858_v62  ;;  %v1359_v39 = vsel %vm1242_vm0, %v2862_v3, %v3697_v43  ;;  %v2995_v45 = vld [vmem:[%s4012_s5 + $0x142] sm:$0xff]  ;;  %v2865_v62 = vld [vmem:[%s4012_s5 + $0x111] sm:$0xff] }
 0x170   : > { %v3457_v10 = vunpack.i.l.bf16 %v6249_v34  ;;  %v3863_v25 = vunpack.i.h.bf16 %v5141_v0  ;;  %v1260_v46 = vsel %vm1242_vm0, %v201_v44, %v3453_v60  ;;  %v1391_v59 = vsel %vm1275_vm1, %v1359_v39, %v3862_v1  ;;  %v3881_v60 = vpop.permute.xlu0 %3880  ;;  %v204_v29 = vld [vmem:[%s4012_s5 + $0xf0] sm:$0xff]  ;;  %v2997_v39 = vld [vmem:[%s4012_s5 + $0x15a] sm:$0xff] }
 0x171   : > { %1711 = vmatmul.mubr.f32.gmra.mrb[28].mxu0 %v1323_v12  ;;  %v3537_v17 = vunpack.i.l.bf16 %v6250_v52  ;;  %v1293_v51 = vsel %vm1275_vm1, %v1260_v46, %v3533_v19  ;;  %v3702_v36 = vunpack.i.l.bf16 %v6252_v33  ;;  %v1423_v56 = vsel %vm1308_vm2, %v1391_v59, %v3867_v4  ;;  %v6256_v19 = vld [vmem:[#allocation34_spill] sm:$0xff]  ;;  %v3886_v4 = vpop.permute.xlu1 %3885  ;;  %v205_v59 = vld [vmem:[%s4012_s5 + $0xf8] sm:$0xff] }
 0x172   : > { %3262 = vmatmul.mubr.msk.f32.gmra.mrb[28].mxu1 %vm1242_vm0, %v2985_v47  ;;  %1715 = vmatprep.mubr.f32.mxu0 %v1420_v7  ;;  %v6251_v47 = vld [vmem:[#allocation25_spill] sm:$0xff]  ;;  %v1326_v38 = vsel %vm1308_vm2, %v1293_v51, %v3613_v24  ;;  %v1360_v6 = vsel %vm1242_vm0, %v2863_v50, %v3698_v14  ;;  %v3458_v12 = vunpack.i.h.bf16 %v6249_v34  ;;  %v3872_v32 = vunpack.i.l.bf16 %v5177_v26 }
 0x173   : > { %3264 = vmatprep.mubr.msk.f32.mxu1 %vm1242_vm0, %v2986_v8  ;;  %v3617_v55 = vunpack.i.l.bf16 %v6251_v47  ;;  %v3868_v8 = vunpack.i.h.bf16 %v3866_v63  ;;  %v1261_v7 = vsel %vm1242_vm0, %v202_v18, %v3457_v10  ;;  %v1392_v21 = vsel %vm1275_vm1, %v1360_v6, %v3863_v25  ;;  %v2996_v63 = vld [vmem:[%s4012_s5 + $0x152] sm:$0xff]  ;;  %v2866_v10 = vld [vmem:[%s4012_s5 + $0x121] sm:$0xff]  ;;  %v6257_v18 = vld [vmem:[#allocation10_spill] sm:$0xff] }
 0x174   : > { %v3538_v35 = vunpack.i.h.bf16 %v6250_v52  ;;  %v1294_v57 = vsel %vm1275_vm1, %v1261_v7, %v3537_v17  ;;  %v3618_v20 = vunpack.i.h.bf16 %v6251_v47  ;;  %v3703_v9 = vunpack.i.h.bf16 %v6252_v33  ;;  %v2999_v33 = vld [vmem:[%s4012_s5 + $0x172] sm:$0xff] }
 0x175   : > { %1716 = vmatmul.mubr.f32.gmra.mrb[30].mxu0 %v1324_v2  ;;  %v1327_v27 = vsel %vm1308_vm2, %v1294_v57, %v3617_v55  ;;  %v3877_v0 = vunpack.i.l.bf16 %v3876_v42  ;;  %v1424_v5 = vsel %vm1308_vm2, %v1392_v21, %v3868_v8  ;;  %v3462_v49 = vunpack.i.l.bf16 %v6253_v53  ;;  %v2867_v8 = vld [vmem:[%s4012_s5 + $0x129] sm:$0xff]  ;;  %v6259_v7 = vld [vmem:[#allocation27_spill] sm:$0xff] }
 0x176   : > { %3265 = vmatmul.mubr.msk.f32.gmra.mrb[30].mxu1 %vm1242_vm0, %v2987_v15  ;;  %1720 = vmatprep.mubr.f32.mxu0 %v1421_v61  ;;  %v2994_v15 = vld [vmem:[%s4012_s5 + $0x13a] sm:$0xff]  ;;  %v3873_v41 = vunpack.i.h.bf16 %v5177_v26  ;;  %v1262_v2 = vsel %vm1242_vm0, %v203_v11, %v3458_v12  ;;  %v3707_v23 = vunpack.i.l.bf16 %v6256_v19  ;;  %v1362_v24 = vsel %vm1242_vm0, %v2865_v62, %v3703_v9 }
 0x177   : > { %3267 = vmatprep.mubr.msk.f32.mxu1 %vm1242_vm0, %v2988_v31  ;;  %v1361_v31 = vsel %vm1242_vm0, %v2864_v37, %v3702_v36  ;;  %v6254_v61 = vld [vmem:[#allocation20_spill] sm:$0xff]  ;;  %v1295_v1 = vsel %vm1275_vm1, %v1262_v2, %v3538_v35  ;;  %v3882_v14 = vunpack.i.l.bf16 %v3881_v60  ;;  %v3708_v17 = vunpack.i.h.bf16 %v6256_v19 }
 0x178   : > { %v1393_v43 = vsel %vm1275_vm1, %v1361_v31, %v3872_v32  ;;  %v3542_v13 = vunpack.i.l.bf16 %v6254_v61  ;;  %v1328_v3 = vsel %vm1308_vm2, %v1295_v1, %v3618_v20  ;;  %v1394_v34 = vsel %vm1275_vm1, %v1362_v24, %v3873_v41  ;;  %v3000_v32 = vld [vmem:[%s4012_s5 + $0x182] sm:$0xff]  ;;  %v3001_v20 = vld [vmem:[%s4012_s5 + $0x18a] sm:$0xff] }
 0x179   : > { %1721 = vmatmul.mubr.f32.gmra.mrb[32].mxu0 %v1325_v48  ;;  %v1425_v44 = vsel %vm1308_vm2, %v1393_v43, %v3877_v0  ;;  %v3463_v48 = vunpack.i.h.bf16 %v6253_v53  ;;  %v3543_v25 = vunpack.i.h.bf16 %v6254_v61  ;;  %v3887_v26 = vunpack.i.l.bf16 %v3886_v4  ;;  %v207_v31 = vld [vmem:[%s4012_s5 + $0x110] sm:$0xff] }
 0x17a   : > { %3268 = vmatmul.mubr.msk.f32.gmra.mrb[32].mxu1 %vm1242_vm0, %v2989_v58  ;;  %1725 = vmatprep.mubr.f32.mxu0 %v1422_v40  ;;  %v6255_v58 = vld [vmem:[#allocation28_spill] sm:$0xff]  ;;  %v1263_v40 = vsel %vm1242_vm0, %v204_v29, %v3462_v49  ;;  %v3467_v47 = vunpack.i.l.bf16 %v6257_v18  ;;  %v3883_v55 = vunpack.i.h.bf16 %v3881_v60  ;;  %v3888_v37 = vunpack.i.h.bf16 %v3886_v4 }
 0x17b   : > { %3270 = vmatprep.mubr.msk.f32.mxu1 %vm1242_vm0, %v2990_v30  ;;  %v3622_v22 = vunpack.i.l.bf16 %v6255_v58  ;;  %v3878_v30 = vunpack.i.h.bf16 %v3876_v42  ;;  %v1296_v46 = vsel %vm1275_vm1, %v1263_v40, %v3542_v13  ;;  %v3623_v50 = vunpack.i.h.bf16 %v6255_v58  ;;  %v206_v42 = vld [vmem:[%s4012_s5 + $0x108] sm:$0xff] }
 0x17c   : > { %v1364_v57 = vsel %vm1242_vm0, %v2867_v8, %v3708_v17  ;;  %v1265_v11 = vsel %vm1242_vm0, %v206_v42, %v3467_v47  ;;  %v3628_v53 = vunpack.i.h.bf16 %v6259_v7 }
 0x17d   : > { %1726 = vmatmul.mubr.f32.gmra.mrb[34].mxu0 %v1326_v38  ;;  %v1329_v52 = vsel %vm1308_vm2, %v1296_v46, %v3622_v22  ;;  %v1426_v51 = vsel %vm1308_vm2, %v1394_v34, %v3878_v30  ;;  %v1264_v38 = vsel %vm1242_vm0, %v205_v59, %v3463_v48 }
 0x17e   : > { %3271 = vmatmul.mubr.msk.f32.gmra.mrb[34].mxu1 %vm1242_vm0, %v2991_v16  ;;  %1730 = vmatprep.mubr.f32.mxu0 %v1423_v56  ;;  %v2998_v16 = vld [vmem:[%s4012_s5 + $0x16a] sm:$0xff]  ;;  %v6258_v56 = vld [vmem:[#allocation19_spill] sm:$0xff]  ;;  %v1297_v12 = vsel %vm1275_vm1, %v1264_v38, %v3543_v25 }
 0x17f   : > { %3273 = vmatprep.mubr.msk.f32.mxu1 %vm1242_vm0, %v2992_v54  ;;  %v1363_v54 = vsel %vm1242_vm0, %v2866_v10, %v3707_v23  ;;  %v3547_v6 = vunpack.i.l.bf16 %v6258_v56  ;;  %v1330_v21 = vsel %vm1308_vm2, %v1297_v12, %v3623_v50  ;;  %v3548_v9 = vunpack.i.h.bf16 %v6258_v56 }
 0x180   : > { %v1395_v36 = vsel %vm1275_vm1, %v1363_v54, %v3882_v14  ;;  %v5289_v54 = vld [vmem:[#allocation2] ss:$0 sm:$0xff] }
 0x181   : > { %1731 = vmatmul.mubr.f32.gmra.mrb[36].mxu0 %v1327_v27  ;;  %v1427_v35 = vsel %vm1308_vm2, %v1395_v36, %v3887_v26  ;;  %v1396_v27 = vsel %vm1275_vm1, %v1364_v57, %v3883_v55  ;;  %v1298_v0 = vsel %vm1275_vm1, %v1265_v11, %v3547_v6 }
 0x182   : > { %3274 = vmatmul.mubr.msk.f32.gmra.mrb[36].mxu1 %vm1242_vm0, %v2993_v28  ;;  %1735 = vmatprep.mubr.f32.mxu0 %v1424_v5  ;;  %v3627_v28 = vunpack.i.l.bf16 %v6259_v7  ;;  %v3002_v5 = vld [vmem:[%s4012_s5 + $0x19a] sm:$0xff]  ;;  %v1428_v41 = vsel %vm1308_vm2, %v1396_v27, %v3888_v37 }
 0x183   : > { %3276 = vmatprep.mubr.msk.f32.mxu1 %vm1242_vm0, %v2994_v15  ;;  %v3468_v15 = vunpack.i.h.bf16 %v6257_v18 }
 0x184   : > { %v1331_v49 = vsel %vm1308_vm2, %v1298_v0, %v3627_v28 }
 0x185   : > { %1736 = vmatmul.mubr.f32.gmra.mrb[38].mxu0 %v1328_v3  ;;  %v1266_v2 = vsel %vm1242_vm0, %v207_v31, %v3468_v15 }
 0x186   : > { %3277 = vmatmul.mubr.msk.f32.gmra.mrb[38].mxu1 %vm1242_vm0, %v2995_v45  ;;  %1740 = vmatprep.mubr.f32.mxu0 %v1425_v44  ;;  %v3003_v45 = vld [vmem:[%s4012_s5 + $0x1a2] sm:$0xff]  ;;  %v1299_v43 = vsel %vm1275_vm1, %v1266_v2, %v3548_v9  ;;  %s3380_s5 = smul.u32 1536, %s6261_s13  ;;  %s3934_s13 = smov 126  }
 0x187   : > { %3279 = vmatprep.mubr.msk.f32.mxu1 %vm1242_vm0, %v2996_v63  ;;  %v1332_v62 = vsel %vm1308_vm2, %v1299_v43, %v3628_v53 }
 0x188   : > { %s5296_s19 = scalar_lea.vmem %s6145_s3, %s3380_s5 }
 0x189   : > { %1741 = vmatmul.mubr.f32.gmra.mrb[40].mxu0 %v1329_v52 }
 0x18a   : > { %3280 = vmatmul.mubr.msk.f32.gmra.mrb[40].mxu1 %vm1242_vm0, %v2997_v39  ;;  %1745 = vmatprep.mubr.f32.mxu0 %v1426_v51 }
 0x18b   : > { %3282 = vmatprep.mubr.msk.f32.mxu1 %vm1242_vm0, %v2998_v16 }
 0x18d   : > { %1746 = vmatmul.mubr.f32.gmra.mrb[42].mxu0 %v1330_v21 }
 0x18e   : > { %3283 = vmatmul.mubr.msk.f32.gmra.mrb[42].mxu1 %vm1242_vm0, %v2999_v33  ;;  %1750 = vmatprep.mubr.f32.mxu0 %v1427_v35 }
 0x18f   : > { %3285 = vmatprep.mubr.msk.f32.mxu1 %vm1242_vm0, %v3000_v32 }
 0x191   : > { %1751 = vmatmul.mubr.f32.gmra.mrb[44].mxu0 %v1331_v49 }
 0x192   : > { %3286 = vmatmul.mubr.msk.f32.gmra.mrb[44].mxu1 %vm1242_vm0, %v3001_v20  ;;  %1755 = vmatprep.mubr.f32.mxu0 %v1428_v41 }
 0x193   : > { %3288 = vmatprep.mubr.msk.f32.mxu1 %vm1242_vm0, %v3002_v5 }
 0x195   : > { %1756 = vmatmul.mubr.f32.gmra.mrb[46].mxu0 %v1332_v62 }
 0x196   : > { %3289 = vmatmul.mubr.msk.f32.gmra.mrb[46].mxu1 %vm1242_vm0, %v3003_v45 }
 0x20b   : > { %v1642_v61 = vpop.f32.mrb[0].mxu0  ;;  %v5272_v13 = vpop.f32.mrb[0].mxu1 }
 0x20c   : > { %v1644_v60 = vpop.f32.mrb[1].mxu0  ;;  %v1764_v1 = vpop.f32.mrb[1].mxu1  ;;  %v1643_v38 = vadd.f32 %v5289_v54, %v1642_v61 }
 0x20f   : > { %v1647_v63 = vpop.f32.mrb[2].mxu0  ;;  %v5274_v29 = vpop.f32.mrb[2].mxu1 }
 0x210   : > { %v1649_v58 = vpop.f32.mrb[3].mxu0  ;;  %v1769_v22 = vpop.f32.mrb[3].mxu1  ;;  %v1648_v55 = vadd.f32 %v5289_v54, %v1647_v63 }
 0x213   : > { %v1652_v3 = vpop.f32.mrb[4].mxu0  ;;  %v5276_v19 = vpop.f32.mrb[4].mxu1 }
 0x214   : > { %v1654_v23 = vpop.f32.mrb[5].mxu0  ;;  %v1774_v30 = vpop.f32.mrb[5].mxu1  ;;  %v1653_v42 = vadd.f32 %v5289_v54, %v1652_v3 }
 0x217   : > { %v1657_v44 = vpop.f32.mrb[6].mxu0  ;;  %v5278_v24 = vpop.f32.mrb[6].mxu1 }
 0x218   : > { %v1659_v48 = vpop.f32.mrb[7].mxu0  ;;  %v1779_v14 = vpop.f32.mrb[7].mxu1  ;;  %v1658_v32 = vadd.f32 %v5289_v54, %v1657_v44 }
 0x21b   : > { %v1662_v4 = vpop.f32.mrb[8].mxu0  ;;  %v5280_v40 = vpop.f32.mrb[8].mxu1 }
 0x21c   : > { %v1664_v39 = vpop.f32.mrb[9].mxu0  ;;  %v1784_v34 = vpop.f32.mrb[9].mxu1  ;;  %v1663_v11 = vadd.f32 %v5289_v54, %v1662_v4 }
 0x21f   : > { %v1667_v10 = vpop.f32.mrb[10].mxu0  ;;  %v5282_v25 = vpop.f32.mrb[10].mxu1 }
 0x220   : > { %v1669_v46 = vpop.f32.mrb[11].mxu0  ;;  %v1789_v16 = vpop.f32.mrb[11].mxu1  ;;  %v1668_v15 = vadd.f32 %v5289_v54, %v1667_v10 }
 0x223   : > { %v1672_v59 = vpop.f32.mrb[12].mxu0  ;;  %v5284_v50 = vpop.f32.mrb[12].mxu1 }
 0x224   : > { %v1674_v52 = vpop.f32.mrb[13].mxu0  ;;  %v1794_v17 = vpop.f32.mrb[13].mxu1  ;;  %v1673_v49 = vadd.f32 %v5289_v54, %v1672_v59 }
 0x228   : > { %v1677_v26 = vpop.f32.mrb[14].mxu0 }
 0x229   : > { %v5286_v51 = vpop.f32.mrb[14].mxu1  ;;  %v1679_v18 = vpop.f32.mrb[15].mxu0  ;;  %v1678_v53 = vadd.f32 %v5289_v54, %v1677_v26 }
 0x22a   : > { %v1799_v47 = vpop.f32.mrb[15].mxu1 }
 0x22c   : > { %v1682_v33 = vpop.f32.mrb[16].mxu0 }
 0x22d   : > { %v3245_v36 = vpop.f32.mrb[16].mxu1  ;;  %v1684_v56 = vpop.f32.mrb[17].mxu0  ;;  %v1683_v1 = vadd.f32 %v5289_v54, %v1682_v33 }
 0x22e   : > { %v5298_v8 = vadd.f32 %v3245_v36, %v1648_v55  ;;  %v1867_v6 = vpop.f32.mrb[17].mxu1 }
 0x22f   : > { %v5300_v12 = vadd.f32 %v1867_v6, %v1643_v38 }
 0x230   : > { %2028 = vst.msk [vmem:[%s5296_s19 + $0x8] sm:$0xff] %vm2026_vm3, %v5298_v8  ;;  %2093 = vrot.lane.b32.xlu1 %v5298_v8, %s3934_s13  ;;  %v1687_v7 = vpop.f32.mrb[18].mxu0 }
 0x231   : > { %2027 = vst.msk [vmem:[%s5296_s19] sm:$0xff] %vm2026_vm3, %v5300_v12  ;;  %v3248_v28 = vpop.f32.mrb[18].mxu1  ;;  %2091 = vrot.lane.b32.xlu0 %v5300_v12, %s3934_s13  ;;  %v1689_v37 = vpop.f32.mrb[19].mxu0  ;;  %v1688_v60 = vadd.f32 %v5289_v54, %v1687_v7 }
 0x232   : > { %v5314_v21 = vadd.f32 %v3248_v28, %v1658_v32  ;;  %v1877_v35 = vpop.f32.mrb[19].mxu1 }
 0x233   : > { %v5316_v57 = vadd.f32 %v1877_v35, %v1653_v42 }
 0x234   : > { %2030 = vst.msk [vmem:[%s5296_s19 + $0x28] sm:$0xff] %vm2026_vm3, %v5314_v21  ;;  %2222 = vrot.lane.b32.xlu1 %v5298_v8, %s3935_s20  ;;  %v1692_v20 = vpop.f32.mrb[20].mxu0 }
 0x235   : > { %2029 = vst.msk [vmem:[%s5296_s19 + $0x20] sm:$0xff] %vm2026_vm3, %v5316_v57  ;;  %v3251_v27 = vpop.f32.mrb[20].mxu1  ;;  %2220 = vrot.lane.b32.xlu0 %v5300_v12, %s3935_s20  ;;  %v1694_v0 = vpop.f32.mrb[21].mxu0  ;;  %v1693_v48 = vadd.f32 %v5289_v54, %v1692_v20 }
 0x236   : > { %v5330_v9 = vadd.f32 %v3251_v27, %v1668_v15  ;;  %v1887_v5 = vpop.f32.mrb[21].mxu1 }
 0x237   : > { %v5332_v31 = vadd.f32 %v1887_v5, %v1663_v11 }
 0x238   : > { %2032 = vst.msk [vmem:[%s5296_s19 + $0x48] sm:$0xff] %vm2026_vm3, %v5330_v9  ;;  %2351 = vrot.lane.b32.xlu1 %v5298_v8, %s3936_s21  ;;  %v1697_v41 = vpop.f32.mrb[22].mxu0 }
 0x239   : > { %2031 = vst.msk [vmem:[%s5296_s19 + $0x40] sm:$0xff] %vm2026_vm3, %v5332_v31  ;;  %v3254_v2 = vpop.f32.mrb[22].mxu1  ;;  %2349 = vrot.lane.b32.xlu0 %v5300_v12, %s3936_s21  ;;  %v1699_v43 = vpop.f32.mrb[23].mxu0  ;;  %v1698_v44 = vadd.f32 %v5289_v54, %v1697_v41 }
 0x23a   : > { %v5346_v45 = vadd.f32 %v3254_v2, %v1678_v53  ;;  %v1897_v62 = vpop.f32.mrb[23].mxu1 }
 0x23b   : > { %v5348_v61 = vadd.f32 %v1897_v62, %v1673_v49 }
 0x23c   : > { %2034 = vst.msk [vmem:[%s5296_s19 + $0x68] sm:$0xff] %vm2026_vm3, %v5346_v45  ;;  %2480 = vrot.lane.b32.xlu1 %v5298_v8, %s3937_s22  ;;  %v1702_v63 = vpop.f32.mrb[24].mxu0 }
 0x23d   : > { %2033 = vst.msk [vmem:[%s5296_s19 + $0x60] sm:$0xff] %vm2026_vm3, %v5348_v61  ;;  %v3257_v58 = vpop.f32.mrb[24].mxu1  ;;  %2478 = vrot.lane.b32.xlu0 %v5300_v12, %s3937_s22  ;;  %v1704_v3 = vpop.f32.mrb[25].mxu0  ;;  %v1703_v59 = vadd.f32 %v5289_v54, %v1702_v63 }
 0x23e   : > { %v5362_v22 = vadd.f32 %v3257_v58, %v1688_v60  ;;  %v1907_v23 = vpop.f32.mrb[25].mxu1 }
 0x23f   : > { %v5364_v30 = vadd.f32 %v1907_v23, %v1683_v1 }
 0x240   : > { %2036 = vst.msk [vmem:[%s5296_s19 + $0x88] sm:$0xff] %vm2026_vm3, %v5362_v22  ;;  %2097 = vrot.lane.b32.xlu1 %v5314_v21, %s3934_s13  ;;  %v1707_v14 = vpop.f32.mrb[26].mxu0 }
 0x241   : > { %2035 = vst.msk [vmem:[%s5296_s19 + $0x80] sm:$0xff] %vm2026_vm3, %v5364_v30  ;;  %v3260_v4 = vpop.f32.mrb[26].mxu1  ;;  %2095 = vrot.lane.b32.xlu0 %v5316_v57, %s3934_s13  ;;  %v1709_v34 = vpop.f32.mrb[27].mxu0  ;;  %v1708_v16 = vadd.f32 %v5289_v54, %v1707_v14  ;;  %v1768_v14 = vadd.f32 %v5289_v54, %v5274_v29 }
 0x242   : > { %v5378_v39 = vadd.f32 %v3260_v4, %v1698_v44  ;;  %v1917_v10 = vpop.f32.mrb[27].mxu1  ;;  %v1763_v34 = vadd.f32 %v5289_v54, %v5272_v13  ;;  %v1778_v13 = vadd.f32 %v5289_v54, %v5278_v24 }
 0x243   : > { %v5380_v46 = vadd.f32 %v1917_v10, %v1693_v48 }
 0x244   : > { %2038 = vst.msk [vmem:[%s5296_s19 + $0xa8] sm:$0xff] %vm2026_vm3, %v5378_v39  ;;  %2226 = vrot.lane.b32.xlu1 %v5314_v21, %s3935_s20  ;;  %v1712_v52 = vpop.f32.mrb[28].mxu0 }
 0x245   : > { %2037 = vst.msk [vmem:[%s5296_s19 + $0xa0] sm:$0xff] %vm2026_vm3, %v5380_v46  ;;  %v3263_v17 = vpop.f32.mrb[28].mxu1  ;;  %2224 = vrot.lane.b32.xlu0 %v5316_v57, %s3935_s20  ;;  %v1714_v18 = vpop.f32.mrb[29].mxu0  ;;  %v1713_v38 = vadd.f32 %v5289_v54, %v1712_v52 }
 0x246   : > { %v5394_v26 = vadd.f32 %v3263_v17, %v1708_v16  ;;  %v1927_v47 = vpop.f32.mrb[29].mxu1 }
 0x247   : > { %v5396_v55 = vadd.f32 %v1927_v47, %v1703_v59 }
 0x248   : > { %2040 = vst.msk [vmem:[%s5296_s19 + $0xc8] sm:$0xff] %vm2026_vm3, %v5394_v26  ;;  %2355 = vrot.lane.b32.xlu1 %v5314_v21, %s3936_s21  ;;  %v1717_v33 = vpop.f32.mrb[30].mxu0 }
 0x249   : > { %2039 = vst.msk [vmem:[%s5296_s19 + $0xc0] sm:$0xff] %vm2026_vm3, %v5396_v55  ;;  %v3266_v36 = vpop.f32.mrb[30].mxu1  ;;  %2353 = vrot.lane.b32.xlu0 %v5316_v57, %s3936_s21  ;;  %v1718_v56 = vadd.f32 %v5289_v54, %v1717_v33  ;;  %v1719_v6 = vpop.f32.mrb[31].mxu0 }
 0x24a   : > { %v1937_v32 = vpop.f32.mrb[31].mxu1 }
 0x24b   : > { %v5410_v42 = vadd.f32 %v1937_v32, %v1713_v38  ;;  %v5412_v7 = vadd.f32 %v3266_v36, %v1718_v56  ;;  %v1773_v38 = vadd.f32 %v5289_v54, %v5276_v19 }
 0x24c   : > { %2484 = vrot.lane.b32.xlu1 %v5314_v21, %s3937_s22  ;;  %v1722_v28 = vpop.f32.mrb[32].mxu0 }
 0x24d   : > { %2041 = vst.msk [vmem:[%s5296_s19 + $0xe0] sm:$0xff] %vm2026_vm3, %v5410_v42  ;;  %2482 = vrot.lane.b32.xlu0 %v5316_v57, %s3937_s22  ;;  %v3269_v37 = vpop.f32.mrb[32].mxu1  ;;  %2042 = vst.msk [vmem:[%s5296_s19 + $0xe8] sm:$0xff] %vm2026_vm3, %v5412_v7  ;;  %v1723_v35 = vadd.f32 %v5289_v54, %v1722_v28  ;;  %v1724_v15 = vpop.f32.mrb[33].mxu0  ;;  %v1788_v28 = vadd.f32 %v5289_v54, %v5282_v25 }
 0x24e   : > { %v1947_v11 = vpop.f32.mrb[33].mxu1 }
 0x24f   : > { %v5425_v20 = vadd.f32 %v1947_v11, %v1723_v35  ;;  %v1783_v35 = vadd.f32 %v5289_v54, %v5280_v40 }
 0x250   : > { %2101 = vrot.lane.b32.xlu1 %v5330_v9, %s3934_s13  ;;  %v1727_v27 = vpop.f32.mrb[34].mxu0 }
 0x251   : > { %2099 = vrot.lane.b32.xlu0 %v5332_v31, %s3934_s13  ;;  %v3272_v0 = vpop.f32.mrb[34].mxu1  ;;  %2043 = vst.msk [vmem:[%s5296_s19 + $0x100] sm:$0xff] %vm2026_vm3, %v5425_v20  ;;  %v1728_v5 = vadd.f32 %v5289_v54, %v1727_v27  ;;  %v1729_v53 = vpop.f32.mrb[35].mxu0 }
 0x252   : > { %v1957_v49 = vpop.f32.mrb[35].mxu1  ;;  %v1798_v53 = vadd.f32 %v5289_v54, %v5286_v51 }
 0x253   : > { %v5435_v41 = vadd.f32 %v3269_v37, %v1728_v5 }
 0x254   : > { %2230 = vrot.lane.b32.xlu1 %v5330_v9, %s3935_s20  ;;  %v1732_v2 = vpop.f32.mrb[36].mxu0 }
 0x255   : > { %2228 = vrot.lane.b32.xlu0 %v5332_v31, %s3935_s20  ;;  %v3275_v43 = vpop.f32.mrb[36].mxu1  ;;  %2044 = vst.msk [vmem:[%s5296_s19 + $0x108] sm:$0xff] %vm2026_vm3, %v5435_v41  ;;  %v1733_v62 = vadd.f32 %v5289_v54, %v1732_v2  ;;  %v1734_v60 = vpop.f32.mrb[37].mxu0  ;;  %v1793_v2 = vadd.f32 %v5289_v54, %v5284_v50 }
 0x256   : > { %v1967_v1 = vpop.f32.mrb[37].mxu1 }
 0x257   : > { %v5445_v63 = vadd.f32 %v1957_v49, %v1733_v62 }
 0x258   : > { %2359 = vrot.lane.b32.xlu1 %v5330_v9, %s3936_s21  ;;  %v1737_v58 = vpop.f32.mrb[38].mxu0 }
 0x259   : > { %2357 = vrot.lane.b32.xlu0 %v5332_v31, %s3936_s21  ;;  %v5451_v3 = vpop.f32.mrb[38].mxu1  ;;  %2045 = vst.msk [vmem:[%s5296_s19 + $0x120] sm:$0xff] %vm2026_vm3, %v5445_v63  ;;  %v1738_v23 = vadd.f32 %v5289_v54, %v1737_v58  ;;  %v1739_v44 = vpop.f32.mrb[39].mxu0 }
 0x25a   : > { %v1977_v48 = vpop.f32.mrb[39].mxu1 }
 0x25b   : > { %v5459_v4 = vadd.f32 %v3272_v0, %v1738_v23 }
 0x25c   : > { %2488 = vrot.lane.b32.xlu1 %v5330_v9, %s3937_s22  ;;  %v1742_v10 = vpop.f32.mrb[40].mxu0 }
 0x25d   : > { %v3281_v16 = vpop.f32.mrb[40].mxu1  ;;  %2486 = vrot.lane.b32.xlu0 %v5332_v31, %s3937_s22  ;;  %2046 = vst.msk [vmem:[%s5296_s19 + $0x128] sm:$0xff] %vm2026_vm3, %v5459_v4  ;;  %v1743_v29 = vadd.f32 %v5289_v54, %v1742_v10  ;;  %v1744_v52 = vpop.f32.mrb[41].mxu0 }
 0x25e   : > { %v5471_v59 = vadd.f32 %v3281_v16, %v1768_v14  ;;  %v1987_v17 = vpop.f32.mrb[41].mxu1 }
 0x25f   : > { %v5473_v18 = vadd.f32 %v1987_v17, %v1763_v34  ;;  %v5477_v47 = vadd.f32 %v1967_v1, %v1743_v29 }
 0x260   : > { %2052 = vst.msk [vmem:[%s5296_s19 + $0x188] sm:$0xff] %vm2026_vm3, %v5471_v59  ;;  %2105 = vrot.lane.b32.xlu1 %v5346_v45, %s3934_s13  ;;  %v1747_v33 = vpop.f32.mrb[42].mxu0 }
 0x261   : > { %2051 = vst.msk [vmem:[%s5296_s19 + $0x180] sm:$0xff] %vm2026_vm3, %v5473_v18  ;;  %v3284_v36 = vpop.f32.mrb[42].mxu1  ;;  %2103 = vrot.lane.b32.xlu0 %v5348_v61, %s3934_s13  ;;  %2047 = vst.msk [vmem:[%s5296_s19 + $0x140] sm:$0xff] %vm2026_vm3, %v5477_v47  ;;  %v1748_v24 = vadd.f32 %v5289_v54, %v1747_v33  ;;  %v1749_v6 = vpop.f32.mrb[43].mxu0 }
 0x262   : > { %v5495_v56 = vadd.f32 %v3284_v36, %v1778_v13  ;;  %v1997_v32 = vpop.f32.mrb[43].mxu1 }
 0x263   : > { %v5497_v19 = vadd.f32 %v1997_v32, %v1773_v38  ;;  %v5501_v37 = vadd.f32 %v3275_v43, %v1748_v24 }
 0x264   : > { %2054 = vst.msk [vmem:[%s5296_s19 + $0x1a8] sm:$0xff] %vm2026_vm3, %v5495_v56  ;;  %2234 = vrot.lane.b32.xlu1 %v5346_v45, %s3935_s20  ;;  %v1752_v15 = vpop.f32.mrb[44].mxu0 }
 0x265   : > { %2053 = vst.msk [vmem:[%s5296_s19 + $0x1a0] sm:$0xff] %vm2026_vm3, %v5497_v19  ;;  %v3287_v11 = vpop.f32.mrb[44].mxu1  ;;  %2232 = vrot.lane.b32.xlu0 %v5348_v61, %s3935_s20  ;;  %2048 = vst.msk [vmem:[%s5296_s19 + $0x148] sm:$0xff] %vm2026_vm3, %v5501_v37  ;;  %v1753_v25 = vadd.f32 %v5289_v54, %v1752_v15  ;;  %v1754_v0 = vpop.f32.mrb[45].mxu0 }
 0x266   : > { %v5519_v27 = vadd.f32 %v3287_v11, %v1788_v28  ;;  %v2007_v5 = vpop.f32.mrb[45].mxu1 }
 0x267   : > { %v5521_v40 = vadd.f32 %v2007_v5, %v1783_v35  ;;  %v5525_v49 = vadd.f32 %v1977_v48, %v1753_v25 }
 0x268   : > { %2056 = vst.msk [vmem:[%s5296_s19 + $0x1c8] sm:$0xff] %vm2026_vm3, %v5519_v27  ;;  %2363 = vrot.lane.b32.xlu1 %v5346_v45, %s3936_s21  ;;  %v1757_v43 = vpop.f32.mrb[46].mxu0 }
 0x269   : > { %2055 = vst.msk [vmem:[%s5296_s19 + $0x1c0] sm:$0xff] %vm2026_vm3, %v5521_v40  ;;  %v3290_v62 = vpop.f32.mrb[46].mxu1  ;;  %2361 = vrot.lane.b32.xlu0 %v5348_v61, %s3936_s21  ;;  %2049 = vst.msk [vmem:[%s5296_s19 + $0x160] sm:$0xff] %vm2026_vm3, %v5525_v49  ;;  %v1758_v51 = vadd.f32 %v5289_v54, %v1757_v43  ;;  %v1759_v1 = vpop.f32.mrb[47].mxu0 }
 0x26a   : > { %v5543_v60 = vadd.f32 %v3290_v62, %v1798_v53  ;;  %v2017_v58 = vpop.f32.mrb[47].mxu1 }
 0x26b   : > { %v5545_v23 = vadd.f32 %v2017_v58, %v1793_v2  ;;  %v5548_v50 = vadd.f32 %v5451_v3, %v1758_v51 }
 0x26c   : > { %2058 = vst.msk [vmem:[%s5296_s19 + $0x1e8] sm:$0xff] %vm2026_vm3, %v5543_v60  ;;  %2492 = vrot.lane.b32.xlu1 %v5346_v45, %s3937_s22 }
 0x26d   : > { %2057 = vst.msk [vmem:[%s5296_s19 + $0x1e0] sm:$0xff] %vm2026_vm3, %v5545_v23  ;;  %2490 = vrot.lane.b32.xlu0 %v5348_v61, %s3937_s22  ;;  %2050 = vst.msk [vmem:[%s5296_s19 + $0x168] sm:$0xff] %vm2026_vm3, %v5548_v50 }
 0x270   : > { %2109 = vrot.lane.b32.xlu1 %v5362_v22, %s3934_s13 }
 0x271   : > { %2107 = vrot.lane.b32.xlu0 %v5364_v30, %s3934_s13 }
 0x274   : > { %2238 = vrot.lane.b32.xlu1 %v5362_v22, %s3935_s20 }
 0x275   : > { %2236 = vrot.lane.b32.xlu0 %v5364_v30, %s3935_s20 }
 0x278   : > { %2367 = vrot.lane.b32.xlu1 %v5362_v22, %s3936_s21 }
 0x279   : > { %2365 = vrot.lane.b32.xlu0 %v5364_v30, %s3936_s21 }
 0x27c   : > { %2496 = vrot.lane.b32.xlu1 %v5362_v22, %s3937_s22 }
 0x27d   : > { %2494 = vrot.lane.b32.xlu0 %v5364_v30, %s3937_s22 }
 0x280   : > { %2113 = vrot.lane.b32.xlu1 %v5378_v39, %s3934_s13 }
 0x281   : > { %2111 = vrot.lane.b32.xlu0 %v5380_v46, %s3934_s13 }
 0x284   : > { %2242 = vrot.lane.b32.xlu1 %v5378_v39, %s3935_s20 }
 0x285   : > { %2240 = vrot.lane.b32.xlu0 %v5380_v46, %s3935_s20 }
 0x288   : > { %2371 = vrot.lane.b32.xlu1 %v5378_v39, %s3936_s21 }
 0x289   : > { %2369 = vrot.lane.b32.xlu0 %v5380_v46, %s3936_s21 }
 0x28c   : > { %2500 = vrot.lane.b32.xlu1 %v5378_v39, %s3937_s22 }
 0x28d   : > { %2498 = vrot.lane.b32.xlu0 %v5380_v46, %s3937_s22 }
 0x290   : > { %2117 = vrot.lane.b32.xlu1 %v5394_v26, %s3934_s13 }
 0x291   : > { %2115 = vrot.lane.b32.xlu0 %v5396_v55, %s3934_s13 }
 0x294   : > { %2246 = vrot.lane.b32.xlu1 %v5394_v26, %s3935_s20 }
 0x295   : > { %2244 = vrot.lane.b32.xlu0 %v5396_v55, %s3935_s20 }
 0x298   : > { %2375 = vrot.lane.b32.xlu1 %v5394_v26, %s3936_s21 }
 0x299   : > { %2373 = vrot.lane.b32.xlu0 %v5396_v55, %s3936_s21 }
 0x29c   : > { %2504 = vrot.lane.b32.xlu1 %v5394_v26, %s3937_s22 }
 0x29d   : > { %2502 = vrot.lane.b32.xlu0 %v5396_v55, %s3937_s22 }
 0x2a0   : > { %2121 = vrot.lane.b32.xlu1 %v5412_v7, %s3934_s13 }
 0x2a1   : > { %2119 = vrot.lane.b32.xlu0 %v5410_v42, %s3934_s13 }
 0x2a2   : > { %v2094_v54 = vpop.permute.xlu1 %2093 }
 0x2a3   : > { %3038 = vst.msk [vmem:[%s5296_s19 + $0x18] sm:$0xff] %vm2026_vm3, %v2094_v54  ;;  %v2092_v3 = vpop.permute.xlu0 %2091 }
 0x2a4   : > { %3037 = vst.msk [vmem:[%s5296_s19 + $0x10] sm:$0xff] %vm2026_vm3, %v2092_v3  ;;  %2250 = vrot.lane.b32.xlu1 %v5412_v7, %s3935_s20 }
 0x2a5   : > { %2248 = vrot.lane.b32.xlu0 %v5410_v42, %s3935_s20 }
 0x2a6   : > { %v2223_v44 = vpop.permute.xlu1 %2222 }
 0x2a7   : > { %3070 = vst.msk [vmem:[%s5296_s19 + $0x208] sm:$0xff] %vm2026_vm3, %v2223_v44  ;;  %v2221_v48 = vpop.permute.xlu0 %2220 }
 0x2a8   : > { %3069 = vst.msk [vmem:[%s5296_s19 + $0x200] sm:$0xff] %vm2026_vm3, %v2221_v48  ;;  %2379 = vrot.lane.b32.xlu1 %v5412_v7, %s3936_s21 }
 0x2a9   : > { %2377 = vrot.lane.b32.xlu0 %v5410_v42, %s3936_s21 }
 0x2aa   : > { %v2352_v14 = vpop.permute.xlu1 %2351 }
 0x2ab   : > { %3102 = vst.msk [vmem:[%s5296_s19 + $0x218] sm:$0xff] %vm2026_vm3, %v2352_v14  ;;  %v2350_v34 = vpop.permute.xlu0 %2349 }
 0x2ac   : > { %3101 = vst.msk [vmem:[%s5296_s19 + $0x210] sm:$0xff] %vm2026_vm3, %v2350_v34  ;;  %2508 = vrot.lane.b32.xlu1 %v5412_v7, %s3937_s22 }
 0x2ad   : > { %2506 = vrot.lane.b32.xlu0 %v5410_v42, %s3937_s22 }
 0x2ae   : > { %v2481_v10 = vpop.permute.xlu1 %2480 }
 0x2af   : > { %3134 = vst.msk [vmem:[%s5296_s19 + $0x408] sm:$0xff] %vm2026_vm3, %v2481_v10  ;;  %v2479_v16 = vpop.permute.xlu0 %2478 }
 0x2b0   : > { %3133 = vst.msk [vmem:[%s5296_s19 + $0x400] sm:$0xff] %vm2026_vm3, %v2479_v16  ;;  %2125 = vrot.lane.b32.xlu1 %v5435_v41, %s3934_s13 }
 0x2b1   : > { %2123 = vrot.lane.b32.xlu0 %v5425_v20, %s3934_s13 }
 0x2b2   : > { %v2098_v29 = vpop.permute.xlu1 %2097 }
 0x2b3   : > { %3040 = vst.msk [vmem:[%s5296_s19 + $0x38] sm:$0xff] %vm2026_vm3, %v2098_v29  ;;  %v2096_v52 = vpop.permute.xlu0 %2095 }
 0x2b4   : > { %3039 = vst.msk [vmem:[%s5296_s19 + $0x30] sm:$0xff] %vm2026_vm3, %v2096_v52  ;;  %2254 = vrot.lane.b32.xlu1 %v5435_v41, %s3935_s20 }
 0x2b5   : > { %2252 = vrot.lane.b32.xlu0 %v5425_v20, %s3935_s20 }
 0x2b6   : > { %v2227_v17 = vpop.permute.xlu1 %2226 }
 0x2b7   : > { %3072 = vst.msk [vmem:[%s5296_s19 + $0x228] sm:$0xff] %vm2026_vm3, %v2227_v17  ;;  %v2225_v13 = vpop.permute.xlu0 %2224 }
 0x2b8   : > { %3071 = vst.msk [vmem:[%s5296_s19 + $0x220] sm:$0xff] %vm2026_vm3, %v2225_v13  ;;  %2383 = vrot.lane.b32.xlu1 %v5435_v41, %s3936_s21 }
 0x2b9   : > { %2381 = vrot.lane.b32.xlu0 %v5425_v20, %s3936_s21 }
 0x2ba   : > { %v2356_v38 = vpop.permute.xlu1 %2355 }
 0x2bb   : > { %3104 = vst.msk [vmem:[%s5296_s19 + $0x238] sm:$0xff] %vm2026_vm3, %v2356_v38  ;;  %v2354_v33 = vpop.permute.xlu0 %2353 }
 0x2bc   : > { %3103 = vst.msk [vmem:[%s5296_s19 + $0x230] sm:$0xff] %vm2026_vm3, %v2354_v33  ;;  %2512 = vrot.lane.b32.xlu1 %v5435_v41, %s3937_s22 }
 0x2bd   : > { %2510 = vrot.lane.b32.xlu0 %v5425_v20, %s3937_s22 }
 0x2be   : > { %v2485_v36 = vpop.permute.xlu1 %2484 }
 0x2bf   : > { %3136 = vst.msk [vmem:[%s5296_s19 + $0x428] sm:$0xff] %vm2026_vm3, %v2485_v36  ;;  %v2483_v24 = vpop.permute.xlu0 %2482 }
 0x2c0   : > { %3135 = vst.msk [vmem:[%s5296_s19 + $0x420] sm:$0xff] %vm2026_vm3, %v2483_v24  ;;  %2129 = vrot.lane.b32.xlu1 %v5459_v4, %s3934_s13 }
 0x2c1   : > { %2127 = vrot.lane.b32.xlu0 %v5445_v63, %s3934_s13 }
 0x2c2   : > { %v2102_v6 = vpop.permute.xlu1 %2101 }
 0x2c3   : > { %3042 = vst.msk [vmem:[%s5296_s19 + $0x58] sm:$0xff] %vm2026_vm3, %v2102_v6  ;;  %v2100_v32 = vpop.permute.xlu0 %2099 }
 0x2c4   : > { %3041 = vst.msk [vmem:[%s5296_s19 + $0x50] sm:$0xff] %vm2026_vm3, %v2100_v32  ;;  %2258 = vrot.lane.b32.xlu1 %v5459_v4, %s3935_s20 }
 0x2c5   : > { %2256 = vrot.lane.b32.xlu0 %v5445_v63, %s3935_s20 }
 0x2c6   : > { %v2231_v28 = vpop.permute.xlu1 %2230 }
 0x2c7   : > { %3074 = vst.msk [vmem:[%s5296_s19 + $0x248] sm:$0xff] %vm2026_vm3, %v2231_v28  ;;  %v2229_v35 = vpop.permute.xlu0 %2228 }
 0x2c8   : > { %3073 = vst.msk [vmem:[%s5296_s19 + $0x240] sm:$0xff] %vm2026_vm3, %v2229_v35  ;;  %2387 = vrot.lane.b32.xlu1 %v5459_v4, %s3936_s21 }
 0x2c9   : > { %2385 = vrot.lane.b32.xlu0 %v5445_v63, %s3936_s21 }
 0x2ca   : > { %v2360_v15 = vpop.permute.xlu1 %2359 }
 0x2cb   : > { %3106 = vst.msk [vmem:[%s5296_s19 + $0x258] sm:$0xff] %vm2026_vm3, %v2360_v15  ;;  %v2358_v11 = vpop.permute.xlu0 %2357 }
 0x2cc   : > { %3105 = vst.msk [vmem:[%s5296_s19 + $0x250] sm:$0xff] %vm2026_vm3, %v2358_v11  ;;  %2516 = vrot.lane.b32.xlu1 %v5459_v4, %s3937_s22 }
 0x2cd   : > { %2514 = vrot.lane.b32.xlu0 %v5445_v63, %s3937_s22 }
 0x2ce   : > { %v2489_v25 = vpop.permute.xlu1 %2488 }
 0x2cf   : > { %3138 = vst.msk [vmem:[%s5296_s19 + $0x448] sm:$0xff] %vm2026_vm3, %v2489_v25  ;;  %v2487_v0 = vpop.permute.xlu0 %2486 }
 0x2d0   : > { %3137 = vst.msk [vmem:[%s5296_s19 + $0x440] sm:$0xff] %vm2026_vm3, %v2487_v0  ;;  %2141 = vrot.lane.b32.xlu1 %v5471_v59, %s3934_s13 }
 0x2d1   : > { %2139 = vrot.lane.b32.xlu0 %v5473_v18, %s3934_s13 }
 0x2d2   : > { %v2106_v5 = vpop.permute.xlu1 %2105 }
 0x2d3   : > { %3044 = vst.msk [vmem:[%s5296_s19 + $0x78] sm:$0xff] %vm2026_vm3, %v2106_v5  ;;  %v2104_v53 = vpop.permute.xlu0 %2103 }
 0x2d4   : > { %3043 = vst.msk [vmem:[%s5296_s19 + $0x70] sm:$0xff] %vm2026_vm3, %v2104_v53  ;;  %2270 = vrot.lane.b32.xlu1 %v5471_v59, %s3935_s20 }
 0x2d5   : > { %2268 = vrot.lane.b32.xlu0 %v5473_v18, %s3935_s20 }
 0x2d6   : > { %v2235_v2 = vpop.permute.xlu1 %2234 }
 0x2d7   : > { %3076 = vst.msk [vmem:[%s5296_s19 + $0x268] sm:$0xff] %vm2026_vm3, %v2235_v2  ;;  %v2233_v43 = vpop.permute.xlu0 %2232 }
 0x2d8   : > { %3075 = vst.msk [vmem:[%s5296_s19 + $0x260] sm:$0xff] %vm2026_vm3, %v2233_v43  ;;  %2399 = vrot.lane.b32.xlu1 %v5471_v59, %s3936_s21 }
 0x2d9   : > { %2397 = vrot.lane.b32.xlu0 %v5473_v18, %s3936_s21 }
 0x2da   : > { %v2364_v62 = vpop.permute.xlu1 %2363 }
 0x2db   : > { %3108 = vst.msk [vmem:[%s5296_s19 + $0x278] sm:$0xff] %vm2026_vm3, %v2364_v62  ;;  %v2362_v51 = vpop.permute.xlu0 %2361 }
 0x2dc   : > { %3107 = vst.msk [vmem:[%s5296_s19 + $0x270] sm:$0xff] %vm2026_vm3, %v2362_v51  ;;  %2528 = vrot.lane.b32.xlu1 %v5471_v59, %s3937_s22 }
 0x2dd   : > { %2526 = vrot.lane.b32.xlu0 %v5473_v18, %s3937_s22 }
 0x2de   : > { %v2493_v1 = vpop.permute.xlu1 %2492 }
 0x2df   : > { %3140 = vst.msk [vmem:[%s5296_s19 + $0x468] sm:$0xff] %vm2026_vm3, %v2493_v1  ;;  %v2491_v58 = vpop.permute.xlu0 %2490 }
 0x2e0   : > { %3139 = vst.msk [vmem:[%s5296_s19 + $0x460] sm:$0xff] %vm2026_vm3, %v2491_v58  ;;  %2145 = vrot.lane.b32.xlu1 %v5495_v56, %s3934_s13 }
 0x2e1   : > { %2131 = vrot.lane.b32.xlu0 %v5477_v47, %s3934_s13 }
 0x2e2   : > { %v2110_v54 = vpop.permute.xlu1 %2109 }
 0x2e3   : > { %3046 = vst.msk [vmem:[%s5296_s19 + $0x98] sm:$0xff] %vm2026_vm3, %v2110_v54  ;;  %v2108_v3 = vpop.permute.xlu0 %2107 }
 0x2e4   : > { %3045 = vst.msk [vmem:[%s5296_s19 + $0x90] sm:$0xff] %vm2026_vm3, %v2108_v3  ;;  %2274 = vrot.lane.b32.xlu1 %v5495_v56, %s3935_s20 }
 0x2e5   : > { %2260 = vrot.lane.b32.xlu0 %v5477_v47, %s3935_s20 }
 0x2e6   : > { %v2239_v44 = vpop.permute.xlu1 %2238 }
 0x2e7   : > { %3078 = vst.msk [vmem:[%s5296_s19 + $0x288] sm:$0xff] %vm2026_vm3, %v2239_v44  ;;  %v2237_v48 = vpop.permute.xlu0 %2236 }
 0x2e8   : > { %3077 = vst.msk [vmem:[%s5296_s19 + $0x280] sm:$0xff] %vm2026_vm3, %v2237_v48  ;;  %2403 = vrot.lane.b32.xlu1 %v5495_v56, %s3936_s21 }
 0x2e9   : > { %2389 = vrot.lane.b32.xlu0 %v5477_v47, %s3936_s21 }
 0x2ea   : > { %v2368_v14 = vpop.permute.xlu1 %2367 }
 0x2eb   : > { %3110 = vst.msk [vmem:[%s5296_s19 + $0x298] sm:$0xff] %vm2026_vm3, %v2368_v14  ;;  %v2366_v34 = vpop.permute.xlu0 %2365 }
 0x2ec   : > { %3109 = vst.msk [vmem:[%s5296_s19 + $0x290] sm:$0xff] %vm2026_vm3, %v2366_v34  ;;  %2133 = vrot.lane.b32.xlu1 %v5501_v37, %s3934_s13 }
 0x2ed   : > { %2518 = vrot.lane.b32.xlu0 %v5477_v47, %s3937_s22 }
 0x2ee   : > { %v2497_v10 = vpop.permute.xlu1 %2496 }
 0x2ef   : > { %3142 = vst.msk [vmem:[%s5296_s19 + $0x488] sm:$0xff] %vm2026_vm3, %v2497_v10  ;;  %v2495_v16 = vpop.permute.xlu0 %2494 }
 0x2f0   : > { %3141 = vst.msk [vmem:[%s5296_s19 + $0x480] sm:$0xff] %vm2026_vm3, %v2495_v16  ;;  %2262 = vrot.lane.b32.xlu1 %v5501_v37, %s3935_s20 }
 0x2f1   : > { %2143 = vrot.lane.b32.xlu0 %v5497_v19, %s3934_s13 }
 0x2f2   : > { %v2114_v29 = vpop.permute.xlu1 %2113 }
 0x2f3   : > { %3048 = vst.msk [vmem:[%s5296_s19 + $0xb8] sm:$0xff] %vm2026_vm3, %v2114_v29  ;;  %v2112_v52 = vpop.permute.xlu0 %2111 }
 0x2f4   : > { %3047 = vst.msk [vmem:[%s5296_s19 + $0xb0] sm:$0xff] %vm2026_vm3, %v2112_v52  ;;  %2391 = vrot.lane.b32.xlu1 %v5501_v37, %s3936_s21 }
 0x2f5   : > { %2272 = vrot.lane.b32.xlu0 %v5497_v19, %s3935_s20 }
 0x2f6   : > { %v2243_v17 = vpop.permute.xlu1 %2242 }
 0x2f7   : > { %3080 = vst.msk [vmem:[%s5296_s19 + $0x2a8] sm:$0xff] %vm2026_vm3, %v2243_v17  ;;  %v2241_v13 = vpop.permute.xlu0 %2240 }
 0x2f8   : > { %3079 = vst.msk [vmem:[%s5296_s19 + $0x2a0] sm:$0xff] %vm2026_vm3, %v2241_v13  ;;  %2520 = vrot.lane.b32.xlu1 %v5501_v37, %s3937_s22 }
 0x2f9   : > { %2401 = vrot.lane.b32.xlu0 %v5497_v19, %s3936_s21 }
 0x2fa   : > { %v2372_v38 = vpop.permute.xlu1 %2371 }
 0x2fb   : > { %3112 = vst.msk [vmem:[%s5296_s19 + $0x2b8] sm:$0xff] %vm2026_vm3, %v2372_v38  ;;  %v2370_v33 = vpop.permute.xlu0 %2369 }
 0x2fc   : > { %3111 = vst.msk [vmem:[%s5296_s19 + $0x2b0] sm:$0xff] %vm2026_vm3, %v2370_v33  ;;  %2149 = vrot.lane.b32.xlu1 %v5519_v27, %s3934_s13 }
 0x2fd   : > { %2147 = vrot.lane.b32.xlu0 %v5521_v40, %s3934_s13 }
 0x2fe   : > { %v2501_v36 = vpop.permute.xlu1 %2500 }
 0x2ff   : > { %3144 = vst.msk [vmem:[%s5296_s19 + $0x4a8] sm:$0xff] %vm2026_vm3, %v2501_v36  ;;  %v2499_v24 = vpop.permute.xlu0 %2498 }
 0x300   : > { %3143 = vst.msk [vmem:[%s5296_s19 + $0x4a0] sm:$0xff] %vm2026_vm3, %v2499_v24  ;;  %2278 = vrot.lane.b32.xlu1 %v5519_v27, %s3935_s20 }
 0x301   : > { %2276 = vrot.lane.b32.xlu0 %v5521_v40, %s3935_s20 }
 0x302   : > { %v2118_v6 = vpop.permute.xlu1 %2117 }
 0x303   : > { %3050 = vst.msk [vmem:[%s5296_s19 + $0xd8] sm:$0xff] %vm2026_vm3, %v2118_v6  ;;  %v2116_v32 = vpop.permute.xlu0 %2115 }
 0x304   : > { %3049 = vst.msk [vmem:[%s5296_s19 + $0xd0] sm:$0xff] %vm2026_vm3, %v2116_v32  ;;  %2407 = vrot.lane.b32.xlu1 %v5519_v27, %s3936_s21 }
 0x305   : > { %2405 = vrot.lane.b32.xlu0 %v5521_v40, %s3936_s21 }
 0x306   : > { %v2247_v28 = vpop.permute.xlu1 %2246 }
 0x307   : > { %3082 = vst.msk [vmem:[%s5296_s19 + $0x2c8] sm:$0xff] %vm2026_vm3, %v2247_v28  ;;  %v2245_v35 = vpop.permute.xlu0 %2244 }
 0x308   : > { %3081 = vst.msk [vmem:[%s5296_s19 + $0x2c0] sm:$0xff] %vm2026_vm3, %v2245_v35  ;;  %2153 = vrot.lane.b32.xlu1 %v5543_v60, %s3934_s13 }
 0x309   : > { %2135 = vrot.lane.b32.xlu0 %v5525_v49, %s3934_s13 }
 0x30a   : > { %v2376_v15 = vpop.permute.xlu1 %2375 }
 0x30b   : > { %3114 = vst.msk [vmem:[%s5296_s19 + $0x2d8] sm:$0xff] %vm2026_vm3, %v2376_v15  ;;  %v2374_v11 = vpop.permute.xlu0 %2373 }
 0x30c   : > { %3113 = vst.msk [vmem:[%s5296_s19 + $0x2d0] sm:$0xff] %vm2026_vm3, %v2374_v11  ;;  %2282 = vrot.lane.b32.xlu1 %v5543_v60, %s3935_s20 }
 0x30d   : > { %2264 = vrot.lane.b32.xlu0 %v5525_v49, %s3935_s20 }
 0x30e   : > { %v2505_v25 = vpop.permute.xlu1 %2504 }
 0x30f   : > { %3146 = vst.msk [vmem:[%s5296_s19 + $0x4c8] sm:$0xff] %vm2026_vm3, %v2505_v25  ;;  %v2503_v0 = vpop.permute.xlu0 %2502 }
 0x310   : > { %3145 = vst.msk [vmem:[%s5296_s19 + $0x4c0] sm:$0xff] %vm2026_vm3, %v2503_v0  ;;  %2411 = vrot.lane.b32.xlu1 %v5543_v60, %s3936_s21 }
 0x311   : > { %2393 = vrot.lane.b32.xlu0 %v5525_v49, %s3936_s21 }
 0x312   : > { %v2122_v5 = vpop.permute.xlu1 %2121 }
 0x313   : > { %3052 = vst.msk [vmem:[%s5296_s19 + $0xf8] sm:$0xff] %vm2026_vm3, %v2122_v5  ;;  %v2120_v53 = vpop.permute.xlu0 %2119 }
 0x314   : > { %3051 = vst.msk [vmem:[%s5296_s19 + $0xf0] sm:$0xff] %vm2026_vm3, %v2120_v53  ;;  %2137 = vrot.lane.b32.xlu1 %v5548_v50, %s3934_s13 }
 0x315   : > { %2522 = vrot.lane.b32.xlu0 %v5525_v49, %s3937_s22 }
 0x316   : > { %v2251_v2 = vpop.permute.xlu1 %2250 }
 0x317   : > { %3084 = vst.msk [vmem:[%s5296_s19 + $0x2e8] sm:$0xff] %vm2026_vm3, %v2251_v2  ;;  %v2249_v43 = vpop.permute.xlu0 %2248 }
 0x318   : > { %3083 = vst.msk [vmem:[%s5296_s19 + $0x2e0] sm:$0xff] %vm2026_vm3, %v2249_v43  ;;  %2266 = vrot.lane.b32.xlu1 %v5548_v50, %s3935_s20 }
 0x319   : > { %2151 = vrot.lane.b32.xlu0 %v5545_v23, %s3934_s13 }
 0x31a   : > { %v2380_v62 = vpop.permute.xlu1 %2379 }
 0x31b   : > { %3116 = vst.msk [vmem:[%s5296_s19 + $0x2f8] sm:$0xff] %vm2026_vm3, %v2380_v62  ;;  %v2378_v51 = vpop.permute.xlu0 %2377 }
 0x31c   : > { %3115 = vst.msk [vmem:[%s5296_s19 + $0x2f0] sm:$0xff] %vm2026_vm3, %v2378_v51  ;;  %2395 = vrot.lane.b32.xlu1 %v5548_v50, %s3936_s21 }
 0x31d   : > { %2280 = vrot.lane.b32.xlu0 %v5545_v23, %s3935_s20 }
 0x31e   : > { %v2509_v1 = vpop.permute.xlu1 %2508 }
 0x31f   : > { %3148 = vst.msk [vmem:[%s5296_s19 + $0x4e8] sm:$0xff] %vm2026_vm3, %v2509_v1  ;;  %v2507_v58 = vpop.permute.xlu0 %2506 }
 0x320   : > { %3147 = vst.msk [vmem:[%s5296_s19 + $0x4e0] sm:$0xff] %vm2026_vm3, %v2507_v58  ;;  %2524 = vrot.lane.b32.xlu1 %v5548_v50, %s3937_s22 }
 0x321   : > { %2409 = vrot.lane.b32.xlu0 %v5545_v23, %s3936_s21 }
 0x322   : > { %v2126_v54 = vpop.permute.xlu1 %2125 }
 0x323   : > { %3054 = vst.msk [vmem:[%s5296_s19 + $0x118] sm:$0xff] %vm2026_vm3, %v2126_v54  ;;  %v2124_v3 = vpop.permute.xlu0 %2123 }
 0x324   : > { %3053 = vst.msk [vmem:[%s5296_s19 + $0x110] sm:$0xff] %vm2026_vm3, %v2124_v3  ;;  %2532 = vrot.lane.b32.xlu1 %v5495_v56, %s3937_s22 }
 0x325   : > { %2530 = vrot.lane.b32.xlu0 %v5497_v19, %s3937_s22 }
 0x326   : > { %v2255_v44 = vpop.permute.xlu1 %2254 }
 0x327   : > { %3086 = vst.msk [vmem:[%s5296_s19 + $0x308] sm:$0xff] %vm2026_vm3, %v2255_v44  ;;  %v2253_v48 = vpop.permute.xlu0 %2252 }
 0x328   : > { %3085 = vst.msk [vmem:[%s5296_s19 + $0x300] sm:$0xff] %vm2026_vm3, %v2253_v48  ;;  %2536 = vrot.lane.b32.xlu1 %v5519_v27, %s3937_s22 }
 0x329   : > { %2534 = vrot.lane.b32.xlu0 %v5521_v40, %s3937_s22 }
 0x32a   : > { %v2384_v14 = vpop.permute.xlu1 %2383 }
 0x32b   : > { %3118 = vst.msk [vmem:[%s5296_s19 + $0x318] sm:$0xff] %vm2026_vm3, %v2384_v14  ;;  %v2382_v34 = vpop.permute.xlu0 %2381 }
 0x32c   : > { %3117 = vst.msk [vmem:[%s5296_s19 + $0x310] sm:$0xff] %vm2026_vm3, %v2382_v34  ;;  %2540 = vrot.lane.b32.xlu1 %v5543_v60, %s3937_s22 }
 0x32d   : > { %2538 = vrot.lane.b32.xlu0 %v5545_v23, %s3937_s22 }
 0x32e   : > { %v2513_v10 = vpop.permute.xlu1 %2512 }
 0x32f   : > { %3150 = vst.msk [vmem:[%s5296_s19 + $0x508] sm:$0xff] %vm2026_vm3, %v2513_v10  ;;  %v2511_v16 = vpop.permute.xlu0 %2510 }
 0x330   : > { %3149 = vst.msk [vmem:[%s5296_s19 + $0x500] sm:$0xff] %vm2026_vm3, %v2511_v16  ;;  %2609 = vrot.lane.b32.xlu1 %v5298_v8, %s3938_s23 }
 0x331   : > { %2607 = vrot.lane.b32.xlu0 %v5300_v12, %s3938_s23 }
 0x332   : > { %v2130_v29 = vpop.permute.xlu1 %2129 }
 0x333   : > { %3056 = vst.msk [vmem:[%s5296_s19 + $0x138] sm:$0xff] %vm2026_vm3, %v2130_v29  ;;  %v2128_v52 = vpop.permute.xlu0 %2127 }
 0x334   : > { %3055 = vst.msk [vmem:[%s5296_s19 + $0x130] sm:$0xff] %vm2026_vm3, %v2128_v52  ;;  %2613 = vrot.lane.b32.xlu1 %v5314_v21, %s3938_s23 }
 0x335   : > { %2611 = vrot.lane.b32.xlu0 %v5316_v57, %s3938_s23 }
 0x336   : > { %v2259_v17 = vpop.permute.xlu1 %2258 }
 0x337   : > { %3088 = vst.msk [vmem:[%s5296_s19 + $0x328] sm:$0xff] %vm2026_vm3, %v2259_v17  ;;  %v2257_v8 = vpop.permute.xlu0 %2256 }
 0x338   : > { %3087 = vst.msk [vmem:[%s5296_s19 + $0x320] sm:$0xff] %vm2026_vm3, %v2257_v8  ;;  %2617 = vrot.lane.b32.xlu1 %v5330_v9, %s3938_s23 }
 0x339   : > { %2615 = vrot.lane.b32.xlu0 %v5332_v31, %s3938_s23 }
 0x33a   : > { %v2388_v12 = vpop.permute.xlu1 %2387 }
 0x33b   : > { %3120 = vst.msk [vmem:[%s5296_s19 + $0x338] sm:$0xff] %vm2026_vm3, %v2388_v12  ;;  %v2386_v21 = vpop.permute.xlu0 %2385 }
 0x33c   : > { %3119 = vst.msk [vmem:[%s5296_s19 + $0x330] sm:$0xff] %vm2026_vm3, %v2386_v21  ;;  %2621 = vrot.lane.b32.xlu1 %v5346_v45, %s3938_s23 }
 0x33d   : > { %2619 = vrot.lane.b32.xlu0 %v5348_v61, %s3938_s23 }
 0x33e   : > { %v2517_v57 = vpop.permute.xlu1 %2516 }
 0x33f   : > { %3152 = vst.msk [vmem:[%s5296_s19 + $0x528] sm:$0xff] %vm2026_vm3, %v2517_v57  ;;  %v2515_v9 = vpop.permute.xlu0 %2514 }
 0x340   : > { %3151 = vst.msk [vmem:[%s5296_s19 + $0x520] sm:$0xff] %vm2026_vm3, %v2515_v9  ;;  %2625 = vrot.lane.b32.xlu1 %v5362_v22, %s3938_s23 }
 0x341   : > { %2623 = vrot.lane.b32.xlu0 %v5364_v30, %s3938_s23 }
 0x342   : > { %v2142_v31 = vpop.permute.xlu1 %2141 }
 0x343   : > { %3062 = vst.msk [vmem:[%s5296_s19 + $0x198] sm:$0xff] %vm2026_vm3, %v2142_v31  ;;  %v2140_v45 = vpop.permute.xlu0 %2139 }
 0x344   : > { %3061 = vst.msk [vmem:[%s5296_s19 + $0x190] sm:$0xff] %vm2026_vm3, %v2140_v45  ;;  %2629 = vrot.lane.b32.xlu1 %v5378_v39, %s3938_s23 }
 0x345   : > { %2627 = vrot.lane.b32.xlu0 %v5380_v46, %s3938_s23 }
 0x346   : > { %v2271_v61 = vpop.permute.xlu1 %2270 }
 0x347   : > { %3094 = vst.msk [vmem:[%s5296_s19 + $0x388] sm:$0xff] %vm2026_vm3, %v2271_v61  ;;  %v2269_v22 = vpop.permute.xlu0 %2268 }
 0x348   : > { %3093 = vst.msk [vmem:[%s5296_s19 + $0x380] sm:$0xff] %vm2026_vm3, %v2269_v22  ;;  %2633 = vrot.lane.b32.xlu1 %v5394_v26, %s3938_s23 }
 0x349   : > { %2631 = vrot.lane.b32.xlu0 %v5396_v55, %s3938_s23 }
 0x34a   : > { %v2400_v30 = vpop.permute.xlu1 %2399 }
 0x34b   : > { %3126 = vst.msk [vmem:[%s5296_s19 + $0x398] sm:$0xff] %vm2026_vm3, %v2400_v30  ;;  %v2398_v39 = vpop.permute.xlu0 %2397 }
 0x34c   : > { %3125 = vst.msk [vmem:[%s5296_s19 + $0x390] sm:$0xff] %vm2026_vm3, %v2398_v39  ;;  %2637 = vrot.lane.b32.xlu1 %v5412_v7, %s3938_s23 }
 0x34d   : > { %2635 = vrot.lane.b32.xlu0 %v5410_v42, %s3938_s23 }
 0x34e   : > { %v2529_v46 = vpop.permute.xlu1 %2528 }
 0x34f   : > { %3158 = vst.msk [vmem:[%s5296_s19 + $0x588] sm:$0xff] %vm2026_vm3, %v2529_v46  ;;  %v2527_v26 = vpop.permute.xlu0 %2526 }
 0x350   : > { %3157 = vst.msk [vmem:[%s5296_s19 + $0x580] sm:$0xff] %vm2026_vm3, %v2527_v26  ;;  %2641 = vrot.lane.b32.xlu1 %v5435_v41, %s3938_s23 }
 0x351   : > { %2639 = vrot.lane.b32.xlu0 %v5425_v20, %s3938_s23 }
 0x352   : > { %v2146_v55 = vpop.permute.xlu1 %2145 }
 0x353   : > { %3064 = vst.msk [vmem:[%s5296_s19 + $0x1b8] sm:$0xff] %vm2026_vm3, %v2146_v55  ;;  %v2132_v7 = vpop.permute.xlu0 %2131 }
 0x354   : > { %3057 = vst.msk [vmem:[%s5296_s19 + $0x150] sm:$0xff] %vm2026_vm3, %v2132_v7  ;;  %2645 = vrot.lane.b32.xlu1 %v5459_v4, %s3938_s23 }
 0x355   : > { %2643 = vrot.lane.b32.xlu0 %v5445_v63, %s3938_s23 }
 0x356   : > { %v2275_v42 = vpop.permute.xlu1 %2274 }
 0x357   : > { %3096 = vst.msk [vmem:[%s5296_s19 + $0x3a8] sm:$0xff] %vm2026_vm3, %v2275_v42  ;;  %v2261_v41 = vpop.permute.xlu0 %2260 }
 0x358   : > { %3089 = vst.msk [vmem:[%s5296_s19 + $0x340] sm:$0xff] %vm2026_vm3, %v2261_v41  ;;  %2649 = vrot.lane.b32.xlu1 %v5501_v37, %s3938_s23 }
 0x359   : > { %2647 = vrot.lane.b32.xlu0 %v5477_v47, %s3938_s23 }
 0x35a   : > { %v2404_v20 = vpop.permute.xlu1 %2403 }
 0x35b   : > { %3128 = vst.msk [vmem:[%s5296_s19 + $0x3b8] sm:$0xff] %vm2026_vm3, %v2404_v20  ;;  %v2390_v4 = vpop.permute.xlu0 %2389 }
 0x35c   : > { %3121 = vst.msk [vmem:[%s5296_s19 + $0x350] sm:$0xff] %vm2026_vm3, %v2390_v4  ;;  %2653 = vrot.lane.b32.xlu1 %v5548_v50, %s3938_s23 }
 0x35d   : > { %2651 = vrot.lane.b32.xlu0 %v5525_v49, %s3938_s23 }
 0x35e   : > { %v2134_v63 = vpop.permute.xlu1 %2133 }
 0x35f   : > { %3058 = vst.msk [vmem:[%s5296_s19 + $0x158] sm:$0xff] %vm2026_vm3, %v2134_v63  ;;  %v2519_v37 = vpop.permute.xlu0 %2518 }
 0x360   : > { %3153 = vst.msk [vmem:[%s5296_s19 + $0x540] sm:$0xff] %vm2026_vm3, %v2519_v37  ;;  %2657 = vrot.lane.b32.xlu1 %v5471_v59, %s3938_s23 }
 0x361   : > { %2655 = vrot.lane.b32.xlu0 %v5473_v18, %s3938_s23 }
 0x362   : > { %v2263_v47 = vpop.permute.xlu1 %2262 }
 0x363   : > { %3090 = vst.msk [vmem:[%s5296_s19 + $0x348] sm:$0xff] %vm2026_vm3, %v2263_v47  ;;  %v2144_v50 = vpop.permute.xlu0 %2143 }
 0x364   : > { %3063 = vst.msk [vmem:[%s5296_s19 + $0x1b0] sm:$0xff] %vm2026_vm3, %v2144_v50  ;;  %2661 = vrot.lane.b32.xlu1 %v5495_v56, %s3938_s23 }
 0x365   : > { %2659 = vrot.lane.b32.xlu0 %v5497_v19, %s3938_s23 }
 0x366   : > { %v2392_v49 = vpop.permute.xlu1 %2391 }
 0x367   : > { %3122 = vst.msk [vmem:[%s5296_s19 + $0x358] sm:$0xff] %vm2026_vm3, %v2392_v49  ;;  %v2273_v59 = vpop.permute.xlu0 %2272 }
 0x368   : > { %3095 = vst.msk [vmem:[%s5296_s19 + $0x3a0] sm:$0xff] %vm2026_vm3, %v2273_v59  ;;  %2665 = vrot.lane.b32.xlu1 %v5519_v27, %s3938_s23 }
 0x369   : > { %2663 = vrot.lane.b32.xlu0 %v5521_v40, %s3938_s23 }
 0x36a   : > { %v2521_v18 = vpop.permute.xlu1 %2520 }
 0x36b   : > { %3154 = vst.msk [vmem:[%s5296_s19 + $0x548] sm:$0xff] %vm2026_vm3, %v2521_v18  ;;  %v2402_v56 = vpop.permute.xlu0 %2401 }
 0x36c   : > { %3127 = vst.msk [vmem:[%s5296_s19 + $0x3b0] sm:$0xff] %vm2026_vm3, %v2402_v56  ;;  %2669 = vrot.lane.b32.xlu1 %v5543_v60, %s3938_s23 }
 0x36d   : > { %2667 = vrot.lane.b32.xlu0 %v5545_v23, %s3938_s23 }
 0x36e   : > { %v2150_v19 = vpop.permute.xlu1 %2149 }
 0x36f   : > { %3066 = vst.msk [vmem:[%s5296_s19 + $0x1d8] sm:$0xff] %vm2026_vm3, %v2150_v19  ;;  %v2148_v27 = vpop.permute.xlu0 %2147 }
 0x370   : > { %3065 = vst.msk [vmem:[%s5296_s19 + $0x1d0] sm:$0xff] %vm2026_vm3, %v2148_v27 }
 0x372   : > { %v2279_v40 = vpop.permute.xlu1 %2278 }
 0x373   : > { %3098 = vst.msk [vmem:[%s5296_s19 + $0x3c8] sm:$0xff] %vm2026_vm3, %v2279_v40  ;;  %v2277_v13 = vpop.permute.xlu0 %2276 }
 0x374   : > { %3097 = vst.msk [vmem:[%s5296_s19 + $0x3c0] sm:$0xff] %vm2026_vm3, %v2277_v13 }
 0x376   : > { %v2408_v60 = vpop.permute.xlu1 %2407 }
 0x377   : > { %3130 = vst.msk [vmem:[%s5296_s19 + $0x3d8] sm:$0xff] %vm2026_vm3, %v2408_v60  ;;  %v2406_v23 = vpop.permute.xlu0 %2405 }
 0x378   : > { %3129 = vst.msk [vmem:[%s5296_s19 + $0x3d0] sm:$0xff] %vm2026_vm3, %v2406_v23 }
 0x37a   : > { %v2154_v38 = vpop.permute.xlu1 %2153 }
 0x37b   : > { %3068 = vst.msk [vmem:[%s5296_s19 + $0x1f8] sm:$0xff] %vm2026_vm3, %v2154_v38  ;;  %v2136_v33 = vpop.permute.xlu0 %2135 }
 0x37c   : > { %3059 = vst.msk [vmem:[%s5296_s19 + $0x170] sm:$0xff] %vm2026_vm3, %v2136_v33 }
 0x37e   : > { %v2283_v36 = vpop.permute.xlu1 %2282 }
 0x37f   : > { %3100 = vst.msk [vmem:[%s5296_s19 + $0x3e8] sm:$0xff] %vm2026_vm3, %v2283_v36  ;;  %v2265_v24 = vpop.permute.xlu0 %2264 }
 0x380   : > { %3091 = vst.msk [vmem:[%s5296_s19 + $0x360] sm:$0xff] %vm2026_vm3, %v2265_v24 }
 0x382   : > { %v2412_v6 = vpop.permute.xlu1 %2411 }
 0x383   : > { %3132 = vst.msk [vmem:[%s5296_s19 + $0x3f8] sm:$0xff] %vm2026_vm3, %v2412_v6  ;;  %v2394_v32 = vpop.permute.xlu0 %2393 }
 0x384   : > { %3123 = vst.msk [vmem:[%s5296_s19 + $0x370] sm:$0xff] %vm2026_vm3, %v2394_v32 }
 0x386   : > { %v2138_v28 = vpop.permute.xlu1 %2137 }
 0x387   : > { %3060 = vst.msk [vmem:[%s5296_s19 + $0x178] sm:$0xff] %vm2026_vm3, %v2138_v28  ;;  %v2523_v35 = vpop.permute.xlu0 %2522 }
 0x388   : > { %3155 = vst.msk [vmem:[%s5296_s19 + $0x560] sm:$0xff] %vm2026_vm3, %v2523_v35 }
 0x38a   : > { %v2267_v15 = vpop.permute.xlu1 %2266 }
 0x38b   : > { %3092 = vst.msk [vmem:[%s5296_s19 + $0x368] sm:$0xff] %vm2026_vm3, %v2267_v15  ;;  %v2152_v11 = vpop.permute.xlu0 %2151 }
 0x38c   : > { %3067 = vst.msk [vmem:[%s5296_s19 + $0x1f0] sm:$0xff] %vm2026_vm3, %v2152_v11 }
 0x38e   : > { %v2396_v25 = vpop.permute.xlu1 %2395 }
 0x38f   : > { %3124 = vst.msk [vmem:[%s5296_s19 + $0x378] sm:$0xff] %vm2026_vm3, %v2396_v25  ;;  %v2281_v0 = vpop.permute.xlu0 %2280 }
 0x390   : > { %3099 = vst.msk [vmem:[%s5296_s19 + $0x3e0] sm:$0xff] %vm2026_vm3, %v2281_v0 }
 0x392   : > { %v2525_v5 = vpop.permute.xlu1 %2524 }
 0x393   : > { %3156 = vst.msk [vmem:[%s5296_s19 + $0x568] sm:$0xff] %vm2026_vm3, %v2525_v5  ;;  %v2410_v53 = vpop.permute.xlu0 %2409 }
 0x394   : > { %3131 = vst.msk [vmem:[%s5296_s19 + $0x3f0] sm:$0xff] %vm2026_vm3, %v2410_v53 }
 0x396   : > { %v2533_v2 = vpop.permute.xlu1 %2532 }
 0x397   : > { %3160 = vst.msk [vmem:[%s5296_s19 + $0x5a8] sm:$0xff] %vm2026_vm3, %v2533_v2  ;;  %v2531_v43 = vpop.permute.xlu0 %2530 }
 0x398   : > { %3159 = vst.msk [vmem:[%s5296_s19 + $0x5a0] sm:$0xff] %vm2026_vm3, %v2531_v43 }
 0x39a   : > { %v2537_v62 = vpop.permute.xlu1 %2536 }
 0x39b   : > { %3162 = vst.msk [vmem:[%s5296_s19 + $0x5c8] sm:$0xff] %vm2026_vm3, %v2537_v62  ;;  %v2535_v51 = vpop.permute.xlu0 %2534 }
 0x39c   : > { %3161 = vst.msk [vmem:[%s5296_s19 + $0x5c0] sm:$0xff] %vm2026_vm3, %v2535_v51 }
 0x39e   : > { %v2541_v1 = vpop.permute.xlu1 %2540 }
 0x39f   : > { %3164 = vst.msk [vmem:[%s5296_s19 + $0x5e8] sm:$0xff] %vm2026_vm3, %v2541_v1  ;;  %v2539_v58 = vpop.permute.xlu0 %2538 }
 0x3a0   : > { %3163 = vst.msk [vmem:[%s5296_s19 + $0x5e0] sm:$0xff] %vm2026_vm3, %v2539_v58 }
 0x3a2   : > { %v2610_v54 = vpop.permute.xlu1 %2609 }
 0x3a3   : > { %3166 = vst.msk [vmem:[%s5296_s19 + $0x418] sm:$0xff] %vm2026_vm3, %v2610_v54  ;;  %v2608_v3 = vpop.permute.xlu0 %2607 }
 0x3a4   : > { %3165 = vst.msk [vmem:[%s5296_s19 + $0x410] sm:$0xff] %vm2026_vm3, %v2608_v3 }
 0x3a6   : > { %v2614_v44 = vpop.permute.xlu1 %2613 }
 0x3a7   : > { %3168 = vst.msk [vmem:[%s5296_s19 + $0x438] sm:$0xff] %vm2026_vm3, %v2614_v44  ;;  %v2612_v48 = vpop.permute.xlu0 %2611 }
 0x3a8   : > { %3167 = vst.msk [vmem:[%s5296_s19 + $0x430] sm:$0xff] %vm2026_vm3, %v2612_v48 }
 0x3aa   : > { %v2618_v14 = vpop.permute.xlu1 %2617 }
 0x3ab   : > { %3170 = vst.msk [vmem:[%s5296_s19 + $0x458] sm:$0xff] %vm2026_vm3, %v2618_v14  ;;  %v2616_v34 = vpop.permute.xlu0 %2615 }
 0x3ac   : > { %3169 = vst.msk [vmem:[%s5296_s19 + $0x450] sm:$0xff] %vm2026_vm3, %v2616_v34 }
 0x3ae   : > { %v2622_v10 = vpop.permute.xlu1 %2621 }
 0x3af   : > { %3172 = vst.msk [vmem:[%s5296_s19 + $0x478] sm:$0xff] %vm2026_vm3, %v2622_v10  ;;  %v2620_v16 = vpop.permute.xlu0 %2619 }
 0x3b0   : > { %3171 = vst.msk [vmem:[%s5296_s19 + $0x470] sm:$0xff] %vm2026_vm3, %v2620_v16 }
 0x3b2   : > { %v2626_v29 = vpop.permute.xlu1 %2625 }
 0x3b3   : > { %3174 = vst.msk [vmem:[%s5296_s19 + $0x498] sm:$0xff] %vm2026_vm3, %v2626_v29  ;;  %v2624_v52 = vpop.permute.xlu0 %2623 }
 0x3b4   : > { %3173 = vst.msk [vmem:[%s5296_s19 + $0x490] sm:$0xff] %vm2026_vm3, %v2624_v52 }
 0x3b6   : > { %v2630_v17 = vpop.permute.xlu1 %2629 }
 0x3b7   : > { %3176 = vst.msk [vmem:[%s5296_s19 + $0x4b8] sm:$0xff] %vm2026_vm3, %v2630_v17  ;;  %v2628_v8 = vpop.permute.xlu0 %2627 }
 0x3b8   : > { %3175 = vst.msk [vmem:[%s5296_s19 + $0x4b0] sm:$0xff] %vm2026_vm3, %v2628_v8 }
 0x3ba   : > { %v2634_v12 = vpop.permute.xlu1 %2633 }
 0x3bb   : > { %3178 = vst.msk [vmem:[%s5296_s19 + $0x4d8] sm:$0xff] %vm2026_vm3, %v2634_v12  ;;  %v2632_v21 = vpop.permute.xlu0 %2631 }
 0x3bc   : > { %3177 = vst.msk [vmem:[%s5296_s19 + $0x4d0] sm:$0xff] %vm2026_vm3, %v2632_v21 }
 0x3be   : > { %v2638_v57 = vpop.permute.xlu1 %2637 }
 0x3bf   : > { %3180 = vst.msk [vmem:[%s5296_s19 + $0x4f8] sm:$0xff] %vm2026_vm3, %v2638_v57  ;;  %v2636_v9 = vpop.permute.xlu0 %2635 }
 0x3c0   : > { %3179 = vst.msk [vmem:[%s5296_s19 + $0x4f0] sm:$0xff] %vm2026_vm3, %v2636_v9 }
 0x3c2   : > { %v2642_v31 = vpop.permute.xlu1 %2641 }
 0x3c3   : > { %3182 = vst.msk [vmem:[%s5296_s19 + $0x518] sm:$0xff] %vm2026_vm3, %v2642_v31  ;;  %v2640_v45 = vpop.permute.xlu0 %2639 }
 0x3c4   : > { %3181 = vst.msk [vmem:[%s5296_s19 + $0x510] sm:$0xff] %vm2026_vm3, %v2640_v45 }
 0x3c6   : > { %v2646_v61 = vpop.permute.xlu1 %2645 }
 0x3c7   : > { %3184 = vst.msk [vmem:[%s5296_s19 + $0x538] sm:$0xff] %vm2026_vm3, %v2646_v61  ;;  %v2644_v22 = vpop.permute.xlu0 %2643 }
 0x3c8   : > { %3183 = vst.msk [vmem:[%s5296_s19 + $0x530] sm:$0xff] %vm2026_vm3, %v2644_v22 }
 0x3ca   : > { %v2650_v30 = vpop.permute.xlu1 %2649 }
 0x3cb   : > { %3186 = vst.msk [vmem:[%s5296_s19 + $0x558] sm:$0xff] %vm2026_vm3, %v2650_v30  ;;  %v2648_v39 = vpop.permute.xlu0 %2647 }
 0x3cc   : > { %3185 = vst.msk [vmem:[%s5296_s19 + $0x550] sm:$0xff] %vm2026_vm3, %v2648_v39 }
 0x3ce   : > { %v2654_v46 = vpop.permute.xlu1 %2653 }
 0x3cf   : > { %3188 = vst.msk [vmem:[%s5296_s19 + $0x578] sm:$0xff] %vm2026_vm3, %v2654_v46  ;;  %v2652_v26 = vpop.permute.xlu0 %2651 }
 0x3d0   : > { %3187 = vst.msk [vmem:[%s5296_s19 + $0x570] sm:$0xff] %vm2026_vm3, %v2652_v26 }
 0x3d2   : > { %v2658_v55 = vpop.permute.xlu1 %2657 }
 0x3d3   : > { %3190 = vst.msk [vmem:[%s5296_s19 + $0x598] sm:$0xff] %vm2026_vm3, %v2658_v55  ;;  %v2656_v7 = vpop.permute.xlu0 %2655 }
 0x3d4   : > { %3189 = vst.msk [vmem:[%s5296_s19 + $0x590] sm:$0xff] %vm2026_vm3, %v2656_v7 }
 0x3d6   : > { %v2662_v42 = vpop.permute.xlu1 %2661 }
 0x3d7   : > { %3192 = vst.msk [vmem:[%s5296_s19 + $0x5b8] sm:$0xff] %vm2026_vm3, %v2662_v42  ;;  %v2660_v41 = vpop.permute.xlu0 %2659 }
 0x3d8   : > { %3191 = vst.msk [vmem:[%s5296_s19 + $0x5b0] sm:$0xff] %vm2026_vm3, %v2660_v41 }
 0x3da   : > { %v2666_v20 = vpop.permute.xlu1 %2665 }
 0x3db   : > { %3194 = vst.msk [vmem:[%s5296_s19 + $0x5d8] sm:$0xff] %vm2026_vm3, %v2666_v20  ;;  %v2664_v4 = vpop.permute.xlu0 %2663 }
 0x3dc   : > { %3193 = vst.msk [vmem:[%s5296_s19 + $0x5d0] sm:$0xff] %vm2026_vm3, %v2664_v4 }
 0x3de   : > { %v2670_v63 = vpop.permute.xlu1 %2669 }
 0x3df   : > { %3196 = vst.msk [vmem:[%s5296_s19 + $0x5f8] sm:$0xff] %vm2026_vm3, %v2670_v63  ;;  %v2668_v37 = vpop.permute.xlu0 %2667 }
 0x3e0   : > { %3195 = vst.msk [vmem:[%s5296_s19 + $0x5f0] sm:$0xff] %vm2026_vm3, %v2668_v37 }
 0x3e1 PF: > { %s14_s12 = sadd.s32 1, %s3927_s12  }
 0x3e2   : > { %p11_p2 = scmp.ge.s32.totalorder %s14_s12, 4  }
 0x3e4   :  { %13 = sbr.rel (!%p11_p2) target bundleno = 1 (0x1), region = 74 }
 0x3eb   :  { %2757 = vsyncpa [#allocation3], 1 }
 0x3ec   :  { %2759 = vsyncpa [#allocation3 + $0x1], 1 }

</bundles_post_ra>
